<compile_context>
chip_gen: v7x
topology: tpu7x:2x2x1
jax: 0.10.0
libtpu: 0.0.40
codegen_flags: <defaults>
</compile_context>

<pallas_src>
import jax
import jax.numpy as jnp
from jax import lax
from jax.experimental import pallas as pl
from jax.experimental.pallas import tpu as pltpu


def _round_up(x, m):
    return ((x + m - 1) // m) * m


def _make_nsloss_kernel(B_true, TB, SUB, K, Dp):
    """Builds the per-grid-step kernel. B_true/TB/SUB/K/Dp are static."""

    def kernel(uid_ref, pid_ref, nid_ref,          # scalar-prefetch ids (SMEM)
               user_hbm, book_hbm,                  # embedding tables (HBM, pl.ANY)
               out_ref,                             # output (1, 8, 128) VMEM
               u_buf, pn_buf, sems):                # scratch (double-buffered)
        outer_base = pl.program_id(0) * (SUB * TB)

        def fetch(sub, slot):
            # Gather one sub-tile of rows (user + pos + K negs), HBM -> VMEM.
            base = outer_base + sub * TB
            for i in range(TB):
                row = base + i
                pltpu.make_async_copy(user_hbm.at[uid_ref[row]],
                                      u_buf.at[slot, i],
                                      sems.at[slot, i]).start()
                pltpu.make_async_copy(book_hbm.at[pid_ref[row]],
                                      pn_buf.at[slot, i, 0],
                                      sems.at[slot, i]).start()
                for k in range(K):
                    pltpu.make_async_copy(book_hbm.at[nid_ref[row * K + k]],
                                          pn_buf.at[slot, i, k + 1],
                                          sems.at[slot, i]).start()

        def wait(slot):
            # All K+2 copies per (slot, row) share one DMA semaphore and have
            # identical sizes, so waiting each descriptor once drains it.
            for i in range(TB):
                pltpu.make_async_copy(user_hbm.at[0], u_buf.at[slot, i],
                                      sems.at[slot, i]).wait()
                pltpu.make_async_copy(book_hbm.at[0], pn_buf.at[slot, i, 0],
                                      sems.at[slot, i]).wait()
                for k in range(K):
                    pltpu.make_async_copy(book_hbm.at[0],
                                          pn_buf.at[slot, i, k + 1],
                                          sems.at[slot, i]).wait()

        fetch(0, 0)                                   # prime slot 0
        out_ref[...] = jnp.zeros_like(out_ref)

        for s in range(SUB):                          # static, fully unrolled
            slot = s % 2
            wait(slot)
            if s + 1 < SUB:
                fetch(s + 1, 1 - slot)                # overlap next gather w/ compute

            # ---- compute on the current sub-tile ----------------------------
            u = u_buf[slot]                           # (TB, Dp)
            pn = pn_buf[slot]                         # (TB, K+1, Dp)
            # single fused multiply + cross-lane reduce for pos (slot 0) + negs
            dots = jnp.sum(pn * u[:, None, :], axis=-1)       # (TB, K+1)
            col = lax.broadcasted_iota(jnp.int32, (TB, K + 1), 1)
            signed = jnp.where(col == 0, dots, -dots)          # +score / -score
            # kept in the module's exact form (see header note)
            ls = jnp.log(jax.nn.sigmoid(signed) + 1e-10)       # (TB, K+1)
            per_row = -jnp.sum(ls, axis=-1, keepdims=True)     # (TB, 1)

            # mask rows that only exist because the batch was padded
            rows = (outer_base + s * TB
                    + lax.broadcasted_iota(jnp.int32, (TB, 1), 0))
            per_row = jnp.where(rows < B_true, per_row, 0.0)

            out_ref[...] += jnp.sum(per_row)          # lane-dense slab accumulate

    return kernel


def user_book2vec_forward(user_embed, book_embed, user_ids, pos_book_ids,
                          neg_book_ids, *, tile_rows=8, inner_steps=4):
    """Forward pass of UserBook2Vec: returns the scalar SGNS loss."""
    B = int(user_ids.shape[0])
    K = int(neg_book_ids.shape[1])
    D = int(user_embed.shape[1])

    Dp = _round_up(D, 128)                       # lane-dense embedding dim
    TB = max(1, min(int(tile_rows), B))          # rows per gather sub-tile
    SUB = max(1, min(int(inner_steps), -(-B // TB)))   # sub-tiles per grid step
    rows_per_step = TB * SUB
    num_steps = -(-B // rows_per_step)           # ceil
    Bp = num_steps * rows_per_step

    user_embed = user_embed.astype(jnp.float32)
    book_embed = book_embed.astype(jnp.float32)
    # zero-pad D once (padded lanes contribute 0 to every dot product)
    if Dp != D:
        user_embed = jnp.pad(user_embed, ((0, 0), (0, Dp - D)))
        book_embed = jnp.pad(book_embed, ((0, 0), (0, Dp - D)))

    uid = user_ids.astype(jnp.int32)
    pid = pos_book_ids.astype(jnp.int32)
    nid = neg_book_ids.reshape(-1).astype(jnp.int32)
    if Bp != B:
        uid = jnp.pad(uid, (0, Bp - B))
        pid = jnp.pad(pid, (0, Bp - B))
        nid = jnp.pad(nid, (0, (Bp - B) * K))

    kernel = _make_nsloss_kernel(B, TB, SUB, K, Dp)

    cost = pl.CostEstimate(
        flops=2 * B * (K + 1) * Dp,
        transcendentals=2 * B * (K + 1),
        bytes_accessed=4 * (Bp * (K + 2) * Dp + Bp * (K + 2)
                            + num_steps * 8 * 128),
    )

    partials = pl.pallas_call(
        kernel,
        out_shape=jax.ShapeDtypeStruct((num_steps, 8, 128), jnp.float32),
        grid_spec=pltpu.PrefetchScalarGridSpec(
            num_scalar_prefetch=3,
            grid=(num_steps,),
            in_specs=[
                pl.BlockSpec(memory_space=pl.ANY),   # user embedding table (HBM)
                pl.BlockSpec(memory_space=pl.ANY),   # book embedding table (HBM)
            ],
            out_specs=pl.BlockSpec((1, 8, 128),
                                   lambda t, uid_sm, pid_sm, nid_sm: (t, 0, 0)),
            scratch_shapes=[
                pltpu.VMEM((2, TB, Dp), jnp.float32),          # user rows (2 slots)
                pltpu.VMEM((2, TB, K + 1, Dp), jnp.float32),   # pos+neg rows (2 slots)
                pltpu.SemaphoreType.DMA((2, TB)),              # one sem per (slot,row)
            ],
        ),
        compiler_params=pltpu.CompilerParams(
            dimension_semantics=("parallel",)),
        cost_estimate=cost,
    )(uid, pid, nid, user_embed, book_embed)

    # per-step partial sums -> mean over the TRUE batch size
    return jnp.sum(partials[:, 0, 0]) / B


def _reference_forward(user_embed, book_embed, user_ids, pos_book_ids,
                       neg_book_ids):
    user_vec = user_embed[user_ids]
    pos_vec = book_embed[pos_book_ids]
    neg_vec = book_embed[neg_book_ids]
    pos_score = jnp.sum(user_vec * pos_vec, axis=1)
    pos_score = jnp.log(jax.nn.sigmoid(pos_score) + 1e-10)
    neg_score = jnp.einsum('bkd,bd->bk', neg_vec, user_vec)
    neg_score = jnp.log(jax.nn.sigmoid(-neg_score) + 1e-10)
    neg_score = jnp.sum(neg_score, axis=1)
    return jnp.mean(-(pos_score + neg_score))


if __name__ == "__main__":
    # Module defaults: embedding_dim=50, num_negatives=5, batch_size=4
    num_users = 16
    vocab_size = 32
    embedding_dim = 50
    num_negatives = 5

    key = jax.random.PRNGKey(0)
    k_u, k_b, k_uid, k_pos, k_neg = jax.random.split(key, 5)

    # nn.Embedding default init: N(0, 1)
    user_embed = jax.random.normal(k_u, (num_users, embedding_dim), dtype=jnp.float32)
    book_embed = jax.random.normal(k_b, (vocab_size, embedding_dim), dtype=jnp.float32)

    # --- case 1: module default batch (single step, single sub-tile) --------
    batch_size = 4
    user_ids = jax.random.randint(k_uid, (batch_size,), 0, num_users)
    pos_book_ids = jax.random.randint(k_pos, (batch_size,), 0, vocab_size)
    neg_book_ids = jax.random.randint(k_neg, (batch_size, num_negatives), 0, vocab_size)

    loss = user_book2vec_forward(user_embed, book_embed,
                                 user_ids, pos_book_ids, neg_book_ids)
    jax.block_until_ready(loss)
    ref = _reference_forward(user_embed, book_embed,
                             user_ids, pos_book_ids, neg_book_ids)
    assert jnp.allclose(loss, ref, rtol=1e-5, atol=1e-5), (loss, ref)

    # --- case 2: multi-sub-tile batch with padding/masking exercised --------
    batch_size2 = 10
    k_uid2, k_pos2, k_neg2 = jax.random.split(jax.random.PRNGKey(1), 3)
    user_ids2 = jax.random.randint(k_uid2, (batch_size2,), 0, num_users)
    pos_book_ids2 = jax.random.randint(k_pos2, (batch_size2,), 0, vocab_size)
    neg_book_ids2 = jax.random.randint(k_neg2, (batch_size2, num_negatives), 0, vocab_size)

    loss2 = user_book2vec_forward(user_embed, book_embed,
                                  user_ids2, pos_book_ids2, neg_book_ids2)
    jax.block_until_ready(loss2)
    ref2 = _reference_forward(user_embed, book_embed,
                              user_ids2, pos_book_ids2, neg_book_ids2)
    assert jnp.allclose(loss2, ref2, rtol=1e-5, atol=1e-5), (loss2, ref2)

    print("KERNEL_OK")
</pallas_src>

<mosaic_0001>
module attributes {stable_mosaic.version = 11 : i64} {
  func.func @kernel(%arg0: i32, %arg1: memref<4xi32, #tpu.memory_space<smem>>, %arg2: memref<4xi32, #tpu.memory_space<smem>>, %arg3: memref<20xi32, #tpu.memory_space<smem>>, %arg4: memref<16x128xf32, #tpu.memory_space<any>>, %arg5: memref<32x128xf32, #tpu.memory_space<any>>, %arg6: memref<1x8x128xf32, #tpu.memory_space<vmem>>, %arg7: memref<2x4x128xf32, #tpu.memory_space<vmem>>, %arg8: memref<2x4x6x128xf32, #tpu.memory_space<vmem>>, %arg9: memref<2x4x!tpu.dma_semaphore, #tpu.memory_space<semaphore_mem>>) attributes {dimension_semantics = [#tpu.dimension_semantics<parallel>], iteration_bounds = array<i64: 1>, scalar_prefetch = 3 : i64, scratch_operands = 3 : i64, tpu.core_type = #tpu.core_type<tc>, window_params = [{}, {}, {transform_indices = @transform_2, window_bounds = array<i64: 1, 8, 128>}]} {
    %c4_i32 = arith.constant 4 : i32
    %0 = arith.muli %arg0, %c4_i32 : i32
    %c0_i32 = arith.constant 0 : i32
    %1 = arith.addi %0, %c0_i32 : i32
    %c0_i32_0 = arith.constant 0 : i32
    %2 = arith.addi %1, %c0_i32_0 : i32
    %3 = arith.index_cast %2 : i32 to index
    %4 = memref.load %arg1[%3] : memref<4xi32, #tpu.memory_space<smem>>
    %c0_i32_1 = arith.constant 0 : i32
    %c0_i32_2 = arith.constant 0 : i32
    %c0_i32_3 = arith.constant 0 : i32
    %c0_i32_4 = arith.constant 0 : i32
    %c0_i32_5 = arith.constant 0 : i32
    %5 = tpu.memref_slice %arg4[%4, %c0_i32_5] : memref<16x128xf32, #tpu.memory_space<any>> -> memref<1x128xf32, #tpu.memory_space<any>>
    %6 = tpu.memref_squeeze %5 : memref<1x128xf32, #tpu.memory_space<any>> -> memref<128xf32, #tpu.memory_space<any>>
    %c0_i32_6 = arith.constant 0 : i32
    %7 = tpu.memref_slice %arg7[%c0_i32_1, %c0_i32_2, %c0_i32_6] : memref<2x4x128xf32, #tpu.memory_space<vmem>> -> memref<1x1x128xf32, #tpu.memory_space<vmem>>
    %8 = tpu.memref_squeeze %7 : memref<1x1x128xf32, #tpu.memory_space<vmem>> -> memref<128xf32, #tpu.memory_space<vmem>>
    %9 = tpu.memref_slice %arg9[%c0_i32_3, %c0_i32_4] : memref<2x4x!tpu.dma_semaphore, #tpu.memory_space<semaphore_mem>> -> memref<1x1x!tpu.dma_semaphore, #tpu.memory_space<semaphore_mem>>
    %10 = tpu.memref_squeeze %9 : memref<1x1x!tpu.dma_semaphore, #tpu.memory_space<semaphore_mem>> -> memref<!tpu.dma_semaphore, #tpu.memory_space<semaphore_mem>>
    tpu.enqueue_dma source(%6 : memref<128xf32, #tpu.memory_space<any>>) target(%8 : memref<128xf32, #tpu.memory_space<vmem>>) target_semaphore(%10 : memref<!tpu.dma_semaphore, #tpu.memory_space<semaphore_mem>>)
    %11 = arith.index_cast %2 : i32 to index
    %12 = memref.load %arg2[%11] : memref<4xi32, #tpu.memory_space<smem>>
    %c0_i32_7 = arith.constant 0 : i32
    %c0_i32_8 = arith.constant 0 : i32
    %c0_i32_9 = arith.constant 0 : i32
    %c0_i32_10 = arith.constant 0 : i32
    %c0_i32_11 = arith.constant 0 : i32
    %c0_i32_12 = arith.constant 0 : i32
    %13 = tpu.memref_slice %arg5[%12, %c0_i32_12] : memref<32x128xf32, #tpu.memory_space<any>> -> memref<1x128xf32, #tpu.memory_space<any>>
    %14 = tpu.memref_squeeze %13 : memref<1x128xf32, #tpu.memory_space<any>> -> memref<128xf32, #tpu.memory_space<any>>
    %c0_i32_13 = arith.constant 0 : i32
    %15 = tpu.memref_slice %arg8[%c0_i32_7, %c0_i32_8, %c0_i32_9, %c0_i32_13] : memref<2x4x6x128xf32, #tpu.memory_space<vmem>> -> memref<1x1x1x128xf32, #tpu.memory_space<vmem>>
    %16 = tpu.memref_squeeze %15 : memref<1x1x1x128xf32, #tpu.memory_space<vmem>> -> memref<128xf32, #tpu.memory_space<vmem>>
    %17 = tpu.memref_slice %arg9[%c0_i32_10, %c0_i32_11] : memref<2x4x!tpu.dma_semaphore, #tpu.memory_space<semaphore_mem>> -> memref<1x1x!tpu.dma_semaphore, #tpu.memory_space<semaphore_mem>>
    %18 = tpu.memref_squeeze %17 : memref<1x1x!tpu.dma_semaphore, #tpu.memory_space<semaphore_mem>> -> memref<!tpu.dma_semaphore, #tpu.memory_space<semaphore_mem>>
    tpu.enqueue_dma source(%14 : memref<128xf32, #tpu.memory_space<any>>) target(%16 : memref<128xf32, #tpu.memory_space<vmem>>) target_semaphore(%18 : memref<!tpu.dma_semaphore, #tpu.memory_space<semaphore_mem>>)
    %c5_i32 = arith.constant 5 : i32
    %19 = arith.muli %2, %c5_i32 : i32
    %c0_i32_14 = arith.constant 0 : i32
    %20 = arith.addi %19, %c0_i32_14 : i32
    %21 = arith.index_cast %20 : i32 to index
    %22 = memref.load %arg3[%21] : memref<20xi32, #tpu.memory_space<smem>>
    %c0_i32_15 = arith.constant 0 : i32
    %c0_i32_16 = arith.constant 0 : i32
    %c1_i32 = arith.constant 1 : i32
    %c0_i32_17 = arith.constant 0 : i32
    %c0_i32_18 = arith.constant 0 : i32
    %c0_i32_19 = arith.constant 0 : i32
    %23 = tpu.memref_slice %arg5[%22, %c0_i32_19] : memref<32x128xf32, #tpu.memory_space<any>> -> memref<1x128xf32, #tpu.memory_space<any>>
    %24 = tpu.memref_squeeze %23 : memref<1x128xf32, #tpu.memory_space<any>> -> memref<128xf32, #tpu.memory_space<any>>
    %c0_i32_20 = arith.constant 0 : i32
    %25 = tpu.memref_slice %arg8[%c0_i32_15, %c0_i32_16, %c1_i32, %c0_i32_20] : memref<2x4x6x128xf32, #tpu.memory_space<vmem>> -> memref<1x1x1x128xf32, #tpu.memory_space<vmem>>
    %26 = tpu.memref_squeeze %25 : memref<1x1x1x128xf32, #tpu.memory_space<vmem>> -> memref<128xf32, #tpu.memory_space<vmem>>
    %27 = tpu.memref_slice %arg9[%c0_i32_17, %c0_i32_18] : memref<2x4x!tpu.dma_semaphore, #tpu.memory_space<semaphore_mem>> -> memref<1x1x!tpu.dma_semaphore, #tpu.memory_space<semaphore_mem>>
    %28 = tpu.memref_squeeze %27 : memref<1x1x!tpu.dma_semaphore, #tpu.memory_space<semaphore_mem>> -> memref<!tpu.dma_semaphore, #tpu.memory_space<semaphore_mem>>
    tpu.enqueue_dma source(%24 : memref<128xf32, #tpu.memory_space<any>>) target(%26 : memref<128xf32, #tpu.memory_space<vmem>>) target_semaphore(%28 : memref<!tpu.dma_semaphore, #tpu.memory_space<semaphore_mem>>)
    %c5_i32_21 = arith.constant 5 : i32
    %29 = arith.muli %2, %c5_i32_21 : i32
    %c1_i32_22 = arith.constant 1 : i32
    %30 = arith.addi %29, %c1_i32_22 : i32
    %31 = arith.index_cast %30 : i32 to index
    %32 = memref.load %arg3[%31] : memref<20xi32, #tpu.memory_space<smem>>
    %c0_i32_23 = arith.constant 0 : i32
    %c0_i32_24 = arith.constant 0 : i32
    %c2_i32 = arith.constant 2 : i32
    %c0_i32_25 = arith.constant 0 : i32
    %c0_i32_26 = arith.constant 0 : i32
    %c0_i32_27 = arith.constant 0 : i32
    %33 = tpu.memref_slice %arg5[%32, %c0_i32_27] : memref<32x128xf32, #tpu.memory_space<any>> -> memref<1x128xf32, #tpu.memory_space<any>>
    %34 = tpu.memref_squeeze %33 : memref<1x128xf32, #tpu.memory_space<any>> -> memref<128xf32, #tpu.memory_space<any>>
    %c0_i32_28 = arith.constant 0 : i32
    %35 = tpu.memref_slice %arg8[%c0_i32_23, %c0_i32_24, %c2_i32, %c0_i32_28] : memref<2x4x6x128xf32, #tpu.memory_space<vmem>> -> memref<1x1x1x128xf32, #tpu.memory_space<vmem>>
    %36 = tpu.memref_squeeze %35 : memref<1x1x1x128xf32, #tpu.memory_space<vmem>> -> memref<128xf32, #tpu.memory_space<vmem>>
    %37 = tpu.memref_slice %arg9[%c0_i32_25, %c0_i32_26] : memref<2x4x!tpu.dma_semaphore, #tpu.memory_space<semaphore_mem>> -> memref<1x1x!tpu.dma_semaphore, #tpu.memory_space<semaphore_mem>>
    %38 = tpu.memref_squeeze %37 : memref<1x1x!tpu.dma_semaphore, #tpu.memory_space<semaphore_mem>> -> memref<!tpu.dma_semaphore, #tpu.memory_space<semaphore_mem>>
    tpu.enqueue_dma source(%34 : memref<128xf32, #tpu.memory_space<any>>) target(%36 : memref<128xf32, #tpu.memory_space<vmem>>) target_semaphore(%38 : memref<!tpu.dma_semaphore, #tpu.memory_space<semaphore_mem>>)
    %c5_i32_29 = arith.constant 5 : i32
    %39 = arith.muli %2, %c5_i32_29 : i32
    %c2_i32_30 = arith.constant 2 : i32
    %40 = arith.addi %39, %c2_i32_30 : i32
    %41 = arith.index_cast %40 : i32 to index
    %42 = memref.load %arg3[%41] : memref<20xi32, #tpu.memory_space<smem>>
    %c0_i32_31 = arith.constant 0 : i32
    %c0_i32_32 = arith.constant 0 : i32
    %c3_i32 = arith.constant 3 : i32
    %c0_i32_33 = arith.constant 0 : i32
    %c0_i32_34 = arith.constant 0 : i32
    %c0_i32_35 = arith.constant 0 : i32
    %43 = tpu.memref_slice %arg5[%42, %c0_i32_35] : memref<32x128xf32, #tpu.memory_space<any>> -> memref<1x128xf32, #tpu.memory_space<any>>
    %44 = tpu.memref_squeeze %43 : memref<1x128xf32, #tpu.memory_space<any>> -> memref<128xf32, #tpu.memory_space<any>>
    %c0_i32_36 = arith.constant 0 : i32
    %45 = tpu.memref_slice %arg8[%c0_i32_31, %c0_i32_32, %c3_i32, %c0_i32_36] : memref<2x4x6x128xf32, #tpu.memory_space<vmem>> -> memref<1x1x1x128xf32, #tpu.memory_space<vmem>>
    %46 = tpu.memref_squeeze %45 : memref<1x1x1x128xf32, #tpu.memory_space<vmem>> -> memref<128xf32, #tpu.memory_space<vmem>>
    %47 = tpu.memref_slice %arg9[%c0_i32_33, %c0_i32_34] : memref<2x4x!tpu.dma_semaphore, #tpu.memory_space<semaphore_mem>> -> memref<1x1x!tpu.dma_semaphore, #tpu.memory_space<semaphore_mem>>
    %48 = tpu.memref_squeeze %47 : memref<1x1x!tpu.dma_semaphore, #tpu.memory_space<semaphore_mem>> -> memref<!tpu.dma_semaphore, #tpu.memory_space<semaphore_mem>>
    tpu.enqueue_dma source(%44 : memref<128xf32, #tpu.memory_space<any>>) target(%46 : memref<128xf32, #tpu.memory_space<vmem>>) target_semaphore(%48 : memref<!tpu.dma_semaphore, #tpu.memory_space<semaphore_mem>>)
    %c5_i32_37 = arith.constant 5 : i32
    %49 = arith.muli %2, %c5_i32_37 : i32
    %c3_i32_38 = arith.constant 3 : i32
    %50 = arith.addi %49, %c3_i32_38 : i32
    %51 = arith.index_cast %50 : i32 to index
    %52 = memref.load %arg3[%51] : memref<20xi32, #tpu.memory_space<smem>>
    %c0_i32_39 = arith.constant 0 : i32
    %c0_i32_40 = arith.constant 0 : i32
    %c4_i32_41 = arith.constant 4 : i32
    %c0_i32_42 = arith.constant 0 : i32
    %c0_i32_43 = arith.constant 0 : i32
    %c0_i32_44 = arith.constant 0 : i32
    %53 = tpu.memref_slice %arg5[%52, %c0_i32_44] : memref<32x128xf32, #tpu.memory_space<any>> -> memref<1x128xf32, #tpu.memory_space<any>>
    %54 = tpu.memref_squeeze %53 : memref<1x128xf32, #tpu.memory_space<any>> -> memref<128xf32, #tpu.memory_space<any>>
    %c0_i32_45 = arith.constant 0 : i32
    %55 = tpu.memref_slice %arg8[%c0_i32_39, %c0_i32_40, %c4_i32_41, %c0_i32_45] : memref<2x4x6x128xf32, #tpu.memory_space<vmem>> -> memref<1x1x1x128xf32, #tpu.memory_space<vmem>>
    %56 = tpu.memref_squeeze %55 : memref<1x1x1x128xf32, #tpu.memory_space<vmem>> -> memref<128xf32, #tpu.memory_space<vmem>>
    %57 = tpu.memref_slice %arg9[%c0_i32_42, %c0_i32_43] : memref<2x4x!tpu.dma_semaphore, #tpu.memory_space<semaphore_mem>> -> memref<1x1x!tpu.dma_semaphore, #tpu.memory_space<semaphore_mem>>
    %58 = tpu.memref_squeeze %57 : memref<1x1x!tpu.dma_semaphore, #tpu.memory_space<semaphore_mem>> -> memref<!tpu.dma_semaphore, #tpu.memory_space<semaphore_mem>>
    tpu.enqueue_dma source(%54 : memref<128xf32, #tpu.memory_space<any>>) target(%56 : memref<128xf32, #tpu.memory_space<vmem>>) target_semaphore(%58 : memref<!tpu.dma_semaphore, #tpu.memory_space<semaphore_mem>>)
    %c5_i32_46 = arith.constant 5 : i32
    %59 = arith.muli %2, %c5_i32_46 : i32
    %c4_i32_47 = arith.constant 4 : i32
    %60 = arith.addi %59, %c4_i32_47 : i32
    %61 = arith.index_cast %60 : i32 to index
    %62 = memref.load %arg3[%61] : memref<20xi32, #tpu.memory_space<smem>>
    %c0_i32_48 = arith.constant 0 : i32
    %c0_i32_49 = arith.constant 0 : i32
    %c5_i32_50 = arith.constant 5 : i32
    %c0_i32_51 = arith.constant 0 : i32
    %c0_i32_52 = arith.constant 0 : i32
    %c0_i32_53 = arith.constant 0 : i32
    %63 = tpu.memref_slice %arg5[%62, %c0_i32_53] : memref<32x128xf32, #tpu.memory_space<any>> -> memref<1x128xf32, #tpu.memory_space<any>>
    %64 = tpu.memref_squeeze %63 : memref<1x128xf32, #tpu.memory_space<any>> -> memref<128xf32, #tpu.memory_space<any>>
    %c0_i32_54 = arith.constant 0 : i32
    %65 = tpu.memref_slice %arg8[%c0_i32_48, %c0_i32_49, %c5_i32_50, %c0_i32_54] : memref<2x4x6x128xf32, #tpu.memory_space<vmem>> -> memref<1x1x1x128xf32, #tpu.memory_space<vmem>>
    %66 = tpu.memref_squeeze %65 : memref<1x1x1x128xf32, #tpu.memory_space<vmem>> -> memref<128xf32, #tpu.memory_space<vmem>>
    %67 = tpu.memref_slice %arg9[%c0_i32_51, %c0_i32_52] : memref<2x4x!tpu.dma_semaphore, #tpu.memory_space<semaphore_mem>> -> memref<1x1x!tpu.dma_semaphore, #tpu.memory_space<semaphore_mem>>
    %68 = tpu.memref_squeeze %67 : memref<1x1x!tpu.dma_semaphore, #tpu.memory_space<semaphore_mem>> -> memref<!tpu.dma_semaphore, #tpu.memory_space<semaphore_mem>>
    tpu.enqueue_dma source(%64 : memref<128xf32, #tpu.memory_space<any>>) target(%66 : memref<128xf32, #tpu.memory_space<vmem>>) target_semaphore(%68 : memref<!tpu.dma_semaphore, #tpu.memory_space<semaphore_mem>>)
    %c1_i32_55 = arith.constant 1 : i32
    %69 = arith.addi %1, %c1_i32_55 : i32
    %70 = arith.index_cast %69 : i32 to index
    %71 = memref.load %arg1[%70] : memref<4xi32, #tpu.memory_space<smem>>
    %c0_i32_56 = arith.constant 0 : i32
    %c1_i32_57 = arith.constant 1 : i32
    %c0_i32_58 = arith.constant 0 : i32
    %c1_i32_59 = arith.constant 1 : i32
    %c0_i32_60 = arith.constant 0 : i32
    %72 = tpu.memref_slice %arg4[%71, %c0_i32_60] : memref<16x128xf32, #tpu.memory_space<any>> -> memref<1x128xf32, #tpu.memory_space<any>>
    %73 = tpu.memref_squeeze %72 : memref<1x128xf32, #tpu.memory_space<any>> -> memref<128xf32, #tpu.memory_space<any>>
    %c0_i32_61 = arith.constant 0 : i32
    %74 = tpu.memref_slice %arg7[%c0_i32_56, %c1_i32_57, %c0_i32_61] : memref<2x4x128xf32, #tpu.memory_space<vmem>> -> memref<1x1x128xf32, #tpu.memory_space<vmem>>
    %75 = tpu.memref_squeeze %74 : memref<1x1x128xf32, #tpu.memory_space<vmem>> -> memref<128xf32, #tpu.memory_space<vmem>>
    %76 = tpu.memref_slice %arg9[%c0_i32_58, %c1_i32_59] : memref<2x4x!tpu.dma_semaphore, #tpu.memory_space<semaphore_mem>> -> memref<1x1x!tpu.dma_semaphore, #tpu.memory_space<semaphore_mem>>
    %77 = tpu.memref_squeeze %76 : memref<1x1x!tpu.dma_semaphore, #tpu.memory_space<semaphore_mem>> -> memref<!tpu.dma_semaphore, #tpu.memory_space<semaphore_mem>>
    tpu.enqueue_dma source(%73 : memref<128xf32, #tpu.memory_space<any>>) target(%75 : memref<128xf32, #tpu.memory_space<vmem>>) target_semaphore(%77 : memref<!tpu.dma_semaphore, #tpu.memory_space<semaphore_mem>>)
    %78 = arith.index_cast %69 : i32 to index
    %79 = memref.load %arg2[%78] : memref<4xi32, #tpu.memory_space<smem>>
    %c0_i32_62 = arith.constant 0 : i32
    %c1_i32_63 = arith.constant 1 : i32
    %c0_i32_64 = arith.constant 0 : i32
    %c0_i32_65 = arith.constant 0 : i32
    %c1_i32_66 = arith.constant 1 : i32
    %c0_i32_67 = arith.constant 0 : i32
    %80 = tpu.memref_slice %arg5[%79, %c0_i32_67] : memref<32x128xf32, #tpu.memory_space<any>> -> memref<1x128xf32, #tpu.memory_space<any>>
    %81 = tpu.memref_squeeze %80 : memref<1x128xf32, #tpu.memory_space<any>> -> memref<128xf32, #tpu.memory_space<any>>
    %c0_i32_68 = arith.constant 0 : i32
    %82 = tpu.memref_slice %arg8[%c0_i32_62, %c1_i32_63, %c0_i32_64, %c0_i32_68] : memref<2x4x6x128xf32, #tpu.memory_space<vmem>> -> memref<1x1x1x128xf32, #tpu.memory_space<vmem>>
    %83 = tpu.memref_squeeze %82 : memref<1x1x1x128xf32, #tpu.memory_space<vmem>> -> memref<128xf32, #tpu.memory_space<vmem>>
    %84 = tpu.memref_slice %arg9[%c0_i32_65, %c1_i32_66] : memref<2x4x!tpu.dma_semaphore, #tpu.memory_space<semaphore_mem>> -> memref<1x1x!tpu.dma_semaphore, #tpu.memory_space<semaphore_mem>>
    %85 = tpu.memref_squeeze %84 : memref<1x1x!tpu.dma_semaphore, #tpu.memory_space<semaphore_mem>> -> memref<!tpu.dma_semaphore, #tpu.memory_space<semaphore_mem>>
    tpu.enqueue_dma source(%81 : memref<128xf32, #tpu.memory_space<any>>) target(%83 : memref<128xf32, #tpu.memory_space<vmem>>) target_semaphore(%85 : memref<!tpu.dma_semaphore, #tpu.memory_space<semaphore_mem>>)
    %c5_i32_69 = arith.constant 5 : i32
    %86 = arith.muli %69, %c5_i32_69 : i32
    %c0_i32_70 = arith.constant 0 : i32
    %87 = arith.addi %86, %c0_i32_70 : i32
    %88 = arith.index_cast %87 : i32 to index
    %89 = memref.load %arg3[%88] : memref<20xi32, #tpu.memory_space<smem>>
    %c0_i32_71 = arith.constant 0 : i32
    %c1_i32_72 = arith.constant 1 : i32
    %c1_i32_73 = arith.constant 1 : i32
    %c0_i32_74 = arith.constant 0 : i32
    %c1_i32_75 = arith.constant 1 : i32
    %c0_i32_76 = arith.constant 0 : i32
    %90 = tpu.memref_slice %arg5[%89, %c0_i32_76] : memref<32x128xf32, #tpu.memory_space<any>> -> memref<1x128xf32, #tpu.memory_space<any>>
    %91 = tpu.memref_squeeze %90 : memref<1x128xf32, #tpu.memory_space<any>> -> memref<128xf32, #tpu.memory_space<any>>
    %c0_i32_77 = arith.constant 0 : i32
    %92 = tpu.memref_slice %arg8[%c0_i32_71, %c1_i32_72, %c1_i32_73, %c0_i32_77] : memref<2x4x6x128xf32, #tpu.memory_space<vmem>> -> memref<1x1x1x128xf32, #tpu.memory_space<vmem>>
    %93 = tpu.memref_squeeze %92 : memref<1x1x1x128xf32, #tpu.memory_space<vmem>> -> memref<128xf32, #tpu.memory_space<vmem>>
    %94 = tpu.memref_slice %arg9[%c0_i32_74, %c1_i32_75] : memref<2x4x!tpu.dma_semaphore, #tpu.memory_space<semaphore_mem>> -> memref<1x1x!tpu.dma_semaphore, #tpu.memory_space<semaphore_mem>>
    %95 = tpu.memref_squeeze %94 : memref<1x1x!tpu.dma_semaphore, #tpu.memory_space<semaphore_mem>> -> memref<!tpu.dma_semaphore, #tpu.memory_space<semaphore_mem>>
    tpu.enqueue_dma source(%91 : memref<128xf32, #tpu.memory_space<any>>) target(%93 : memref<128xf32, #tpu.memory_space<vmem>>) target_semaphore(%95 : memref<!tpu.dma_semaphore, #tpu.memory_space<semaphore_mem>>)
    %c5_i32_78 = arith.constant 5 : i32
    %96 = arith.muli %69, %c5_i32_78 : i32
    %c1_i32_79 = arith.constant 1 : i32
    %97 = arith.addi %96, %c1_i32_79 : i32
    %98 = arith.index_cast %97 : i32 to index
    %99 = memref.load %arg3[%98] : memref<20xi32, #tpu.memory_space<smem>>
    %c0_i32_80 = arith.constant 0 : i32
    %c1_i32_81 = arith.constant 1 : i32
    %c2_i32_82 = arith.constant 2 : i32
    %c0_i32_83 = arith.constant 0 : i32
    %c1_i32_84 = arith.constant 1 : i32
    %c0_i32_85 = arith.constant 0 : i32
    %100 = tpu.memref_slice %arg5[%99, %c0_i32_85] : memref<32x128xf32, #tpu.memory_space<any>> -> memref<1x128xf32, #tpu.memory_space<any>>
    %101 = tpu.memref_squeeze %100 : memref<1x128xf32, #tpu.memory_space<any>> -> memref<128xf32, #tpu.memory_space<any>>
    %c0_i32_86 = arith.constant 0 : i32
    %102 = tpu.memref_slice %arg8[%c0_i32_80, %c1_i32_81, %c2_i32_82, %c0_i32_86] : memref<2x4x6x128xf32, #tpu.memory_space<vmem>> -> memref<1x1x1x128xf32, #tpu.memory_space<vmem>>
    %103 = tpu.memref_squeeze %102 : memref<1x1x1x128xf32, #tpu.memory_space<vmem>> -> memref<128xf32, #tpu.memory_space<vmem>>
    %104 = tpu.memref_slice %arg9[%c0_i32_83, %c1_i32_84] : memref<2x4x!tpu.dma_semaphore, #tpu.memory_space<semaphore_mem>> -> memref<1x1x!tpu.dma_semaphore, #tpu.memory_space<semaphore_mem>>
    %105 = tpu.memref_squeeze %104 : memref<1x1x!tpu.dma_semaphore, #tpu.memory_space<semaphore_mem>> -> memref<!tpu.dma_semaphore, #tpu.memory_space<semaphore_mem>>
    tpu.enqueue_dma source(%101 : memref<128xf32, #tpu.memory_space<any>>) target(%103 : memref<128xf32, #tpu.memory_space<vmem>>) target_semaphore(%105 : memref<!tpu.dma_semaphore, #tpu.memory_space<semaphore_mem>>)
    %c5_i32_87 = arith.constant 5 : i32
    %106 = arith.muli %69, %c5_i32_87 : i32
    %c2_i32_88 = arith.constant 2 : i32
    %107 = arith.addi %106, %c2_i32_88 : i32
    %108 = arith.index_cast %107 : i32 to index
    %109 = memref.load %arg3[%108] : memref<20xi32, #tpu.memory_space<smem>>
    %c0_i32_89 = arith.constant 0 : i32
    %c1_i32_90 = arith.constant 1 : i32
    %c3_i32_91 = arith.constant 3 : i32
    %c0_i32_92 = arith.constant 0 : i32
    %c1_i32_93 = arith.constant 1 : i32
    %c0_i32_94 = arith.constant 0 : i32
    %110 = tpu.memref_slice %arg5[%109, %c0_i32_94] : memref<32x128xf32, #tpu.memory_space<any>> -> memref<1x128xf32, #tpu.memory_space<any>>
    %111 = tpu.memref_squeeze %110 : memref<1x128xf32, #tpu.memory_space<any>> -> memref<128xf32, #tpu.memory_space<any>>
    %c0_i32_95 = arith.constant 0 : i32
    %112 = tpu.memref_slice %arg8[%c0_i32_89, %c1_i32_90, %c3_i32_91, %c0_i32_95] : memref<2x4x6x128xf32, #tpu.memory_space<vmem>> -> memref<1x1x1x128xf32, #tpu.memory_space<vmem>>
    %113 = tpu.memref_squeeze %112 : memref<1x1x1x128xf32, #tpu.memory_space<vmem>> -> memref<128xf32, #tpu.memory_space<vmem>>
    %114 = tpu.memref_slice %arg9[%c0_i32_92, %c1_i32_93] : memref<2x4x!tpu.dma_semaphore, #tpu.memory_space<semaphore_mem>> -> memref<1x1x!tpu.dma_semaphore, #tpu.memory_space<semaphore_mem>>
    %115 = tpu.memref_squeeze %114 : memref<1x1x!tpu.dma_semaphore, #tpu.memory_space<semaphore_mem>> -> memref<!tpu.dma_semaphore, #tpu.memory_space<semaphore_mem>>
    tpu.enqueue_dma source(%111 : memref<128xf32, #tpu.memory_space<any>>) target(%113 : memref<128xf32, #tpu.memory_space<vmem>>) target_semaphore(%115 : memref<!tpu.dma_semaphore, #tpu.memory_space<semaphore_mem>>)
    %c5_i32_96 = arith.constant 5 : i32
    %116 = arith.muli %69, %c5_i32_96 : i32
    %c3_i32_97 = arith.constant 3 : i32
    %117 = arith.addi %116, %c3_i32_97 : i32
    %118 = arith.index_cast %117 : i32 to index
    %119 = memref.load %arg3[%118] : memref<20xi32, #tpu.memory_space<smem>>
    %c0_i32_98 = arith.constant 0 : i32
    %c1_i32_99 = arith.constant 1 : i32
    %c4_i32_100 = arith.constant 4 : i32
    %c0_i32_101 = arith.constant 0 : i32
    %c1_i32_102 = arith.constant 1 : i32
    %c0_i32_103 = arith.constant 0 : i32
    %120 = tpu.memref_slice %arg5[%119, %c0_i32_103] : memref<32x128xf32, #tpu.memory_space<any>> -> memref<1x128xf32, #tpu.memory_space<any>>
    %121 = tpu.memref_squeeze %120 : memref<1x128xf32, #tpu.memory_space<any>> -> memref<128xf32, #tpu.memory_space<any>>
    %c0_i32_104 = arith.constant 0 : i32
    %122 = tpu.memref_slice %arg8[%c0_i32_98, %c1_i32_99, %c4_i32_100, %c0_i32_104] : memref<2x4x6x128xf32, #tpu.memory_space<vmem>> -> memref<1x1x1x128xf32, #tpu.memory_space<vmem>>
    %123 = tpu.memref_squeeze %122 : memref<1x1x1x128xf32, #tpu.memory_space<vmem>> -> memref<128xf32, #tpu.memory_space<vmem>>
    %124 = tpu.memref_slice %arg9[%c0_i32_101, %c1_i32_102] : memref<2x4x!tpu.dma_semaphore, #tpu.memory_space<semaphore_mem>> -> memref<1x1x!tpu.dma_semaphore, #tpu.memory_space<semaphore_mem>>
    %125 = tpu.memref_squeeze %124 : memref<1x1x!tpu.dma_semaphore, #tpu.memory_space<semaphore_mem>> -> memref<!tpu.dma_semaphore, #tpu.memory_space<semaphore_mem>>
    tpu.enqueue_dma source(%121 : memref<128xf32, #tpu.memory_space<any>>) target(%123 : memref<128xf32, #tpu.memory_space<vmem>>) target_semaphore(%125 : memref<!tpu.dma_semaphore, #tpu.memory_space<semaphore_mem>>)
    %c5_i32_105 = arith.constant 5 : i32
    %126 = arith.muli %69, %c5_i32_105 : i32
    %c4_i32_106 = arith.constant 4 : i32
    %127 = arith.addi %126, %c4_i32_106 : i32
    %128 = arith.index_cast %127 : i32 to index
    %129 = memref.load %arg3[%128] : memref<20xi32, #tpu.memory_space<smem>>
    %c0_i32_107 = arith.constant 0 : i32
    %c1_i32_108 = arith.constant 1 : i32
    %c5_i32_109 = arith.constant 5 : i32
    %c0_i32_110 = arith.constant 0 : i32
    %c1_i32_111 = arith.constant 1 : i32
    %c0_i32_112 = arith.constant 0 : i32
    %130 = tpu.memref_slice %arg5[%129, %c0_i32_112] : memref<32x128xf32, #tpu.memory_space<any>> -> memref<1x128xf32, #tpu.memory_space<any>>
    %131 = tpu.memref_squeeze %130 : memref<1x128xf32, #tpu.memory_space<any>> -> memref<128xf32, #tpu.memory_space<any>>
    %c0_i32_113 = arith.constant 0 : i32
    %132 = tpu.memref_slice %arg8[%c0_i32_107, %c1_i32_108, %c5_i32_109, %c0_i32_113] : memref<2x4x6x128xf32, #tpu.memory_space<vmem>> -> memref<1x1x1x128xf32, #tpu.memory_space<vmem>>
    %133 = tpu.memref_squeeze %132 : memref<1x1x1x128xf32, #tpu.memory_space<vmem>> -> memref<128xf32, #tpu.memory_space<vmem>>
    %134 = tpu.memref_slice %arg9[%c0_i32_110, %c1_i32_111] : memref<2x4x!tpu.dma_semaphore, #tpu.memory_space<semaphore_mem>> -> memref<1x1x!tpu.dma_semaphore, #tpu.memory_space<semaphore_mem>>
    %135 = tpu.memref_squeeze %134 : memref<1x1x!tpu.dma_semaphore, #tpu.memory_space<semaphore_mem>> -> memref<!tpu.dma_semaphore, #tpu.memory_space<semaphore_mem>>
    tpu.enqueue_dma source(%131 : memref<128xf32, #tpu.memory_space<any>>) target(%133 : memref<128xf32, #tpu.memory_space<vmem>>) target_semaphore(%135 : memref<!tpu.dma_semaphore, #tpu.memory_space<semaphore_mem>>)
    %c2_i32_114 = arith.constant 2 : i32
    %136 = arith.addi %1, %c2_i32_114 : i32
    %137 = arith.index_cast %136 : i32 to index
    %138 = memref.load %arg1[%137] : memref<4xi32, #tpu.memory_space<smem>>
    %c0_i32_115 = arith.constant 0 : i32
    %c2_i32_116 = arith.constant 2 : i32
    %c0_i32_117 = arith.constant 0 : i32
    %c2_i32_118 = arith.constant 2 : i32
    %c0_i32_119 = arith.constant 0 : i32
    %139 = tpu.memref_slice %arg4[%138, %c0_i32_119] : memref<16x128xf32, #tpu.memory_space<any>> -> memref<1x128xf32, #tpu.memory_space<any>>
    %140 = tpu.memref_squeeze %139 : memref<1x128xf32, #tpu.memory_space<any>> -> memref<128xf32, #tpu.memory_space<any>>
    %c0_i32_120 = arith.constant 0 : i32
    %141 = tpu.memref_slice %arg7[%c0_i32_115, %c2_i32_116, %c0_i32_120] : memref<2x4x128xf32, #tpu.memory_space<vmem>> -> memref<1x1x128xf32, #tpu.memory_space<vmem>>
    %142 = tpu.memref_squeeze %141 : memref<1x1x128xf32, #tpu.memory_space<vmem>> -> memref<128xf32, #tpu.memory_space<vmem>>
    %143 = tpu.memref_slice %arg9[%c0_i32_117, %c2_i32_118] : memref<2x4x!tpu.dma_semaphore, #tpu.memory_space<semaphore_mem>> -> memref<1x1x!tpu.dma_semaphore, #tpu.memory_space<semaphore_mem>>
    %144 = tpu.memref_squeeze %143 : memref<1x1x!tpu.dma_semaphore, #tpu.memory_space<semaphore_mem>> -> memref<!tpu.dma_semaphore, #tpu.memory_space<semaphore_mem>>
    tpu.enqueue_dma source(%140 : memref<128xf32, #tpu.memory_space<any>>) target(%142 : memref<128xf32, #tpu.memory_space<vmem>>) target_semaphore(%144 : memref<!tpu.dma_semaphore, #tpu.memory_space<semaphore_mem>>)
    %145 = arith.index_cast %136 : i32 to index
    %146 = memref.load %arg2[%145] : memref<4xi32, #tpu.memory_space<smem>>
    %c0_i32_121 = arith.constant 0 : i32
    %c2_i32_122 = arith.constant 2 : i32
    %c0_i32_123 = arith.constant 0 : i32
    %c0_i32_124 = arith.constant 0 : i32
    %c2_i32_125 = arith.constant 2 : i32
    %c0_i32_126 = arith.constant 0 : i32
    %147 = tpu.memref_slice %arg5[%146, %c0_i32_126] : memref<32x128xf32, #tpu.memory_space<any>> -> memref<1x128xf32, #tpu.memory_space<any>>
    %148 = tpu.memref_squeeze %147 : memref<1x128xf32, #tpu.memory_space<any>> -> memref<128xf32, #tpu.memory_space<any>>
    %c0_i32_127 = arith.constant 0 : i32
    %149 = tpu.memref_slice %arg8[%c0_i32_121, %c2_i32_122, %c0_i32_123, %c0_i32_127] : memref<2x4x6x128xf32, #tpu.memory_space<vmem>> -> memref<1x1x1x128xf32, #tpu.memory_space<vmem>>
    %150 = tpu.memref_squeeze %149 : memref<1x1x1x128xf32, #tpu.memory_space<vmem>> -> memref<128xf32, #tpu.memory_space<vmem>>
    %151 = tpu.memref_slice %arg9[%c0_i32_124, %c2_i32_125] : memref<2x4x!tpu.dma_semaphore, #tpu.memory_space<semaphore_mem>> -> memref<1x1x!tpu.dma_semaphore, #tpu.memory_space<semaphore_mem>>
    %152 = tpu.memref_squeeze %151 : memref<1x1x!tpu.dma_semaphore, #tpu.memory_space<semaphore_mem>> -> memref<!tpu.dma_semaphore, #tpu.memory_space<semaphore_mem>>
    tpu.enqueue_dma source(%148 : memref<128xf32, #tpu.memory_space<any>>) target(%150 : memref<128xf32, #tpu.memory_space<vmem>>) target_semaphore(%152 : memref<!tpu.dma_semaphore, #tpu.memory_space<semaphore_mem>>)
    %c5_i32_128 = arith.constant 5 : i32
    %153 = arith.muli %136, %c5_i32_128 : i32
    %c0_i32_129 = arith.constant 0 : i32
    %154 = arith.addi %153, %c0_i32_129 : i32
    %155 = arith.index_cast %154 : i32 to index
    %156 = memref.load %arg3[%155] : memref<20xi32, #tpu.memory_space<smem>>
    %c0_i32_130 = arith.constant 0 : i32
    %c2_i32_131 = arith.constant 2 : i32
    %c1_i32_132 = arith.constant 1 : i32
    %c0_i32_133 = arith.constant 0 : i32
    %c2_i32_134 = arith.constant 2 : i32
    %c0_i32_135 = arith.constant 0 : i32
    %157 = tpu.memref_slice %arg5[%156, %c0_i32_135] : memref<32x128xf32, #tpu.memory_space<any>> -> memref<1x128xf32, #tpu.memory_space<any>>
    %158 = tpu.memref_squeeze %157 : memref<1x128xf32, #tpu.memory_space<any>> -> memref<128xf32, #tpu.memory_space<any>>
    %c0_i32_136 = arith.constant 0 : i32
    %159 = tpu.memref_slice %arg8[%c0_i32_130, %c2_i32_131, %c1_i32_132, %c0_i32_136] : memref<2x4x6x128xf32, #tpu.memory_space<vmem>> -> memref<1x1x1x128xf32, #tpu.memory_space<vmem>>
    %160 = tpu.memref_squeeze %159 : memref<1x1x1x128xf32, #tpu.memory_space<vmem>> -> memref<128xf32, #tpu.memory_space<vmem>>
    %161 = tpu.memref_slice %arg9[%c0_i32_133, %c2_i32_134] : memref<2x4x!tpu.dma_semaphore, #tpu.memory_space<semaphore_mem>> -> memref<1x1x!tpu.dma_semaphore, #tpu.memory_space<semaphore_mem>>
    %162 = tpu.memref_squeeze %161 : memref<1x1x!tpu.dma_semaphore, #tpu.memory_space<semaphore_mem>> -> memref<!tpu.dma_semaphore, #tpu.memory_space<semaphore_mem>>
    tpu.enqueue_dma source(%158 : memref<128xf32, #tpu.memory_space<any>>) target(%160 : memref<128xf32, #tpu.memory_space<vmem>>) target_semaphore(%162 : memref<!tpu.dma_semaphore, #tpu.memory_space<semaphore_mem>>)
    %c5_i32_137 = arith.constant 5 : i32
    %163 = arith.muli %136, %c5_i32_137 : i32
    %c1_i32_138 = arith.constant 1 : i32
    %164 = arith.addi %163, %c1_i32_138 : i32
    %165 = arith.index_cast %164 : i32 to index
    %166 = memref.load %arg3[%165] : memref<20xi32, #tpu.memory_space<smem>>
    %c0_i32_139 = arith.constant 0 : i32
    %c2_i32_140 = arith.constant 2 : i32
    %c2_i32_141 = arith.constant 2 : i32
    %c0_i32_142 = arith.constant 0 : i32
    %c2_i32_143 = arith.constant 2 : i32
    %c0_i32_144 = arith.constant 0 : i32
    %167 = tpu.memref_slice %arg5[%166, %c0_i32_144] : memref<32x128xf32, #tpu.memory_space<any>> -> memref<1x128xf32, #tpu.memory_space<any>>
    %168 = tpu.memref_squeeze %167 : memref<1x128xf32, #tpu.memory_space<any>> -> memref<128xf32, #tpu.memory_space<any>>
    %c0_i32_145 = arith.constant 0 : i32
    %169 = tpu.memref_slice %arg8[%c0_i32_139, %c2_i32_140, %c2_i32_141, %c0_i32_145] : memref<2x4x6x128xf32, #tpu.memory_space<vmem>> -> memref<1x1x1x128xf32, #tpu.memory_space<vmem>>
    %170 = tpu.memref_squeeze %169 : memref<1x1x1x128xf32, #tpu.memory_space<vmem>> -> memref<128xf32, #tpu.memory_space<vmem>>
    %171 = tpu.memref_slice %arg9[%c0_i32_142, %c2_i32_143] : memref<2x4x!tpu.dma_semaphore, #tpu.memory_space<semaphore_mem>> -> memref<1x1x!tpu.dma_semaphore, #tpu.memory_space<semaphore_mem>>
    %172 = tpu.memref_squeeze %171 : memref<1x1x!tpu.dma_semaphore, #tpu.memory_space<semaphore_mem>> -> memref<!tpu.dma_semaphore, #tpu.memory_space<semaphore_mem>>
    tpu.enqueue_dma source(%168 : memref<128xf32, #tpu.memory_space<any>>) target(%170 : memref<128xf32, #tpu.memory_space<vmem>>) target_semaphore(%172 : memref<!tpu.dma_semaphore, #tpu.memory_space<semaphore_mem>>)
    %c5_i32_146 = arith.constant 5 : i32
    %173 = arith.muli %136, %c5_i32_146 : i32
    %c2_i32_147 = arith.constant 2 : i32
    %174 = arith.addi %173, %c2_i32_147 : i32
    %175 = arith.index_cast %174 : i32 to index
    %176 = memref.load %arg3[%175] : memref<20xi32, #tpu.memory_space<smem>>
    %c0_i32_148 = arith.constant 0 : i32
    %c2_i32_149 = arith.constant 2 : i32
    %c3_i32_150 = arith.constant 3 : i32
    %c0_i32_151 = arith.constant 0 : i32
    %c2_i32_152 = arith.constant 2 : i32
    %c0_i32_153 = arith.constant 0 : i32
    %177 = tpu.memref_slice %arg5[%176, %c0_i32_153] : memref<32x128xf32, #tpu.memory_space<any>> -> memref<1x128xf32, #tpu.memory_space<any>>
    %178 = tpu.memref_squeeze %177 : memref<1x128xf32, #tpu.memory_space<any>> -> memref<128xf32, #tpu.memory_space<any>>
    %c0_i32_154 = arith.constant 0 : i32
    %179 = tpu.memref_slice %arg8[%c0_i32_148, %c2_i32_149, %c3_i32_150, %c0_i32_154] : memref<2x4x6x128xf32, #tpu.memory_space<vmem>> -> memref<1x1x1x128xf32, #tpu.memory_space<vmem>>
    %180 = tpu.memref_squeeze %179 : memref<1x1x1x128xf32, #tpu.memory_space<vmem>> -> memref<128xf32, #tpu.memory_space<vmem>>
    %181 = tpu.memref_slice %arg9[%c0_i32_151, %c2_i32_152] : memref<2x4x!tpu.dma_semaphore, #tpu.memory_space<semaphore_mem>> -> memref<1x1x!tpu.dma_semaphore, #tpu.memory_space<semaphore_mem>>
    %182 = tpu.memref_squeeze %181 : memref<1x1x!tpu.dma_semaphore, #tpu.memory_space<semaphore_mem>> -> memref<!tpu.dma_semaphore, #tpu.memory_space<semaphore_mem>>
    tpu.enqueue_dma source(%178 : memref<128xf32, #tpu.memory_space<any>>) target(%180 : memref<128xf32, #tpu.memory_space<vmem>>) target_semaphore(%182 : memref<!tpu.dma_semaphore, #tpu.memory_space<semaphore_mem>>)
    %c5_i32_155 = arith.constant 5 : i32
    %183 = arith.muli %136, %c5_i32_155 : i32
    %c3_i32_156 = arith.constant 3 : i32
    %184 = arith.addi %183, %c3_i32_156 : i32
    %185 = arith.index_cast %184 : i32 to index
    %186 = memref.load %arg3[%185] : memref<20xi32, #tpu.memory_space<smem>>
    %c0_i32_157 = arith.constant 0 : i32
    %c2_i32_158 = arith.constant 2 : i32
    %c4_i32_159 = arith.constant 4 : i32
    %c0_i32_160 = arith.constant 0 : i32
    %c2_i32_161 = arith.constant 2 : i32
    %c0_i32_162 = arith.constant 0 : i32
    %187 = tpu.memref_slice %arg5[%186, %c0_i32_162] : memref<32x128xf32, #tpu.memory_space<any>> -> memref<1x128xf32, #tpu.memory_space<any>>
    %188 = tpu.memref_squeeze %187 : memref<1x128xf32, #tpu.memory_space<any>> -> memref<128xf32, #tpu.memory_space<any>>
    %c0_i32_163 = arith.constant 0 : i32
    %189 = tpu.memref_slice %arg8[%c0_i32_157, %c2_i32_158, %c4_i32_159, %c0_i32_163] : memref<2x4x6x128xf32, #tpu.memory_space<vmem>> -> memref<1x1x1x128xf32, #tpu.memory_space<vmem>>
    %190 = tpu.memref_squeeze %189 : memref<1x1x1x128xf32, #tpu.memory_space<vmem>> -> memref<128xf32, #tpu.memory_space<vmem>>
    %191 = tpu.memref_slice %arg9[%c0_i32_160, %c2_i32_161] : memref<2x4x!tpu.dma_semaphore, #tpu.memory_space<semaphore_mem>> -> memref<1x1x!tpu.dma_semaphore, #tpu.memory_space<semaphore_mem>>
    %192 = tpu.memref_squeeze %191 : memref<1x1x!tpu.dma_semaphore, #tpu.memory_space<semaphore_mem>> -> memref<!tpu.dma_semaphore, #tpu.memory_space<semaphore_mem>>
    tpu.enqueue_dma source(%188 : memref<128xf32, #tpu.memory_space<any>>) target(%190 : memref<128xf32, #tpu.memory_space<vmem>>) target_semaphore(%192 : memref<!tpu.dma_semaphore, #tpu.memory_space<semaphore_mem>>)
    %c5_i32_164 = arith.constant 5 : i32
    %193 = arith.muli %136, %c5_i32_164 : i32
    %c4_i32_165 = arith.constant 4 : i32
    %194 = arith.addi %193, %c4_i32_165 : i32
    %195 = arith.index_cast %194 : i32 to index
    %196 = memref.load %arg3[%195] : memref<20xi32, #tpu.memory_space<smem>>
    %c0_i32_166 = arith.constant 0 : i32
    %c2_i32_167 = arith.constant 2 : i32
    %c5_i32_168 = arith.constant 5 : i32
    %c0_i32_169 = arith.constant 0 : i32
    %c2_i32_170 = arith.constant 2 : i32
    %c0_i32_171 = arith.constant 0 : i32
    %197 = tpu.memref_slice %arg5[%196, %c0_i32_171] : memref<32x128xf32, #tpu.memory_space<any>> -> memref<1x128xf32, #tpu.memory_space<any>>
    %198 = tpu.memref_squeeze %197 : memref<1x128xf32, #tpu.memory_space<any>> -> memref<128xf32, #tpu.memory_space<any>>
    %c0_i32_172 = arith.constant 0 : i32
    %199 = tpu.memref_slice %arg8[%c0_i32_166, %c2_i32_167, %c5_i32_168, %c0_i32_172] : memref<2x4x6x128xf32, #tpu.memory_space<vmem>> -> memref<1x1x1x128xf32, #tpu.memory_space<vmem>>
    %200 = tpu.memref_squeeze %199 : memref<1x1x1x128xf32, #tpu.memory_space<vmem>> -> memref<128xf32, #tpu.memory_space<vmem>>
    %201 = tpu.memref_slice %arg9[%c0_i32_169, %c2_i32_170] : memref<2x4x!tpu.dma_semaphore, #tpu.memory_space<semaphore_mem>> -> memref<1x1x!tpu.dma_semaphore, #tpu.memory_space<semaphore_mem>>
    %202 = tpu.memref_squeeze %201 : memref<1x1x!tpu.dma_semaphore, #tpu.memory_space<semaphore_mem>> -> memref<!tpu.dma_semaphore, #tpu.memory_space<semaphore_mem>>
    tpu.enqueue_dma source(%198 : memref<128xf32, #tpu.memory_space<any>>) target(%200 : memref<128xf32, #tpu.memory_space<vmem>>) target_semaphore(%202 : memref<!tpu.dma_semaphore, #tpu.memory_space<semaphore_mem>>)
    %c3_i32_173 = arith.constant 3 : i32
    %203 = arith.addi %1, %c3_i32_173 : i32
    %204 = arith.index_cast %203 : i32 to index
    %205 = memref.load %arg1[%204] : memref<4xi32, #tpu.memory_space<smem>>
    %c0_i32_174 = arith.constant 0 : i32
    %c3_i32_175 = arith.constant 3 : i32
    %c0_i32_176 = arith.constant 0 : i32
    %c3_i32_177 = arith.constant 3 : i32
    %c0_i32_178 = arith.constant 0 : i32
    %206 = tpu.memref_slice %arg4[%205, %c0_i32_178] : memref<16x128xf32, #tpu.memory_space<any>> -> memref<1x128xf32, #tpu.memory_space<any>>
    %207 = tpu.memref_squeeze %206 : memref<1x128xf32, #tpu.memory_space<any>> -> memref<128xf32, #tpu.memory_space<any>>
    %c0_i32_179 = arith.constant 0 : i32
    %208 = tpu.memref_slice %arg7[%c0_i32_174, %c3_i32_175, %c0_i32_179] : memref<2x4x128xf32, #tpu.memory_space<vmem>> -> memref<1x1x128xf32, #tpu.memory_space<vmem>>
    %209 = tpu.memref_squeeze %208 : memref<1x1x128xf32, #tpu.memory_space<vmem>> -> memref<128xf32, #tpu.memory_space<vmem>>
    %210 = tpu.memref_slice %arg9[%c0_i32_176, %c3_i32_177] : memref<2x4x!tpu.dma_semaphore, #tpu.memory_space<semaphore_mem>> -> memref<1x1x!tpu.dma_semaphore, #tpu.memory_space<semaphore_mem>>
    %211 = tpu.memref_squeeze %210 : memref<1x1x!tpu.dma_semaphore, #tpu.memory_space<semaphore_mem>> -> memref<!tpu.dma_semaphore, #tpu.memory_space<semaphore_mem>>
    tpu.enqueue_dma source(%207 : memref<128xf32, #tpu.memory_space<any>>) target(%209 : memref<128xf32, #tpu.memory_space<vmem>>) target_semaphore(%211 : memref<!tpu.dma_semaphore, #tpu.memory_space<semaphore_mem>>)
    %212 = arith.index_cast %203 : i32 to index
    %213 = memref.load %arg2[%212] : memref<4xi32, #tpu.memory_space<smem>>
    %c0_i32_180 = arith.constant 0 : i32
    %c3_i32_181 = arith.constant 3 : i32
    %c0_i32_182 = arith.constant 0 : i32
    %c0_i32_183 = arith.constant 0 : i32
    %c3_i32_184 = arith.constant 3 : i32
    %c0_i32_185 = arith.constant 0 : i32
    %214 = tpu.memref_slice %arg5[%213, %c0_i32_185] : memref<32x128xf32, #tpu.memory_space<any>> -> memref<1x128xf32, #tpu.memory_space<any>>
    %215 = tpu.memref_squeeze %214 : memref<1x128xf32, #tpu.memory_space<any>> -> memref<128xf32, #tpu.memory_space<any>>
    %c0_i32_186 = arith.constant 0 : i32
    %216 = tpu.memref_slice %arg8[%c0_i32_180, %c3_i32_181, %c0_i32_182, %c0_i32_186] : memref<2x4x6x128xf32, #tpu.memory_space<vmem>> -> memref<1x1x1x128xf32, #tpu.memory_space<vmem>>
    %217 = tpu.memref_squeeze %216 : memref<1x1x1x128xf32, #tpu.memory_space<vmem>> -> memref<128xf32, #tpu.memory_space<vmem>>
    %218 = tpu.memref_slice %arg9[%c0_i32_183, %c3_i32_184] : memref<2x4x!tpu.dma_semaphore, #tpu.memory_space<semaphore_mem>> -> memref<1x1x!tpu.dma_semaphore, #tpu.memory_space<semaphore_mem>>
    %219 = tpu.memref_squeeze %218 : memref<1x1x!tpu.dma_semaphore, #tpu.memory_space<semaphore_mem>> -> memref<!tpu.dma_semaphore, #tpu.memory_space<semaphore_mem>>
    tpu.enqueue_dma source(%215 : memref<128xf32, #tpu.memory_space<any>>) target(%217 : memref<128xf32, #tpu.memory_space<vmem>>) target_semaphore(%219 : memref<!tpu.dma_semaphore, #tpu.memory_space<semaphore_mem>>)
    %c5_i32_187 = arith.constant 5 : i32
    %220 = arith.muli %203, %c5_i32_187 : i32
    %c0_i32_188 = arith.constant 0 : i32
    %221 = arith.addi %220, %c0_i32_188 : i32
    %222 = arith.index_cast %221 : i32 to index
    %223 = memref.load %arg3[%222] : memref<20xi32, #tpu.memory_space<smem>>
    %c0_i32_189 = arith.constant 0 : i32
    %c3_i32_190 = arith.constant 3 : i32
    %c1_i32_191 = arith.constant 1 : i32
    %c0_i32_192 = arith.constant 0 : i32
    %c3_i32_193 = arith.constant 3 : i32
    %c0_i32_194 = arith.constant 0 : i32
    %224 = tpu.memref_slice %arg5[%223, %c0_i32_194] : memref<32x128xf32, #tpu.memory_space<any>> -> memref<1x128xf32, #tpu.memory_space<any>>
    %225 = tpu.memref_squeeze %224 : memref<1x128xf32, #tpu.memory_space<any>> -> memref<128xf32, #tpu.memory_space<any>>
    %c0_i32_195 = arith.constant 0 : i32
    %226 = tpu.memref_slice %arg8[%c0_i32_189, %c3_i32_190, %c1_i32_191, %c0_i32_195] : memref<2x4x6x128xf32, #tpu.memory_space<vmem>> -> memref<1x1x1x128xf32, #tpu.memory_space<vmem>>
    %227 = tpu.memref_squeeze %226 : memref<1x1x1x128xf32, #tpu.memory_space<vmem>> -> memref<128xf32, #tpu.memory_space<vmem>>
    %228 = tpu.memref_slice %arg9[%c0_i32_192, %c3_i32_193] : memref<2x4x!tpu.dma_semaphore, #tpu.memory_space<semaphore_mem>> -> memref<1x1x!tpu.dma_semaphore, #tpu.memory_space<semaphore_mem>>
    %229 = tpu.memref_squeeze %228 : memref<1x1x!tpu.dma_semaphore, #tpu.memory_space<semaphore_mem>> -> memref<!tpu.dma_semaphore, #tpu.memory_space<semaphore_mem>>
    tpu.enqueue_dma source(%225 : memref<128xf32, #tpu.memory_space<any>>) target(%227 : memref<128xf32, #tpu.memory_space<vmem>>) target_semaphore(%229 : memref<!tpu.dma_semaphore, #tpu.memory_space<semaphore_mem>>)
    %c5_i32_196 = arith.constant 5 : i32
    %230 = arith.muli %203, %c5_i32_196 : i32
    %c1_i32_197 = arith.constant 1 : i32
    %231 = arith.addi %230, %c1_i32_197 : i32
    %232 = arith.index_cast %231 : i32 to index
    %233 = memref.load %arg3[%232] : memref<20xi32, #tpu.memory_space<smem>>
    %c0_i32_198 = arith.constant 0 : i32
    %c3_i32_199 = arith.constant 3 : i32
    %c2_i32_200 = arith.constant 2 : i32
    %c0_i32_201 = arith.constant 0 : i32
    %c3_i32_202 = arith.constant 3 : i32
    %c0_i32_203 = arith.constant 0 : i32
    %234 = tpu.memref_slice %arg5[%233, %c0_i32_203] : memref<32x128xf32, #tpu.memory_space<any>> -> memref<1x128xf32, #tpu.memory_space<any>>
    %235 = tpu.memref_squeeze %234 : memref<1x128xf32, #tpu.memory_space<any>> -> memref<128xf32, #tpu.memory_space<any>>
    %c0_i32_204 = arith.constant 0 : i32
    %236 = tpu.memref_slice %arg8[%c0_i32_198, %c3_i32_199, %c2_i32_200, %c0_i32_204] : memref<2x4x6x128xf32, #tpu.memory_space<vmem>> -> memref<1x1x1x128xf32, #tpu.memory_space<vmem>>
    %237 = tpu.memref_squeeze %236 : memref<1x1x1x128xf32, #tpu.memory_space<vmem>> -> memref<128xf32, #tpu.memory_space<vmem>>
    %238 = tpu.memref_slice %arg9[%c0_i32_201, %c3_i32_202] : memref<2x4x!tpu.dma_semaphore, #tpu.memory_space<semaphore_mem>> -> memref<1x1x!tpu.dma_semaphore, #tpu.memory_space<semaphore_mem>>
    %239 = tpu.memref_squeeze %238 : memref<1x1x!tpu.dma_semaphore, #tpu.memory_space<semaphore_mem>> -> memref<!tpu.dma_semaphore, #tpu.memory_space<semaphore_mem>>
    tpu.enqueue_dma source(%235 : memref<128xf32, #tpu.memory_space<any>>) target(%237 : memref<128xf32, #tpu.memory_space<vmem>>) target_semaphore(%239 : memref<!tpu.dma_semaphore, #tpu.memory_space<semaphore_mem>>)
    %c5_i32_205 = arith.constant 5 : i32
    %240 = arith.muli %203, %c5_i32_205 : i32
    %c2_i32_206 = arith.constant 2 : i32
    %241 = arith.addi %240, %c2_i32_206 : i32
    %242 = arith.index_cast %241 : i32 to index
    %243 = memref.load %arg3[%242] : memref<20xi32, #tpu.memory_space<smem>>
    %c0_i32_207 = arith.constant 0 : i32
    %c3_i32_208 = arith.constant 3 : i32
    %c3_i32_209 = arith.constant 3 : i32
    %c0_i32_210 = arith.constant 0 : i32
    %c3_i32_211 = arith.constant 3 : i32
    %c0_i32_212 = arith.constant 0 : i32
    %244 = tpu.memref_slice %arg5[%243, %c0_i32_212] : memref<32x128xf32, #tpu.memory_space<any>> -> memref<1x128xf32, #tpu.memory_space<any>>
    %245 = tpu.memref_squeeze %244 : memref<1x128xf32, #tpu.memory_space<any>> -> memref<128xf32, #tpu.memory_space<any>>
    %c0_i32_213 = arith.constant 0 : i32
    %246 = tpu.memref_slice %arg8[%c0_i32_207, %c3_i32_208, %c3_i32_209, %c0_i32_213] : memref<2x4x6x128xf32, #tpu.memory_space<vmem>> -> memref<1x1x1x128xf32, #tpu.memory_space<vmem>>
    %247 = tpu.memref_squeeze %246 : memref<1x1x1x128xf32, #tpu.memory_space<vmem>> -> memref<128xf32, #tpu.memory_space<vmem>>
    %248 = tpu.memref_slice %arg9[%c0_i32_210, %c3_i32_211] : memref<2x4x!tpu.dma_semaphore, #tpu.memory_space<semaphore_mem>> -> memref<1x1x!tpu.dma_semaphore, #tpu.memory_space<semaphore_mem>>
    %249 = tpu.memref_squeeze %248 : memref<1x1x!tpu.dma_semaphore, #tpu.memory_space<semaphore_mem>> -> memref<!tpu.dma_semaphore, #tpu.memory_space<semaphore_mem>>
    tpu.enqueue_dma source(%245 : memref<128xf32, #tpu.memory_space<any>>) target(%247 : memref<128xf32, #tpu.memory_space<vmem>>) target_semaphore(%249 : memref<!tpu.dma_semaphore, #tpu.memory_space<semaphore_mem>>)
    %c5_i32_214 = arith.constant 5 : i32
    %250 = arith.muli %203, %c5_i32_214 : i32
    %c3_i32_215 = arith.constant 3 : i32
    %251 = arith.addi %250, %c3_i32_215 : i32
    %252 = arith.index_cast %251 : i32 to index
    %253 = memref.load %arg3[%252] : memref<20xi32, #tpu.memory_space<smem>>
    %c0_i32_216 = arith.constant 0 : i32
    %c3_i32_217 = arith.constant 3 : i32
    %c4_i32_218 = arith.constant 4 : i32
    %c0_i32_219 = arith.constant 0 : i32
    %c3_i32_220 = arith.constant 3 : i32
    %c0_i32_221 = arith.constant 0 : i32
    %254 = tpu.memref_slice %arg5[%253, %c0_i32_221] : memref<32x128xf32, #tpu.memory_space<any>> -> memref<1x128xf32, #tpu.memory_space<any>>
    %255 = tpu.memref_squeeze %254 : memref<1x128xf32, #tpu.memory_space<any>> -> memref<128xf32, #tpu.memory_space<any>>
    %c0_i32_222 = arith.constant 0 : i32
    %256 = tpu.memref_slice %arg8[%c0_i32_216, %c3_i32_217, %c4_i32_218, %c0_i32_222] : memref<2x4x6x128xf32, #tpu.memory_space<vmem>> -> memref<1x1x1x128xf32, #tpu.memory_space<vmem>>
    %257 = tpu.memref_squeeze %256 : memref<1x1x1x128xf32, #tpu.memory_space<vmem>> -> memref<128xf32, #tpu.memory_space<vmem>>
    %258 = tpu.memref_slice %arg9[%c0_i32_219, %c3_i32_220] : memref<2x4x!tpu.dma_semaphore, #tpu.memory_space<semaphore_mem>> -> memref<1x1x!tpu.dma_semaphore, #tpu.memory_space<semaphore_mem>>
    %259 = tpu.memref_squeeze %258 : memref<1x1x!tpu.dma_semaphore, #tpu.memory_space<semaphore_mem>> -> memref<!tpu.dma_semaphore, #tpu.memory_space<semaphore_mem>>
    tpu.enqueue_dma source(%255 : memref<128xf32, #tpu.memory_space<any>>) target(%257 : memref<128xf32, #tpu.memory_space<vmem>>) target_semaphore(%259 : memref<!tpu.dma_semaphore, #tpu.memory_space<semaphore_mem>>)
    %c5_i32_223 = arith.constant 5 : i32
    %260 = arith.muli %203, %c5_i32_223 : i32
    %c4_i32_224 = arith.constant 4 : i32
    %261 = arith.addi %260, %c4_i32_224 : i32
    %262 = arith.index_cast %261 : i32 to index
    %263 = memref.load %arg3[%262] : memref<20xi32, #tpu.memory_space<smem>>
    %c0_i32_225 = arith.constant 0 : i32
    %c3_i32_226 = arith.constant 3 : i32
    %c5_i32_227 = arith.constant 5 : i32
    %c0_i32_228 = arith.constant 0 : i32
    %c3_i32_229 = arith.constant 3 : i32
    %c0_i32_230 = arith.constant 0 : i32
    %264 = tpu.memref_slice %arg5[%263, %c0_i32_230] : memref<32x128xf32, #tpu.memory_space<any>> -> memref<1x128xf32, #tpu.memory_space<any>>
    %265 = tpu.memref_squeeze %264 : memref<1x128xf32, #tpu.memory_space<any>> -> memref<128xf32, #tpu.memory_space<any>>
    %c0_i32_231 = arith.constant 0 : i32
    %266 = tpu.memref_slice %arg8[%c0_i32_225, %c3_i32_226, %c5_i32_227, %c0_i32_231] : memref<2x4x6x128xf32, #tpu.memory_space<vmem>> -> memref<1x1x1x128xf32, #tpu.memory_space<vmem>>
    %267 = tpu.memref_squeeze %266 : memref<1x1x1x128xf32, #tpu.memory_space<vmem>> -> memref<128xf32, #tpu.memory_space<vmem>>
    %268 = tpu.memref_slice %arg9[%c0_i32_228, %c3_i32_229] : memref<2x4x!tpu.dma_semaphore, #tpu.memory_space<semaphore_mem>> -> memref<1x1x!tpu.dma_semaphore, #tpu.memory_space<semaphore_mem>>
    %269 = tpu.memref_squeeze %268 : memref<1x1x!tpu.dma_semaphore, #tpu.memory_space<semaphore_mem>> -> memref<!tpu.dma_semaphore, #tpu.memory_space<semaphore_mem>>
    tpu.enqueue_dma source(%265 : memref<128xf32, #tpu.memory_space<any>>) target(%267 : memref<128xf32, #tpu.memory_space<vmem>>) target_semaphore(%269 : memref<!tpu.dma_semaphore, #tpu.memory_space<semaphore_mem>>)
    %cst = arith.constant 0.000000e+00 : f32
    %270 = vector.broadcast %cst : f32 to vector<1x8x128xf32>
    %c0 = arith.constant 0 : index
    %c0_232 = arith.constant 0 : index
    %c0_233 = arith.constant 0 : index
    %271 = vector.load %arg6[%c0, %c0_232, %c0_233] : memref<1x8x128xf32, #tpu.memory_space<vmem>>, vector<1x8x128xf32>
    tpu.vector_store %arg6[%c0, %c0_232, %c0_233], %270 {strides = array<i32>} : memref<1x8x128xf32, #tpu.memory_space<vmem>>, vector<1x8x128xf32>,
    %c0_i32_234 = arith.constant 0 : i32
    %c0_i32_235 = arith.constant 0 : i32
    %c0_i32_236 = arith.constant 0 : i32
    %c0_i32_237 = arith.constant 0 : i32
    %c0_i32_238 = arith.constant 0 : i32
    %c0_i32_239 = arith.constant 0 : i32
    %272 = tpu.memref_slice %arg4[%c0_i32_234, %c0_i32_239] : memref<16x128xf32, #tpu.memory_space<any>> -> memref<1x128xf32, #tpu.memory_space<any>>
    %273 = tpu.memref_squeeze %272 : memref<1x128xf32, #tpu.memory_space<any>> -> memref<128xf32, #tpu.memory_space<any>>
    %c0_i32_240 = arith.constant 0 : i32
    %274 = tpu.memref_slice %arg7[%c0_i32_235, %c0_i32_236, %c0_i32_240] : memref<2x4x128xf32, #tpu.memory_space<vmem>> -> memref<1x1x128xf32, #tpu.memory_space<vmem>>
    %275 = tpu.memref_squeeze %274 : memref<1x1x128xf32, #tpu.memory_space<vmem>> -> memref<128xf32, #tpu.memory_space<vmem>>
    %276 = tpu.memref_slice %arg9[%c0_i32_237, %c0_i32_238] : memref<2x4x!tpu.dma_semaphore, #tpu.memory_space<semaphore_mem>> -> memref<1x1x!tpu.dma_semaphore, #tpu.memory_space<semaphore_mem>>
    %277 = tpu.memref_squeeze %276 : memref<1x1x!tpu.dma_semaphore, #tpu.memory_space<semaphore_mem>> -> memref<!tpu.dma_semaphore, #tpu.memory_space<semaphore_mem>>
    tpu.wait_dma2 semaphore(%277 : memref<!tpu.dma_semaphore, #tpu.memory_space<semaphore_mem>>) src(%273 : memref<128xf32, #tpu.memory_space<any>>) dst(%275 : memref<128xf32, #tpu.memory_space<vmem>>)
    %c0_i32_241 = arith.constant 0 : i32
    %c0_i32_242 = arith.constant 0 : i32
    %c0_i32_243 = arith.constant 0 : i32
    %c0_i32_244 = arith.constant 0 : i32
    %c0_i32_245 = arith.constant 0 : i32
    %c0_i32_246 = arith.constant 0 : i32
    %c0_i32_247 = arith.constant 0 : i32
    %278 = tpu.memref_slice %arg5[%c0_i32_241, %c0_i32_247] : memref<32x128xf32, #tpu.memory_space<any>> -> memref<1x128xf32, #tpu.memory_space<any>>
    %279 = tpu.memref_squeeze %278 : memref<1x128xf32, #tpu.memory_space<any>> -> memref<128xf32, #tpu.memory_space<any>>
    %c0_i32_248 = arith.constant 0 : i32
    %280 = tpu.memref_slice %arg8[%c0_i32_242, %c0_i32_243, %c0_i32_244, %c0_i32_248] : memref<2x4x6x128xf32, #tpu.memory_space<vmem>> -> memref<1x1x1x128xf32, #tpu.memory_space<vmem>>
    %281 = tpu.memref_squeeze %280 : memref<1x1x1x128xf32, #tpu.memory_space<vmem>> -> memref<128xf32, #tpu.memory_space<vmem>>
    %282 = tpu.memref_slice %arg9[%c0_i32_245, %c0_i32_246] : memref<2x4x!tpu.dma_semaphore, #tpu.memory_space<semaphore_mem>> -> memref<1x1x!tpu.dma_semaphore, #tpu.memory_space<semaphore_mem>>
    %283 = tpu.memref_squeeze %282 : memref<1x1x!tpu.dma_semaphore, #tpu.memory_space<semaphore_mem>> -> memref<!tpu.dma_semaphore, #tpu.memory_space<semaphore_mem>>
    tpu.wait_dma2 semaphore(%283 : memref<!tpu.dma_semaphore, #tpu.memory_space<semaphore_mem>>) src(%279 : memref<128xf32, #tpu.memory_space<any>>) dst(%281 : memref<128xf32, #tpu.memory_space<vmem>>)
    %c0_i32_249 = arith.constant 0 : i32
    %c0_i32_250 = arith.constant 0 : i32
    %c0_i32_251 = arith.constant 0 : i32
    %c1_i32_252 = arith.constant 1 : i32
    %c0_i32_253 = arith.constant 0 : i32
    %c0_i32_254 = arith.constant 0 : i32
    %c0_i32_255 = arith.constant 0 : i32
    %284 = tpu.memref_slice %arg5[%c0_i32_249, %c0_i32_255] : memref<32x128xf32, #tpu.memory_space<any>> -> memref<1x128xf32, #tpu.memory_space<any>>
    %285 = tpu.memref_squeeze %284 : memref<1x128xf32, #tpu.memory_space<any>> -> memref<128xf32, #tpu.memory_space<any>>
    %c0_i32_256 = arith.constant 0 : i32
    %286 = tpu.memref_slice %arg8[%c0_i32_250, %c0_i32_251, %c1_i32_252, %c0_i32_256] : memref<2x4x6x128xf32, #tpu.memory_space<vmem>> -> memref<1x1x1x128xf32, #tpu.memory_space<vmem>>
    %287 = tpu.memref_squeeze %286 : memref<1x1x1x128xf32, #tpu.memory_space<vmem>> -> memref<128xf32, #tpu.memory_space<vmem>>
    %288 = tpu.memref_slice %arg9[%c0_i32_253, %c0_i32_254] : memref<2x4x!tpu.dma_semaphore, #tpu.memory_space<semaphore_mem>> -> memref<1x1x!tpu.dma_semaphore, #tpu.memory_space<semaphore_mem>>
    %289 = tpu.memref_squeeze %288 : memref<1x1x!tpu.dma_semaphore, #tpu.memory_space<semaphore_mem>> -> memref<!tpu.dma_semaphore, #tpu.memory_space<semaphore_mem>>
    tpu.wait_dma2 semaphore(%289 : memref<!tpu.dma_semaphore, #tpu.memory_space<semaphore_mem>>) src(%285 : memref<128xf32, #tpu.memory_space<any>>) dst(%287 : memref<128xf32, #tpu.memory_space<vmem>>)
    %c0_i32_257 = arith.constant 0 : i32
    %c0_i32_258 = arith.constant 0 : i32
    %c0_i32_259 = arith.constant 0 : i32
    %c2_i32_260 = arith.constant 2 : i32
    %c0_i32_261 = arith.constant 0 : i32
    %c0_i32_262 = arith.constant 0 : i32
    %c0_i32_263 = arith.constant 0 : i32
    %290 = tpu.memref_slice %arg5[%c0_i32_257, %c0_i32_263] : memref<32x128xf32, #tpu.memory_space<any>> -> memref<1x128xf32, #tpu.memory_space<any>>
    %291 = tpu.memref_squeeze %290 : memref<1x128xf32, #tpu.memory_space<any>> -> memref<128xf32, #tpu.memory_space<any>>
    %c0_i32_264 = arith.constant 0 : i32
    %292 = tpu.memref_slice %arg8[%c0_i32_258, %c0_i32_259, %c2_i32_260, %c0_i32_264] : memref<2x4x6x128xf32, #tpu.memory_space<vmem>> -> memref<1x1x1x128xf32, #tpu.memory_space<vmem>>
    %293 = tpu.memref_squeeze %292 : memref<1x1x1x128xf32, #tpu.memory_space<vmem>> -> memref<128xf32, #tpu.memory_space<vmem>>
    %294 = tpu.memref_slice %arg9[%c0_i32_261, %c0_i32_262] : memref<2x4x!tpu.dma_semaphore, #tpu.memory_space<semaphore_mem>> -> memref<1x1x!tpu.dma_semaphore, #tpu.memory_space<semaphore_mem>>
    %295 = tpu.memref_squeeze %294 : memref<1x1x!tpu.dma_semaphore, #tpu.memory_space<semaphore_mem>> -> memref<!tpu.dma_semaphore, #tpu.memory_space<semaphore_mem>>
    tpu.wait_dma2 semaphore(%295 : memref<!tpu.dma_semaphore, #tpu.memory_space<semaphore_mem>>) src(%291 : memref<128xf32, #tpu.memory_space<any>>) dst(%293 : memref<128xf32, #tpu.memory_space<vmem>>)
    %c0_i32_265 = arith.constant 0 : i32
    %c0_i32_266 = arith.constant 0 : i32
    %c0_i32_267 = arith.constant 0 : i32
    %c3_i32_268 = arith.constant 3 : i32
    %c0_i32_269 = arith.constant 0 : i32
    %c0_i32_270 = arith.constant 0 : i32
    %c0_i32_271 = arith.constant 0 : i32
    %296 = tpu.memref_slice %arg5[%c0_i32_265, %c0_i32_271] : memref<32x128xf32, #tpu.memory_space<any>> -> memref<1x128xf32, #tpu.memory_space<any>>
    %297 = tpu.memref_squeeze %296 : memref<1x128xf32, #tpu.memory_space<any>> -> memref<128xf32, #tpu.memory_space<any>>
    %c0_i32_272 = arith.constant 0 : i32
    %298 = tpu.memref_slice %arg8[%c0_i32_266, %c0_i32_267, %c3_i32_268, %c0_i32_272] : memref<2x4x6x128xf32, #tpu.memory_space<vmem>> -> memref<1x1x1x128xf32, #tpu.memory_space<vmem>>
    %299 = tpu.memref_squeeze %298 : memref<1x1x1x128xf32, #tpu.memory_space<vmem>> -> memref<128xf32, #tpu.memory_space<vmem>>
    %300 = tpu.memref_slice %arg9[%c0_i32_269, %c0_i32_270] : memref<2x4x!tpu.dma_semaphore, #tpu.memory_space<semaphore_mem>> -> memref<1x1x!tpu.dma_semaphore, #tpu.memory_space<semaphore_mem>>
    %301 = tpu.memref_squeeze %300 : memref<1x1x!tpu.dma_semaphore, #tpu.memory_space<semaphore_mem>> -> memref<!tpu.dma_semaphore, #tpu.memory_space<semaphore_mem>>
    tpu.wait_dma2 semaphore(%301 : memref<!tpu.dma_semaphore, #tpu.memory_space<semaphore_mem>>) src(%297 : memref<128xf32, #tpu.memory_space<any>>) dst(%299 : memref<128xf32, #tpu.memory_space<vmem>>)
    %c0_i32_273 = arith.constant 0 : i32
    %c0_i32_274 = arith.constant 0 : i32
    %c0_i32_275 = arith.constant 0 : i32
    %c4_i32_276 = arith.constant 4 : i32
    %c0_i32_277 = arith.constant 0 : i32
    %c0_i32_278 = arith.constant 0 : i32
    %c0_i32_279 = arith.constant 0 : i32
    %302 = tpu.memref_slice %arg5[%c0_i32_273, %c0_i32_279] : memref<32x128xf32, #tpu.memory_space<any>> -> memref<1x128xf32, #tpu.memory_space<any>>
    %303 = tpu.memref_squeeze %302 : memref<1x128xf32, #tpu.memory_space<any>> -> memref<128xf32, #tpu.memory_space<any>>
    %c0_i32_280 = arith.constant 0 : i32
    %304 = tpu.memref_slice %arg8[%c0_i32_274, %c0_i32_275, %c4_i32_276, %c0_i32_280] : memref<2x4x6x128xf32, #tpu.memory_space<vmem>> -> memref<1x1x1x128xf32, #tpu.memory_space<vmem>>
    %305 = tpu.memref_squeeze %304 : memref<1x1x1x128xf32, #tpu.memory_space<vmem>> -> memref<128xf32, #tpu.memory_space<vmem>>
    %306 = tpu.memref_slice %arg9[%c0_i32_277, %c0_i32_278] : memref<2x4x!tpu.dma_semaphore, #tpu.memory_space<semaphore_mem>> -> memref<1x1x!tpu.dma_semaphore, #tpu.memory_space<semaphore_mem>>
    %307 = tpu.memref_squeeze %306 : memref<1x1x!tpu.dma_semaphore, #tpu.memory_space<semaphore_mem>> -> memref<!tpu.dma_semaphore, #tpu.memory_space<semaphore_mem>>
    tpu.wait_dma2 semaphore(%307 : memref<!tpu.dma_semaphore, #tpu.memory_space<semaphore_mem>>) src(%303 : memref<128xf32, #tpu.memory_space<any>>) dst(%305 : memref<128xf32, #tpu.memory_space<vmem>>)
    %c0_i32_281 = arith.constant 0 : i32
    %c0_i32_282 = arith.constant 0 : i32
    %c0_i32_283 = arith.constant 0 : i32
    %c5_i32_284 = arith.constant 5 : i32
    %c0_i32_285 = arith.constant 0 : i32
    %c0_i32_286 = arith.constant 0 : i32
    %c0_i32_287 = arith.constant 0 : i32
    %308 = tpu.memref_slice %arg5[%c0_i32_281, %c0_i32_287] : memref<32x128xf32, #tpu.memory_space<any>> -> memref<1x128xf32, #tpu.memory_space<any>>
    %309 = tpu.memref_squeeze %308 : memref<1x128xf32, #tpu.memory_space<any>> -> memref<128xf32, #tpu.memory_space<any>>
    %c0_i32_288 = arith.constant 0 : i32
    %310 = tpu.memref_slice %arg8[%c0_i32_282, %c0_i32_283, %c5_i32_284, %c0_i32_288] : memref<2x4x6x128xf32, #tpu.memory_space<vmem>> -> memref<1x1x1x128xf32, #tpu.memory_space<vmem>>
    %311 = tpu.memref_squeeze %310 : memref<1x1x1x128xf32, #tpu.memory_space<vmem>> -> memref<128xf32, #tpu.memory_space<vmem>>
    %312 = tpu.memref_slice %arg9[%c0_i32_285, %c0_i32_286] : memref<2x4x!tpu.dma_semaphore, #tpu.memory_space<semaphore_mem>> -> memref<1x1x!tpu.dma_semaphore, #tpu.memory_space<semaphore_mem>>
    %313 = tpu.memref_squeeze %312 : memref<1x1x!tpu.dma_semaphore, #tpu.memory_space<semaphore_mem>> -> memref<!tpu.dma_semaphore, #tpu.memory_space<semaphore_mem>>
    tpu.wait_dma2 semaphore(%313 : memref<!tpu.dma_semaphore, #tpu.memory_space<semaphore_mem>>) src(%309 : memref<128xf32, #tpu.memory_space<any>>) dst(%311 : memref<128xf32, #tpu.memory_space<vmem>>)
    %c0_i32_289 = arith.constant 0 : i32
    %c0_i32_290 = arith.constant 0 : i32
    %c1_i32_291 = arith.constant 1 : i32
    %c0_i32_292 = arith.constant 0 : i32
    %c1_i32_293 = arith.constant 1 : i32
    %c0_i32_294 = arith.constant 0 : i32
    %314 = tpu.memref_slice %arg4[%c0_i32_289, %c0_i32_294] : memref<16x128xf32, #tpu.memory_space<any>> -> memref<1x128xf32, #tpu.memory_space<any>>
    %315 = tpu.memref_squeeze %314 : memref<1x128xf32, #tpu.memory_space<any>> -> memref<128xf32, #tpu.memory_space<any>>
    %c0_i32_295 = arith.constant 0 : i32
    %316 = tpu.memref_slice %arg7[%c0_i32_290, %c1_i32_291, %c0_i32_295] : memref<2x4x128xf32, #tpu.memory_space<vmem>> -> memref<1x1x128xf32, #tpu.memory_space<vmem>>
    %317 = tpu.memref_squeeze %316 : memref<1x1x128xf32, #tpu.memory_space<vmem>> -> memref<128xf32, #tpu.memory_space<vmem>>
    %318 = tpu.memref_slice %arg9[%c0_i32_292, %c1_i32_293] : memref<2x4x!tpu.dma_semaphore, #tpu.memory_space<semaphore_mem>> -> memref<1x1x!tpu.dma_semaphore, #tpu.memory_space<semaphore_mem>>
    %319 = tpu.memref_squeeze %318 : memref<1x1x!tpu.dma_semaphore, #tpu.memory_space<semaphore_mem>> -> memref<!tpu.dma_semaphore, #tpu.memory_space<semaphore_mem>>
    tpu.wait_dma2 semaphore(%319 : memref<!tpu.dma_semaphore, #tpu.memory_space<semaphore_mem>>) src(%315 : memref<128xf32, #tpu.memory_space<any>>) dst(%317 : memref<128xf32, #tpu.memory_space<vmem>>)
    %c0_i32_296 = arith.constant 0 : i32
    %c0_i32_297 = arith.constant 0 : i32
    %c1_i32_298 = arith.constant 1 : i32
    %c0_i32_299 = arith.constant 0 : i32
    %c0_i32_300 = arith.constant 0 : i32
    %c1_i32_301 = arith.constant 1 : i32
    %c0_i32_302 = arith.constant 0 : i32
    %320 = tpu.memref_slice %arg5[%c0_i32_296, %c0_i32_302] : memref<32x128xf32, #tpu.memory_space<any>> -> memref<1x128xf32, #tpu.memory_space<any>>
    %321 = tpu.memref_squeeze %320 : memref<1x128xf32, #tpu.memory_space<any>> -> memref<128xf32, #tpu.memory_space<any>>
    %c0_i32_303 = arith.constant 0 : i32
    %322 = tpu.memref_slice %arg8[%c0_i32_297, %c1_i32_298, %c0_i32_299, %c0_i32_303] : memref<2x4x6x128xf32, #tpu.memory_space<vmem>> -> memref<1x1x1x128xf32, #tpu.memory_space<vmem>>
    %323 = tpu.memref_squeeze %322 : memref<1x1x1x128xf32, #tpu.memory_space<vmem>> -> memref<128xf32, #tpu.memory_space<vmem>>
    %324 = tpu.memref_slice %arg9[%c0_i32_300, %c1_i32_301] : memref<2x4x!tpu.dma_semaphore, #tpu.memory_space<semaphore_mem>> -> memref<1x1x!tpu.dma_semaphore, #tpu.memory_space<semaphore_mem>>
    %325 = tpu.memref_squeeze %324 : memref<1x1x!tpu.dma_semaphore, #tpu.memory_space<semaphore_mem>> -> memref<!tpu.dma_semaphore, #tpu.memory_space<semaphore_mem>>
    tpu.wait_dma2 semaphore(%325 : memref<!tpu.dma_semaphore, #tpu.memory_space<semaphore_mem>>) src(%321 : memref<128xf32, #tpu.memory_space<any>>) dst(%323 : memref<128xf32, #tpu.memory_space<vmem>>)
    %c0_i32_304 = arith.constant 0 : i32
    %c0_i32_305 = arith.constant 0 : i32
    %c1_i32_306 = arith.constant 1 : i32
    %c1_i32_307 = arith.constant 1 : i32
    %c0_i32_308 = arith.constant 0 : i32
    %c1_i32_309 = arith.constant 1 : i32
    %c0_i32_310 = arith.constant 0 : i32
    %326 = tpu.memref_slice %arg5[%c0_i32_304, %c0_i32_310] : memref<32x128xf32, #tpu.memory_space<any>> -> memref<1x128xf32, #tpu.memory_space<any>>
    %327 = tpu.memref_squeeze %326 : memref<1x128xf32, #tpu.memory_space<any>> -> memref<128xf32, #tpu.memory_space<any>>
    %c0_i32_311 = arith.constant 0 : i32
    %328 = tpu.memref_slice %arg8[%c0_i32_305, %c1_i32_306, %c1_i32_307, %c0_i32_311] : memref<2x4x6x128xf32, #tpu.memory_space<vmem>> -> memref<1x1x1x128xf32, #tpu.memory_space<vmem>>
    %329 = tpu.memref_squeeze %328 : memref<1x1x1x128xf32, #tpu.memory_space<vmem>> -> memref<128xf32, #tpu.memory_space<vmem>>
    %330 = tpu.memref_slice %arg9[%c0_i32_308, %c1_i32_309] : memref<2x4x!tpu.dma_semaphore, #tpu.memory_space<semaphore_mem>> -> memref<1x1x!tpu.dma_semaphore, #tpu.memory_space<semaphore_mem>>
    %331 = tpu.memref_squeeze %330 : memref<1x1x!tpu.dma_semaphore, #tpu.memory_space<semaphore_mem>> -> memref<!tpu.dma_semaphore, #tpu.memory_space<semaphore_mem>>
    tpu.wait_dma2 semaphore(%331 : memref<!tpu.dma_semaphore, #tpu.memory_space<semaphore_mem>>) src(%327 : memref<128xf32, #tpu.memory_space<any>>) dst(%329 : memref<128xf32, #tpu.memory_space<vmem>>)
    %c0_i32_312 = arith.constant 0 : i32
    %c0_i32_313 = arith.constant 0 : i32
    %c1_i32_314 = arith.constant 1 : i32
    %c2_i32_315 = arith.constant 2 : i32
    %c0_i32_316 = arith.constant 0 : i32
    %c1_i32_317 = arith.constant 1 : i32
    %c0_i32_318 = arith.constant 0 : i32
    %332 = tpu.memref_slice %arg5[%c0_i32_312, %c0_i32_318] : memref<32x128xf32, #tpu.memory_space<any>> -> memref<1x128xf32, #tpu.memory_space<any>>
    %333 = tpu.memref_squeeze %332 : memref<1x128xf32, #tpu.memory_space<any>> -> memref<128xf32, #tpu.memory_space<any>>
    %c0_i32_319 = arith.constant 0 : i32
    %334 = tpu.memref_slice %arg8[%c0_i32_313, %c1_i32_314, %c2_i32_315, %c0_i32_319] : memref<2x4x6x128xf32, #tpu.memory_space<vmem>> -> memref<1x1x1x128xf32, #tpu.memory_space<vmem>>
    %335 = tpu.memref_squeeze %334 : memref<1x1x1x128xf32, #tpu.memory_space<vmem>> -> memref<128xf32, #tpu.memory_space<vmem>>
    %336 = tpu.memref_slice %arg9[%c0_i32_316, %c1_i32_317] : memref<2x4x!tpu.dma_semaphore, #tpu.memory_space<semaphore_mem>> -> memref<1x1x!tpu.dma_semaphore, #tpu.memory_space<semaphore_mem>>
    %337 = tpu.memref_squeeze %336 : memref<1x1x!tpu.dma_semaphore, #tpu.memory_space<semaphore_mem>> -> memref<!tpu.dma_semaphore, #tpu.memory_space<semaphore_mem>>
    tpu.wait_dma2 semaphore(%337 : memref<!tpu.dma_semaphore, #tpu.memory_space<semaphore_mem>>) src(%333 : memref<128xf32, #tpu.memory_space<any>>) dst(%335 : memref<128xf32, #tpu.memory_space<vmem>>)
    %c0_i32_320 = arith.constant 0 : i32
    %c0_i32_321 = arith.constant 0 : i32
    %c1_i32_322 = arith.constant 1 : i32
    %c3_i32_323 = arith.constant 3 : i32
    %c0_i32_324 = arith.constant 0 : i32
    %c1_i32_325 = arith.constant 1 : i32
    %c0_i32_326 = arith.constant 0 : i32
    %338 = tpu.memref_slice %arg5[%c0_i32_320, %c0_i32_326] : memref<32x128xf32, #tpu.memory_space<any>> -> memref<1x128xf32, #tpu.memory_space<any>>
    %339 = tpu.memref_squeeze %338 : memref<1x128xf32, #tpu.memory_space<any>> -> memref<128xf32, #tpu.memory_space<any>>
    %c0_i32_327 = arith.constant 0 : i32
    %340 = tpu.memref_slice %arg8[%c0_i32_321, %c1_i32_322, %c3_i32_323, %c0_i32_327] : memref<2x4x6x128xf32, #tpu.memory_space<vmem>> -> memref<1x1x1x128xf32, #tpu.memory_space<vmem>>
    %341 = tpu.memref_squeeze %340 : memref<1x1x1x128xf32, #tpu.memory_space<vmem>> -> memref<128xf32, #tpu.memory_space<vmem>>
    %342 = tpu.memref_slice %arg9[%c0_i32_324, %c1_i32_325] : memref<2x4x!tpu.dma_semaphore, #tpu.memory_space<semaphore_mem>> -> memref<1x1x!tpu.dma_semaphore, #tpu.memory_space<semaphore_mem>>
    %343 = tpu.memref_squeeze %342 : memref<1x1x!tpu.dma_semaphore, #tpu.memory_space<semaphore_mem>> -> memref<!tpu.dma_semaphore, #tpu.memory_space<semaphore_mem>>
    tpu.wait_dma2 semaphore(%343 : memref<!tpu.dma_semaphore, #tpu.memory_space<semaphore_mem>>) src(%339 : memref<128xf32, #tpu.memory_space<any>>) dst(%341 : memref<128xf32, #tpu.memory_space<vmem>>)
    %c0_i32_328 = arith.constant 0 : i32
    %c0_i32_329 = arith.constant 0 : i32
    %c1_i32_330 = arith.constant 1 : i32
    %c4_i32_331 = arith.constant 4 : i32
    %c0_i32_332 = arith.constant 0 : i32
    %c1_i32_333 = arith.constant 1 : i32
    %c0_i32_334 = arith.constant 0 : i32
    %344 = tpu.memref_slice %arg5[%c0_i32_328, %c0_i32_334] : memref<32x128xf32, #tpu.memory_space<any>> -> memref<1x128xf32, #tpu.memory_space<any>>
    %345 = tpu.memref_squeeze %344 : memref<1x128xf32, #tpu.memory_space<any>> -> memref<128xf32, #tpu.memory_space<any>>
    %c0_i32_335 = arith.constant 0 : i32
    %346 = tpu.memref_slice %arg8[%c0_i32_329, %c1_i32_330, %c4_i32_331, %c0_i32_335] : memref<2x4x6x128xf32, #tpu.memory_space<vmem>> -> memref<1x1x1x128xf32, #tpu.memory_space<vmem>>
    %347 = tpu.memref_squeeze %346 : memref<1x1x1x128xf32, #tpu.memory_space<vmem>> -> memref<128xf32, #tpu.memory_space<vmem>>
    %348 = tpu.memref_slice %arg9[%c0_i32_332, %c1_i32_333] : memref<2x4x!tpu.dma_semaphore, #tpu.memory_space<semaphore_mem>> -> memref<1x1x!tpu.dma_semaphore, #tpu.memory_space<semaphore_mem>>
    %349 = tpu.memref_squeeze %348 : memref<1x1x!tpu.dma_semaphore, #tpu.memory_space<semaphore_mem>> -> memref<!tpu.dma_semaphore, #tpu.memory_space<semaphore_mem>>
    tpu.wait_dma2 semaphore(%349 : memref<!tpu.dma_semaphore, #tpu.memory_space<semaphore_mem>>) src(%345 : memref<128xf32, #tpu.memory_space<any>>) dst(%347 : memref<128xf32, #tpu.memory_space<vmem>>)
    %c0_i32_336 = arith.constant 0 : i32
    %c0_i32_337 = arith.constant 0 : i32
    %c1_i32_338 = arith.constant 1 : i32
    %c5_i32_339 = arith.constant 5 : i32
    %c0_i32_340 = arith.constant 0 : i32
    %c1_i32_341 = arith.constant 1 : i32
    %c0_i32_342 = arith.constant 0 : i32
    %350 = tpu.memref_slice %arg5[%c0_i32_336, %c0_i32_342] : memref<32x128xf32, #tpu.memory_space<any>> -> memref<1x128xf32, #tpu.memory_space<any>>
    %351 = tpu.memref_squeeze %350 : memref<1x128xf32, #tpu.memory_space<any>> -> memref<128xf32, #tpu.memory_space<any>>
    %c0_i32_343 = arith.constant 0 : i32
    %352 = tpu.memref_slice %arg8[%c0_i32_337, %c1_i32_338, %c5_i32_339, %c0_i32_343] : memref<2x4x6x128xf32, #tpu.memory_space<vmem>> -> memref<1x1x1x128xf32, #tpu.memory_space<vmem>>
    %353 = tpu.memref_squeeze %352 : memref<1x1x1x128xf32, #tpu.memory_space<vmem>> -> memref<128xf32, #tpu.memory_space<vmem>>
    %354 = tpu.memref_slice %arg9[%c0_i32_340, %c1_i32_341] : memref<2x4x!tpu.dma_semaphore, #tpu.memory_space<semaphore_mem>> -> memref<1x1x!tpu.dma_semaphore, #tpu.memory_space<semaphore_mem>>
    %355 = tpu.memref_squeeze %354 : memref<1x1x!tpu.dma_semaphore, #tpu.memory_space<semaphore_mem>> -> memref<!tpu.dma_semaphore, #tpu.memory_space<semaphore_mem>>
    tpu.wait_dma2 semaphore(%355 : memref<!tpu.dma_semaphore, #tpu.memory_space<semaphore_mem>>) src(%351 : memref<128xf32, #tpu.memory_space<any>>) dst(%353 : memref<128xf32, #tpu.memory_space<vmem>>)
    %c0_i32_344 = arith.constant 0 : i32
    %c0_i32_345 = arith.constant 0 : i32
    %c2_i32_346 = arith.constant 2 : i32
    %c0_i32_347 = arith.constant 0 : i32
    %c2_i32_348 = arith.constant 2 : i32
    %c0_i32_349 = arith.constant 0 : i32
    %356 = tpu.memref_slice %arg4[%c0_i32_344, %c0_i32_349] : memref<16x128xf32, #tpu.memory_space<any>> -> memref<1x128xf32, #tpu.memory_space<any>>
    %357 = tpu.memref_squeeze %356 : memref<1x128xf32, #tpu.memory_space<any>> -> memref<128xf32, #tpu.memory_space<any>>
    %c0_i32_350 = arith.constant 0 : i32
    %358 = tpu.memref_slice %arg7[%c0_i32_345, %c2_i32_346, %c0_i32_350] : memref<2x4x128xf32, #tpu.memory_space<vmem>> -> memref<1x1x128xf32, #tpu.memory_space<vmem>>
    %359 = tpu.memref_squeeze %358 : memref<1x1x128xf32, #tpu.memory_space<vmem>> -> memref<128xf32, #tpu.memory_space<vmem>>
    %360 = tpu.memref_slice %arg9[%c0_i32_347, %c2_i32_348] : memref<2x4x!tpu.dma_semaphore, #tpu.memory_space<semaphore_mem>> -> memref<1x1x!tpu.dma_semaphore, #tpu.memory_space<semaphore_mem>>
    %361 = tpu.memref_squeeze %360 : memref<1x1x!tpu.dma_semaphore, #tpu.memory_space<semaphore_mem>> -> memref<!tpu.dma_semaphore, #tpu.memory_space<semaphore_mem>>
    tpu.wait_dma2 semaphore(%361 : memref<!tpu.dma_semaphore, #tpu.memory_space<semaphore_mem>>) src(%357 : memref<128xf32, #tpu.memory_space<any>>) dst(%359 : memref<128xf32, #tpu.memory_space<vmem>>)
    %c0_i32_351 = arith.constant 0 : i32
    %c0_i32_352 = arith.constant 0 : i32
    %c2_i32_353 = arith.constant 2 : i32
    %c0_i32_354 = arith.constant 0 : i32
    %c0_i32_355 = arith.constant 0 : i32
    %c2_i32_356 = arith.constant 2 : i32
    %c0_i32_357 = arith.constant 0 : i32
    %362 = tpu.memref_slice %arg5[%c0_i32_351, %c0_i32_357] : memref<32x128xf32, #tpu.memory_space<any>> -> memref<1x128xf32, #tpu.memory_space<any>>
    %363 = tpu.memref_squeeze %362 : memref<1x128xf32, #tpu.memory_space<any>> -> memref<128xf32, #tpu.memory_space<any>>
    %c0_i32_358 = arith.constant 0 : i32
    %364 = tpu.memref_slice %arg8[%c0_i32_352, %c2_i32_353, %c0_i32_354, %c0_i32_358] : memref<2x4x6x128xf32, #tpu.memory_space<vmem>> -> memref<1x1x1x128xf32, #tpu.memory_space<vmem>>
    %365 = tpu.memref_squeeze %364 : memref<1x1x1x128xf32, #tpu.memory_space<vmem>> -> memref<128xf32, #tpu.memory_space<vmem>>
    %366 = tpu.memref_slice %arg9[%c0_i32_355, %c2_i32_356] : memref<2x4x!tpu.dma_semaphore, #tpu.memory_space<semaphore_mem>> -> memref<1x1x!tpu.dma_semaphore, #tpu.memory_space<semaphore_mem>>
    %367 = tpu.memref_squeeze %366 : memref<1x1x!tpu.dma_semaphore, #tpu.memory_space<semaphore_mem>> -> memref<!tpu.dma_semaphore, #tpu.memory_space<semaphore_mem>>
    tpu.wait_dma2 semaphore(%367 : memref<!tpu.dma_semaphore, #tpu.memory_space<semaphore_mem>>) src(%363 : memref<128xf32, #tpu.memory_space<any>>) dst(%365 : memref<128xf32, #tpu.memory_space<vmem>>)
    %c0_i32_359 = arith.constant 0 : i32
    %c0_i32_360 = arith.constant 0 : i32
    %c2_i32_361 = arith.constant 2 : i32
    %c1_i32_362 = arith.constant 1 : i32
    %c0_i32_363 = arith.constant 0 : i32
    %c2_i32_364 = arith.constant 2 : i32
    %c0_i32_365 = arith.constant 0 : i32
    %368 = tpu.memref_slice %arg5[%c0_i32_359, %c0_i32_365] : memref<32x128xf32, #tpu.memory_space<any>> -> memref<1x128xf32, #tpu.memory_space<any>>
    %369 = tpu.memref_squeeze %368 : memref<1x128xf32, #tpu.memory_space<any>> -> memref<128xf32, #tpu.memory_space<any>>
    %c0_i32_366 = arith.constant 0 : i32
    %370 = tpu.memref_slice %arg8[%c0_i32_360, %c2_i32_361, %c1_i32_362, %c0_i32_366] : memref<2x4x6x128xf32, #tpu.memory_space<vmem>> -> memref<1x1x1x128xf32, #tpu.memory_space<vmem>>
    %371 = tpu.memref_squeeze %370 : memref<1x1x1x128xf32, #tpu.memory_space<vmem>> -> memref<128xf32, #tpu.memory_space<vmem>>
    %372 = tpu.memref_slice %arg9[%c0_i32_363, %c2_i32_364] : memref<2x4x!tpu.dma_semaphore, #tpu.memory_space<semaphore_mem>> -> memref<1x1x!tpu.dma_semaphore, #tpu.memory_space<semaphore_mem>>
    %373 = tpu.memref_squeeze %372 : memref<1x1x!tpu.dma_semaphore, #tpu.memory_space<semaphore_mem>> -> memref<!tpu.dma_semaphore, #tpu.memory_space<semaphore_mem>>
    tpu.wait_dma2 semaphore(%373 : memref<!tpu.dma_semaphore, #tpu.memory_space<semaphore_mem>>) src(%369 : memref<128xf32, #tpu.memory_space<any>>) dst(%371 : memref<128xf32, #tpu.memory_space<vmem>>)
    %c0_i32_367 = arith.constant 0 : i32
    %c0_i32_368 = arith.constant 0 : i32
    %c2_i32_369 = arith.constant 2 : i32
    %c2_i32_370 = arith.constant 2 : i32
    %c0_i32_371 = arith.constant 0 : i32
    %c2_i32_372 = arith.constant 2 : i32
    %c0_i32_373 = arith.constant 0 : i32
    %374 = tpu.memref_slice %arg5[%c0_i32_367, %c0_i32_373] : memref<32x128xf32, #tpu.memory_space<any>> -> memref<1x128xf32, #tpu.memory_space<any>>
    %375 = tpu.memref_squeeze %374 : memref<1x128xf32, #tpu.memory_space<any>> -> memref<128xf32, #tpu.memory_space<any>>
    %c0_i32_374 = arith.constant 0 : i32
    %376 = tpu.memref_slice %arg8[%c0_i32_368, %c2_i32_369, %c2_i32_370, %c0_i32_374] : memref<2x4x6x128xf32, #tpu.memory_space<vmem>> -> memref<1x1x1x128xf32, #tpu.memory_space<vmem>>
    %377 = tpu.memref_squeeze %376 : memref<1x1x1x128xf32, #tpu.memory_space<vmem>> -> memref<128xf32, #tpu.memory_space<vmem>>
    %378 = tpu.memref_slice %arg9[%c0_i32_371, %c2_i32_372] : memref<2x4x!tpu.dma_semaphore, #tpu.memory_space<semaphore_mem>> -> memref<1x1x!tpu.dma_semaphore, #tpu.memory_space<semaphore_mem>>
    %379 = tpu.memref_squeeze %378 : memref<1x1x!tpu.dma_semaphore, #tpu.memory_space<semaphore_mem>> -> memref<!tpu.dma_semaphore, #tpu.memory_space<semaphore_mem>>
    tpu.wait_dma2 semaphore(%379 : memref<!tpu.dma_semaphore, #tpu.memory_space<semaphore_mem>>) src(%375 : memref<128xf32, #tpu.memory_space<any>>) dst(%377 : memref<128xf32, #tpu.memory_space<vmem>>)
    %c0_i32_375 = arith.constant 0 : i32
    %c0_i32_376 = arith.constant 0 : i32
    %c2_i32_377 = arith.constant 2 : i32
    %c3_i32_378 = arith.constant 3 : i32
    %c0_i32_379 = arith.constant 0 : i32
    %c2_i32_380 = arith.constant 2 : i32
    %c0_i32_381 = arith.constant 0 : i32
    %380 = tpu.memref_slice %arg5[%c0_i32_375, %c0_i32_381] : memref<32x128xf32, #tpu.memory_space<any>> -> memref<1x128xf32, #tpu.memory_space<any>>
    %381 = tpu.memref_squeeze %380 : memref<1x128xf32, #tpu.memory_space<any>> -> memref<128xf32, #tpu.memory_space<any>>
    %c0_i32_382 = arith.constant 0 : i32
    %382 = tpu.memref_slice %arg8[%c0_i32_376, %c2_i32_377, %c3_i32_378, %c0_i32_382] : memref<2x4x6x128xf32, #tpu.memory_space<vmem>> -> memref<1x1x1x128xf32, #tpu.memory_space<vmem>>
    %383 = tpu.memref_squeeze %382 : memref<1x1x1x128xf32, #tpu.memory_space<vmem>> -> memref<128xf32, #tpu.memory_space<vmem>>
    %384 = tpu.memref_slice %arg9[%c0_i32_379, %c2_i32_380] : memref<2x4x!tpu.dma_semaphore, #tpu.memory_space<semaphore_mem>> -> memref<1x1x!tpu.dma_semaphore, #tpu.memory_space<semaphore_mem>>
    %385 = tpu.memref_squeeze %384 : memref<1x1x!tpu.dma_semaphore, #tpu.memory_space<semaphore_mem>> -> memref<!tpu.dma_semaphore, #tpu.memory_space<semaphore_mem>>
    tpu.wait_dma2 semaphore(%385 : memref<!tpu.dma_semaphore, #tpu.memory_space<semaphore_mem>>) src(%381 : memref<128xf32, #tpu.memory_space<any>>) dst(%383 : memref<128xf32, #tpu.memory_space<vmem>>)
    %c0_i32_383 = arith.constant 0 : i32
    %c0_i32_384 = arith.constant 0 : i32
    %c2_i32_385 = arith.constant 2 : i32
    %c4_i32_386 = arith.constant 4 : i32
    %c0_i32_387 = arith.constant 0 : i32
    %c2_i32_388 = arith.constant 2 : i32
    %c0_i32_389 = arith.constant 0 : i32
    %386 = tpu.memref_slice %arg5[%c0_i32_383, %c0_i32_389] : memref<32x128xf32, #tpu.memory_space<any>> -> memref<1x128xf32, #tpu.memory_space<any>>
    %387 = tpu.memref_squeeze %386 : memref<1x128xf32, #tpu.memory_space<any>> -> memref<128xf32, #tpu.memory_space<any>>
    %c0_i32_390 = arith.constant 0 : i32
    %388 = tpu.memref_slice %arg8[%c0_i32_384, %c2_i32_385, %c4_i32_386, %c0_i32_390] : memref<2x4x6x128xf32, #tpu.memory_space<vmem>> -> memref<1x1x1x128xf32, #tpu.memory_space<vmem>>
    %389 = tpu.memref_squeeze %388 : memref<1x1x1x128xf32, #tpu.memory_space<vmem>> -> memref<128xf32, #tpu.memory_space<vmem>>
    %390 = tpu.memref_slice %arg9[%c0_i32_387, %c2_i32_388] : memref<2x4x!tpu.dma_semaphore, #tpu.memory_space<semaphore_mem>> -> memref<1x1x!tpu.dma_semaphore, #tpu.memory_space<semaphore_mem>>
    %391 = tpu.memref_squeeze %390 : memref<1x1x!tpu.dma_semaphore, #tpu.memory_space<semaphore_mem>> -> memref<!tpu.dma_semaphore, #tpu.memory_space<semaphore_mem>>
    tpu.wait_dma2 semaphore(%391 : memref<!tpu.dma_semaphore, #tpu.memory_space<semaphore_mem>>) src(%387 : memref<128xf32, #tpu.memory_space<any>>) dst(%389 : memref<128xf32, #tpu.memory_space<vmem>>)
    %c0_i32_391 = arith.constant 0 : i32
    %c0_i32_392 = arith.constant 0 : i32
    %c2_i32_393 = arith.constant 2 : i32
    %c5_i32_394 = arith.constant 5 : i32
    %c0_i32_395 = arith.constant 0 : i32
    %c2_i32_396 = arith.constant 2 : i32
    %c0_i32_397 = arith.constant 0 : i32
    %392 = tpu.memref_slice %arg5[%c0_i32_391, %c0_i32_397] : memref<32x128xf32, #tpu.memory_space<any>> -> memref<1x128xf32, #tpu.memory_space<any>>
    %393 = tpu.memref_squeeze %392 : memref<1x128xf32, #tpu.memory_space<any>> -> memref<128xf32, #tpu.memory_space<any>>
    %c0_i32_398 = arith.constant 0 : i32
    %394 = tpu.memref_slice %arg8[%c0_i32_392, %c2_i32_393, %c5_i32_394, %c0_i32_398] : memref<2x4x6x128xf32, #tpu.memory_space<vmem>> -> memref<1x1x1x128xf32, #tpu.memory_space<vmem>>
    %395 = tpu.memref_squeeze %394 : memref<1x1x1x128xf32, #tpu.memory_space<vmem>> -> memref<128xf32, #tpu.memory_space<vmem>>
    %396 = tpu.memref_slice %arg9[%c0_i32_395, %c2_i32_396] : memref<2x4x!tpu.dma_semaphore, #tpu.memory_space<semaphore_mem>> -> memref<1x1x!tpu.dma_semaphore, #tpu.memory_space<semaphore_mem>>
    %397 = tpu.memref_squeeze %396 : memref<1x1x!tpu.dma_semaphore, #tpu.memory_space<semaphore_mem>> -> memref<!tpu.dma_semaphore, #tpu.memory_space<semaphore_mem>>
    tpu.wait_dma2 semaphore(%397 : memref<!tpu.dma_semaphore, #tpu.memory_space<semaphore_mem>>) src(%393 : memref<128xf32, #tpu.memory_space<any>>) dst(%395 : memref<128xf32, #tpu.memory_space<vmem>>)
    %c0_i32_399 = arith.constant 0 : i32
    %c0_i32_400 = arith.constant 0 : i32
    %c3_i32_401 = arith.constant 3 : i32
    %c0_i32_402 = arith.constant 0 : i32
    %c3_i32_403 = arith.constant 3 : i32
    %c0_i32_404 = arith.constant 0 : i32
    %398 = tpu.memref_slice %arg4[%c0_i32_399, %c0_i32_404] : memref<16x128xf32, #tpu.memory_space<any>> -> memref<1x128xf32, #tpu.memory_space<any>>
    %399 = tpu.memref_squeeze %398 : memref<1x128xf32, #tpu.memory_space<any>> -> memref<128xf32, #tpu.memory_space<any>>
    %c0_i32_405 = arith.constant 0 : i32
    %400 = tpu.memref_slice %arg7[%c0_i32_400, %c3_i32_401, %c0_i32_405] : memref<2x4x128xf32, #tpu.memory_space<vmem>> -> memref<1x1x128xf32, #tpu.memory_space<vmem>>
    %401 = tpu.memref_squeeze %400 : memref<1x1x128xf32, #tpu.memory_space<vmem>> -> memref<128xf32, #tpu.memory_space<vmem>>
    %402 = tpu.memref_slice %arg9[%c0_i32_402, %c3_i32_403] : memref<2x4x!tpu.dma_semaphore, #tpu.memory_space<semaphore_mem>> -> memref<1x1x!tpu.dma_semaphore, #tpu.memory_space<semaphore_mem>>
    %403 = tpu.memref_squeeze %402 : memref<1x1x!tpu.dma_semaphore, #tpu.memory_space<semaphore_mem>> -> memref<!tpu.dma_semaphore, #tpu.memory_space<semaphore_mem>>
    tpu.wait_dma2 semaphore(%403 : memref<!tpu.dma_semaphore, #tpu.memory_space<semaphore_mem>>) src(%399 : memref<128xf32, #tpu.memory_space<any>>) dst(%401 : memref<128xf32, #tpu.memory_space<vmem>>)
    %c0_i32_406 = arith.constant 0 : i32
    %c0_i32_407 = arith.constant 0 : i32
    %c3_i32_408 = arith.constant 3 : i32
    %c0_i32_409 = arith.constant 0 : i32
    %c0_i32_410 = arith.constant 0 : i32
    %c3_i32_411 = arith.constant 3 : i32
    %c0_i32_412 = arith.constant 0 : i32
    %404 = tpu.memref_slice %arg5[%c0_i32_406, %c0_i32_412] : memref<32x128xf32, #tpu.memory_space<any>> -> memref<1x128xf32, #tpu.memory_space<any>>
    %405 = tpu.memref_squeeze %404 : memref<1x128xf32, #tpu.memory_space<any>> -> memref<128xf32, #tpu.memory_space<any>>
    %c0_i32_413 = arith.constant 0 : i32
    %406 = tpu.memref_slice %arg8[%c0_i32_407, %c3_i32_408, %c0_i32_409, %c0_i32_413] : memref<2x4x6x128xf32, #tpu.memory_space<vmem>> -> memref<1x1x1x128xf32, #tpu.memory_space<vmem>>
    %407 = tpu.memref_squeeze %406 : memref<1x1x1x128xf32, #tpu.memory_space<vmem>> -> memref<128xf32, #tpu.memory_space<vmem>>
    %408 = tpu.memref_slice %arg9[%c0_i32_410, %c3_i32_411] : memref<2x4x!tpu.dma_semaphore, #tpu.memory_space<semaphore_mem>> -> memref<1x1x!tpu.dma_semaphore, #tpu.memory_space<semaphore_mem>>
    %409 = tpu.memref_squeeze %408 : memref<1x1x!tpu.dma_semaphore, #tpu.memory_space<semaphore_mem>> -> memref<!tpu.dma_semaphore, #tpu.memory_space<semaphore_mem>>
    tpu.wait_dma2 semaphore(%409 : memref<!tpu.dma_semaphore, #tpu.memory_space<semaphore_mem>>) src(%405 : memref<128xf32, #tpu.memory_space<any>>) dst(%407 : memref<128xf32, #tpu.memory_space<vmem>>)
    %c0_i32_414 = arith.constant 0 : i32
    %c0_i32_415 = arith.constant 0 : i32
    %c3_i32_416 = arith.constant 3 : i32
    %c1_i32_417 = arith.constant 1 : i32
    %c0_i32_418 = arith.constant 0 : i32
    %c3_i32_419 = arith.constant 3 : i32
    %c0_i32_420 = arith.constant 0 : i32
    %410 = tpu.memref_slice %arg5[%c0_i32_414, %c0_i32_420] : memref<32x128xf32, #tpu.memory_space<any>> -> memref<1x128xf32, #tpu.memory_space<any>>
    %411 = tpu.memref_squeeze %410 : memref<1x128xf32, #tpu.memory_space<any>> -> memref<128xf32, #tpu.memory_space<any>>
    %c0_i32_421 = arith.constant 0 : i32
    %412 = tpu.memref_slice %arg8[%c0_i32_415, %c3_i32_416, %c1_i32_417, %c0_i32_421] : memref<2x4x6x128xf32, #tpu.memory_space<vmem>> -> memref<1x1x1x128xf32, #tpu.memory_space<vmem>>
    %413 = tpu.memref_squeeze %412 : memref<1x1x1x128xf32, #tpu.memory_space<vmem>> -> memref<128xf32, #tpu.memory_space<vmem>>
    %414 = tpu.memref_slice %arg9[%c0_i32_418, %c3_i32_419] : memref<2x4x!tpu.dma_semaphore, #tpu.memory_space<semaphore_mem>> -> memref<1x1x!tpu.dma_semaphore, #tpu.memory_space<semaphore_mem>>
    %415 = tpu.memref_squeeze %414 : memref<1x1x!tpu.dma_semaphore, #tpu.memory_space<semaphore_mem>> -> memref<!tpu.dma_semaphore, #tpu.memory_space<semaphore_mem>>
    tpu.wait_dma2 semaphore(%415 : memref<!tpu.dma_semaphore, #tpu.memory_space<semaphore_mem>>) src(%411 : memref<128xf32, #tpu.memory_space<any>>) dst(%413 : memref<128xf32, #tpu.memory_space<vmem>>)
    %c0_i32_422 = arith.constant 0 : i32
    %c0_i32_423 = arith.constant 0 : i32
    %c3_i32_424 = arith.constant 3 : i32
    %c2_i32_425 = arith.constant 2 : i32
    %c0_i32_426 = arith.constant 0 : i32
    %c3_i32_427 = arith.constant 3 : i32
    %c0_i32_428 = arith.constant 0 : i32
    %416 = tpu.memref_slice %arg5[%c0_i32_422, %c0_i32_428] : memref<32x128xf32, #tpu.memory_space<any>> -> memref<1x128xf32, #tpu.memory_space<any>>
    %417 = tpu.memref_squeeze %416 : memref<1x128xf32, #tpu.memory_space<any>> -> memref<128xf32, #tpu.memory_space<any>>
    %c0_i32_429 = arith.constant 0 : i32
    %418 = tpu.memref_slice %arg8[%c0_i32_423, %c3_i32_424, %c2_i32_425, %c0_i32_429] : memref<2x4x6x128xf32, #tpu.memory_space<vmem>> -> memref<1x1x1x128xf32, #tpu.memory_space<vmem>>
    %419 = tpu.memref_squeeze %418 : memref<1x1x1x128xf32, #tpu.memory_space<vmem>> -> memref<128xf32, #tpu.memory_space<vmem>>
    %420 = tpu.memref_slice %arg9[%c0_i32_426, %c3_i32_427] : memref<2x4x!tpu.dma_semaphore, #tpu.memory_space<semaphore_mem>> -> memref<1x1x!tpu.dma_semaphore, #tpu.memory_space<semaphore_mem>>
    %421 = tpu.memref_squeeze %420 : memref<1x1x!tpu.dma_semaphore, #tpu.memory_space<semaphore_mem>> -> memref<!tpu.dma_semaphore, #tpu.memory_space<semaphore_mem>>
    tpu.wait_dma2 semaphore(%421 : memref<!tpu.dma_semaphore, #tpu.memory_space<semaphore_mem>>) src(%417 : memref<128xf32, #tpu.memory_space<any>>) dst(%419 : memref<128xf32, #tpu.memory_space<vmem>>)
    %c0_i32_430 = arith.constant 0 : i32
    %c0_i32_431 = arith.constant 0 : i32
    %c3_i32_432 = arith.constant 3 : i32
    %c3_i32_433 = arith.constant 3 : i32
    %c0_i32_434 = arith.constant 0 : i32
    %c3_i32_435 = arith.constant 3 : i32
    %c0_i32_436 = arith.constant 0 : i32
    %422 = tpu.memref_slice %arg5[%c0_i32_430, %c0_i32_436] : memref<32x128xf32, #tpu.memory_space<any>> -> memref<1x128xf32, #tpu.memory_space<any>>
    %423 = tpu.memref_squeeze %422 : memref<1x128xf32, #tpu.memory_space<any>> -> memref<128xf32, #tpu.memory_space<any>>
    %c0_i32_437 = arith.constant 0 : i32
    %424 = tpu.memref_slice %arg8[%c0_i32_431, %c3_i32_432, %c3_i32_433, %c0_i32_437] : memref<2x4x6x128xf32, #tpu.memory_space<vmem>> -> memref<1x1x1x128xf32, #tpu.memory_space<vmem>>
    %425 = tpu.memref_squeeze %424 : memref<1x1x1x128xf32, #tpu.memory_space<vmem>> -> memref<128xf32, #tpu.memory_space<vmem>>
    %426 = tpu.memref_slice %arg9[%c0_i32_434, %c3_i32_435] : memref<2x4x!tpu.dma_semaphore, #tpu.memory_space<semaphore_mem>> -> memref<1x1x!tpu.dma_semaphore, #tpu.memory_space<semaphore_mem>>
    %427 = tpu.memref_squeeze %426 : memref<1x1x!tpu.dma_semaphore, #tpu.memory_space<semaphore_mem>> -> memref<!tpu.dma_semaphore, #tpu.memory_space<semaphore_mem>>
    tpu.wait_dma2 semaphore(%427 : memref<!tpu.dma_semaphore, #tpu.memory_space<semaphore_mem>>) src(%423 : memref<128xf32, #tpu.memory_space<any>>) dst(%425 : memref<128xf32, #tpu.memory_space<vmem>>)
    %c0_i32_438 = arith.constant 0 : i32
    %c0_i32_439 = arith.constant 0 : i32
    %c3_i32_440 = arith.constant 3 : i32
    %c4_i32_441 = arith.constant 4 : i32
    %c0_i32_442 = arith.constant 0 : i32
    %c3_i32_443 = arith.constant 3 : i32
    %c0_i32_444 = arith.constant 0 : i32
    %428 = tpu.memref_slice %arg5[%c0_i32_438, %c0_i32_444] : memref<32x128xf32, #tpu.memory_space<any>> -> memref<1x128xf32, #tpu.memory_space<any>>
    %429 = tpu.memref_squeeze %428 : memref<1x128xf32, #tpu.memory_space<any>> -> memref<128xf32, #tpu.memory_space<any>>
    %c0_i32_445 = arith.constant 0 : i32
    %430 = tpu.memref_slice %arg8[%c0_i32_439, %c3_i32_440, %c4_i32_441, %c0_i32_445] : memref<2x4x6x128xf32, #tpu.memory_space<vmem>> -> memref<1x1x1x128xf32, #tpu.memory_space<vmem>>
    %431 = tpu.memref_squeeze %430 : memref<1x1x1x128xf32, #tpu.memory_space<vmem>> -> memref<128xf32, #tpu.memory_space<vmem>>
    %432 = tpu.memref_slice %arg9[%c0_i32_442, %c3_i32_443] : memref<2x4x!tpu.dma_semaphore, #tpu.memory_space<semaphore_mem>> -> memref<1x1x!tpu.dma_semaphore, #tpu.memory_space<semaphore_mem>>
    %433 = tpu.memref_squeeze %432 : memref<1x1x!tpu.dma_semaphore, #tpu.memory_space<semaphore_mem>> -> memref<!tpu.dma_semaphore, #tpu.memory_space<semaphore_mem>>
    tpu.wait_dma2 semaphore(%433 : memref<!tpu.dma_semaphore, #tpu.memory_space<semaphore_mem>>) src(%429 : memref<128xf32, #tpu.memory_space<any>>) dst(%431 : memref<128xf32, #tpu.memory_space<vmem>>)
    %c0_i32_446 = arith.constant 0 : i32
    %c0_i32_447 = arith.constant 0 : i32
    %c3_i32_448 = arith.constant 3 : i32
    %c5_i32_449 = arith.constant 5 : i32
    %c0_i32_450 = arith.constant 0 : i32
    %c3_i32_451 = arith.constant 3 : i32
    %c0_i32_452 = arith.constant 0 : i32
    %434 = tpu.memref_slice %arg5[%c0_i32_446, %c0_i32_452] : memref<32x128xf32, #tpu.memory_space<any>> -> memref<1x128xf32, #tpu.memory_space<any>>
    %435 = tpu.memref_squeeze %434 : memref<1x128xf32, #tpu.memory_space<any>> -> memref<128xf32, #tpu.memory_space<any>>
    %c0_i32_453 = arith.constant 0 : i32
    %436 = tpu.memref_slice %arg8[%c0_i32_447, %c3_i32_448, %c5_i32_449, %c0_i32_453] : memref<2x4x6x128xf32, #tpu.memory_space<vmem>> -> memref<1x1x1x128xf32, #tpu.memory_space<vmem>>
    %437 = tpu.memref_squeeze %436 : memref<1x1x1x128xf32, #tpu.memory_space<vmem>> -> memref<128xf32, #tpu.memory_space<vmem>>
    %438 = tpu.memref_slice %arg9[%c0_i32_450, %c3_i32_451] : memref<2x4x!tpu.dma_semaphore, #tpu.memory_space<semaphore_mem>> -> memref<1x1x!tpu.dma_semaphore, #tpu.memory_space<semaphore_mem>>
    %439 = tpu.memref_squeeze %438 : memref<1x1x!tpu.dma_semaphore, #tpu.memory_space<semaphore_mem>> -> memref<!tpu.dma_semaphore, #tpu.memory_space<semaphore_mem>>
    tpu.wait_dma2 semaphore(%439 : memref<!tpu.dma_semaphore, #tpu.memory_space<semaphore_mem>>) src(%435 : memref<128xf32, #tpu.memory_space<any>>) dst(%437 : memref<128xf32, #tpu.memory_space<vmem>>)
    %c0_454 = arith.constant 0 : index
    %c0_455 = arith.constant 0 : index
    %c0_456 = arith.constant 0 : index
    %440 = vector.load %arg7[%c0_454, %c0_455, %c0_456] : memref<2x4x128xf32, #tpu.memory_space<vmem>>, vector<1x4x128xf32>
    %441 = vector.shape_cast %440 : vector<1x4x128xf32> to vector<4x128xf32>
    %c0_457 = arith.constant 0 : index
    %c0_458 = arith.constant 0 : index
    %c0_459 = arith.constant 0 : index
    %c0_460 = arith.constant 0 : index
    %442 = vector.load %arg8[%c0_457, %c0_458, %c0_459, %c0_460] : memref<2x4x6x128xf32, #tpu.memory_space<vmem>>, vector<1x4x6x128xf32>
    %443 = vector.shape_cast %442 : vector<1x4x6x128xf32> to vector<4x6x128xf32>
    %444 = vector.shape_cast %441 : vector<4x128xf32> to vector<4x1x128xf32>
    %445 = vector.broadcast %444 : vector<4x1x128xf32> to vector<4x6x128xf32>
    %446 = arith.mulf %443, %445 : vector<4x6x128xf32>
    %cst_461 = arith.constant dense<0.000000e+00> : vector<4x6xf32>
    %447 = vector.multi_reduction <add>, %446, %cst_461 [2] : vector<4x6x128xf32> to vector<4x6xf32>
    %448 = tpu.iota {dimensions = array<i32: 1>} : vector<4x6xi32>
    %c0_i32_462 = arith.constant 0 : i32
    %449 = vector.broadcast %c0_i32_462 : i32 to vector<4x6xi32>
    %450 = arith.cmpi eq, %448, %449 : vector<4x6xi32>
    %cst_463 = arith.constant 0.000000e+00 : f32
    %451 = vector.broadcast %cst_463 : f32 to vector<4x6xf32>
    %452 = arith.subf %451, %447 : vector<4x6xf32>
    %453 = arith.select %450, %447, %452 : vector<4x6xi1>, vector<4x6xf32>
    %454 = arith.negf %453 : vector<4x6xf32>
    %455 = math.exp %454 : vector<4x6xf32>
    %cst_464 = arith.constant 1.000000e+00 : f32
    %456 = vector.broadcast %cst_464 : f32 to vector<4x6xf32>
    %457 = arith.addf %456, %455 : vector<4x6xf32>
    %458 = arith.divf %456, %457 : vector<4x6xf32>
    %cst_465 = arith.constant 1.000000e-10 : f32
    %459 = vector.broadcast %cst_465 : f32 to vector<4x6xf32>
    %460 = arith.addf %458, %459 : vector<4x6xf32>
    %461 = math.log %460 : vector<4x6xf32>
    %cst_466 = arith.constant dense<0.000000e+00> : vector<4xf32>
    %462 = vector.multi_reduction <add>, %461, %cst_466 [1] : vector<4x6xf32> to vector<4xf32>
    %463 = vector.shape_cast %462 : vector<4xf32> to vector<4x1xf32>
    %cst_467 = arith.constant 0.000000e+00 : f32
    %464 = vector.broadcast %cst_467 : f32 to vector<4x1xf32>
    %465 = arith.subf %464, %463 : vector<4x1xf32>
    %c0_i32_468 = arith.constant 0 : i32
    %466 = arith.addi %0, %c0_i32_468 : i32
    %467 = tpu.iota {dimensions = array<i32: 0>} : vector<4x1xi32>
    %468 = vector.broadcast %466 : i32 to vector<4x1xi32>
    %469 = arith.addi %468, %467 : vector<4x1xi32>
    %c4_i32_469 = arith.constant 4 : i32
    %470 = vector.broadcast %c4_i32_469 : i32 to vector<4x1xi32>
    %471 = arith.cmpi slt, %469, %470 : vector<4x1xi32>
    %cst_470 = arith.constant 0.000000e+00 : f32
    %472 = vector.broadcast %cst_470 : f32 to vector<4x1xf32>
    %473 = arith.select %471, %465, %472 : vector<4x1xi1>, vector<4x1xf32>
    %c0_471 = arith.constant 0 : index
    %c0_472 = arith.constant 0 : index
    %c0_473 = arith.constant 0 : index
    %474 = vector.load %arg6[%c0_471, %c0_472, %c0_473] : memref<1x8x128xf32, #tpu.memory_space<vmem>>, vector<1x8x128xf32>
    %475 = vector.shape_cast %473 : vector<4x1xf32> to vector<1x4x1xf32>
    %cst_474 = arith.constant dense<0.000000e+00> : vector<1xf32>
    %476 = vector.multi_reduction <add>, %475, %cst_474 [1, 2] : vector<1x4x1xf32> to vector<1xf32>
    %477 = vector.shape_cast %476 : vector<1xf32> to vector<1x1x1xf32>
    %478 = vector.extract %477[0, 0, 0] : f32 from vector<1x1x1xf32>
    %479 = vector.broadcast %478 : f32 to vector<1x8x128xf32>
    %480 = arith.addf %474, %479 : vector<1x8x128xf32>
    %c0_475 = arith.constant 0 : index
    %c0_476 = arith.constant 0 : index
    %c0_477 = arith.constant 0 : index
    %481 = vector.load %arg6[%c0_475, %c0_476, %c0_477] : memref<1x8x128xf32, #tpu.memory_space<vmem>>, vector<1x8x128xf32>
    tpu.vector_store %arg6[%c0_475, %c0_476, %c0_477], %480 {strides = array<i32>} : memref<1x8x128xf32, #tpu.memory_space<vmem>>, vector<1x8x128xf32>,
    return
  }
  func.func @transform_2(%arg0: i32, %arg1: memref<4xi32, #tpu.memory_space<smem>>, %arg2: memref<4xi32, #tpu.memory_space<smem>>, %arg3: memref<20xi32, #tpu.memory_space<smem>>) -> (i32, i32, i32) {
    %c0_i32 = arith.constant 0 : i32
    %c0_i32_0 = arith.constant 0 : i32
    %c0_i32_1 = arith.constant 0 : i32
    return %arg0, %c0_i32, %c0_i32_0 : i32, i32, i32
  }
}

</mosaic_0001>

<bundles_post_ra>
// kernel: tpu_custom_call.1
= control target key start
LH: loop header
LB: loop body
LE: loop exit
PB: predicated region body
PF: predicated region fallthrough
CT: control target
= control target key end

     0   :  { %s2225_s0 = inlined_call_operand.hbm [shape: s32[4], index: 0, kind: input, shape index: {}]   ;;  %s2226_s3 = inlined_call_operand.hbm [shape: f32[16,128], index: 3, kind: input, shape index: {}]   ;;  %s2227_s4 = inlined_call_operand.hbm [shape: f32[32,128], index: 4, kind: input, shape index: {}]   ;;  %s2228_s5 = inlined_call_operand.hbm [shape: f32[1,8,128], index: 5, kind: output, shape index: {}]   ;;  %s2229_s1 = inlined_call_operand.vmem [shape: s32[4], index: 1, kind: input, shape index: {}]   ;;  %s2230_s2 = inlined_call_operand.vmem [shape: s32[20], index: 2, kind: input, shape index: {}]  }
   0x1   :  { %s916_s20 = scalar_lea.hbm %s2225_s0, 16 }
   0x2   :  { %p917_p0 = scmp.ne.s32.totalorder %s2225_s0, %s916_s20  ;;  %p920_p1 = scmp.lt.u32.totalorder %s916_s20, %s2225_s0 }
   0x4   :  { %p922_p2 = pnand %p920_p1, %p917_p0 }
   0x6   :  { %925 = shalt.err (!%p922_p2)  }
   0x7   :  { %s1656_s25 = smov [#allocation6]   ;;  %s12_s30 = sshll.u32 %s2229_s1, 4  ;;  %s13_s30 = int_to_ptr.vmem [resolvable:$true] %s12_s30 }
   0x8   :  { %11 = dma.hbm_to_smem %s2225_s0, 16, %s1656_s25, [#allocation5] }
   0x9   :  { %s16_s8 = sshll.u32 %s2230_s2, 4  ;;  %s926_s9 = scalar_lea.vmem %s13_s30, 16  ;;  %s17_s8 = int_to_ptr.vmem [resolvable:$true] %s16_s8 }
   0xa   :  { %p927_p3 = scmp.ne.s32.totalorder %s13_s30, %s926_s9  ;;  %p931_p4 = scmp.lt.s32.totalorder %s13_s30, %s13_s30 }
   0xb   :  { %p932_p5 = scmp.lt.s32.totalorder %s926_s9, %s926_s9 }
   0xd   :  { %p933_p6 = por %p932_p5, %p931_p4 }
   0xf   :  { %p934_p7 = pnand %p933_p6, %p927_p3 }
  0x11   :  { %937 = shalt.err (!%p934_p7)  }
  0x12   :  { %s1657_s10 = smov [#allocation7]   ;;  %s938_s0 = scalar_lea.vmem %s17_s8, 16 }
  0x13   :  { %15 = dma.vmem_to_smem %s13_s30, 16, %s1657_s10, [#allocation5] }
  0x14   :  { %p939_p8 = scmp.ne.s32.totalorder %s17_s8, %s938_s0  ;;  %p943_p9 = scmp.lt.s32.totalorder %s17_s8, %s17_s8 }
  0x15   :  { %p944_p10 = scmp.lt.s32.totalorder %s938_s0, %s938_s0 }
  0x17   :  { %p945_p11 = por %p944_p10, %p943_p9 }
  0x19   :  { %p946_p12 = pnand %p945_p11, %p939_p8 }
  0x1b   :  { %949 = shalt.err (!%p946_p12)  }
  0x1c   :  { %s1658_s1 = smov [#allocation8]  }
  0x1d   :  { %19 = dma.vmem_to_smem %s17_s8, 16, %s1658_s1, [#allocation5] }
  0x1e   :  { %1644 = dma.done.wait [#allocation5], 48 }
  0x1f   :  { %1645 = vsyncadd [#allocation5], 4294967248 }
  0x20   :  { %21 = sfence }
  0x21   :  { %22 = vsyncpa [#allocation10], 0  ;;  %s24_s2 = sld [smem:[#allocation6]]  ;;  %s1659_s11 = smov [#allocation2]   ;;  %v1660_v0 = vmov 0.0  }
  0x22   :  { %s34_s12 = sshll.u32 %s1659_s11, 4  ;;  %s1738_s13 = sld [smem:[#allocation7]]  ;;  %468 = vst [vmem:[#allocation9] sm:$0xff] %v1660_v0  ;;  %s1740_s12 = int_to_ptr.vmem [resolvable:$true] %s34_s12 }
  0x23   :  { %s1661_s14 = smov [#allocation3]   ;;  %s1742_s16 = sld [smem:[#allocation8]] }
  0x24   :  { %s48_s15 = sshll.u32 %s1661_s14, 4  ;;  %s1662_s17 = smov [#allocation3 + $0x1]   ;;  %s1744_s15 = int_to_ptr.vmem [resolvable:$true] %s48_s15 }
  0x25   :  { %s64_s18 = sshll.u32 %s1662_s17, 4  ;;  %s1746_s19 = sld [smem:[#allocation8 + $0x1]]  ;;  %s1748_s18 = int_to_ptr.vmem [resolvable:$true] %s64_s18 }
  0x26   :  { %s1757_s28 = scalar_lea.hbm %s2226_s3, 256 }
  0x27   :  { %s811_s20 = sshll.u32 %s24_s2, 4 }
  0x28   :  { %s26_s23 = scalar_lea.hbm %s2226_s3, %s811_s20  ;;  %s812_s24 = sshll.u32 %s1738_s13, 4 }
  0x29   :  { %s950_s25 = scalar_lea.hbm %s26_s23, 16  ;;  %p953_p0 = scmp.lt.u32.totalorder %s26_s23, %s2226_s3 }
  0x2a   :  { %p951_p13 = scmp.ne.s32.totalorder %s26_s23, %s950_s25  ;;  %p954_p1 = scmp.lt.u32.totalorder %s1757_s28, %s950_s25 }
  0x2b   :  { %p956_p3 = scmp.lt.u32.totalorder %s950_s25, %s26_s23 }
  0x2c   :  { %p955_p2 = por %p954_p1, %p953_p0 }
  0x2e   :  { %p957_p4 = por %p956_p3, %p955_p2 }
  0x30   :  { %p958_p5 = pnand %p957_p4, %p951_p13 }
  0x32   :  { %961 = shalt.err (!%p958_p5)  }
  0x33   :  { %s962_s6 = scalar_lea.vmem %s1740_s12, 16  ;;  %s1766_s7 = scalar_lea.vmem %s1740_s12, 128 }
  0x34   :  { %p963_p6 = scmp.ne.s32.totalorder %s1740_s12, %s962_s6  ;;  %p967_p7 = scmp.lt.s32.totalorder %s1740_s12, %s1740_s12 }
  0x35   :  { %p968_p8 = scmp.lt.s32.totalorder %s1766_s7, %s962_s6 }
  0x37   :  { %p969_p9 = por %p968_p8, %p967_p7 }
  0x39   :  { %p970_p10 = pnand %p969_p9, %p963_p6 }
  0x3b   :  { %973 = shalt.err (!%p970_p10)  }
  0x3c   :  { %37 = dma.hbm_to_vmem [thread:$0]  %s26_s23, 16, %s1740_s12, [#allocation4] }
  0x3d   :  { %s40_s10 = scalar_lea.hbm %s2227_s4, %s812_s24  ;;  %s813_s0 = sshll.u32 %s1742_s16, 4 }
  0x3e   :  { %s974_s1 = scalar_lea.hbm %s40_s10, 16  ;;  %s1779_s13 = scalar_lea.hbm %s2227_s4, 512 }
  0x3f   :  { %p975_p11 = scmp.ne.s32.totalorder %s40_s10, %s974_s1  ;;  %p977_p12 = scmp.lt.u32.totalorder %s40_s10, %s2227_s4 }
  0x40   :  { %p978_p13 = scmp.lt.u32.totalorder %s1779_s13, %s974_s1  ;;  %p980_p1 = scmp.lt.u32.totalorder %s974_s1, %s40_s10 }
  0x42   :  { %p979_p0 = por %p978_p13, %p977_p12 }
  0x44   :  { %p981_p2 = por %p980_p1, %p979_p0 }
  0x46   :  { %p982_p3 = pnand %p981_p2, %p975_p11 }
  0x48   :  { %985 = shalt.err (!%p982_p3)  }
  0x49   :  { %s986_s16 = scalar_lea.vmem %s1744_s15, 16  ;;  %s1788_s20 = scalar_lea.vmem %s1744_s15, 1024 }
  0x4a   :  { %p987_p4 = scmp.ne.s32.totalorder %s1744_s15, %s986_s16  ;;  %p991_p5 = scmp.lt.s32.totalorder %s1744_s15, %s1744_s15 }
  0x4b   :  { %p992_p6 = scmp.lt.s32.totalorder %s1788_s20, %s986_s16 }
  0x4d   :  { %p993_p7 = por %p992_p6, %p991_p5 }
  0x4f   :  { %p994_p8 = pnand %p993_p7, %p987_p4 }
  0x51   :  { %997 = shalt.err (!%p994_p8)  }
  0x52   :  { %51 = dma.hbm_to_vmem [thread:$0]  %s40_s10, 16, %s1744_s15, [#allocation4] }
  0x53   :  { %s55_s23 = scalar_lea.hbm %s2227_s4, %s813_s0  ;;  %s815_s24 = sshll.u32 %s1746_s19, 4 }
  0x54   :  { %s998_s25 = scalar_lea.hbm %s55_s23, 16  ;;  %p1001_p10 = scmp.lt.u32.totalorder %s55_s23, %s2227_s4 }
  0x55   :  { %p999_p9 = scmp.ne.s32.totalorder %s55_s23, %s998_s25  ;;  %p1002_p11 = scmp.lt.u32.totalorder %s1779_s13, %s998_s25 }
  0x56   :  { %p1004_p13 = scmp.lt.u32.totalorder %s998_s25, %s55_s23 }
  0x57   :  { %p1003_p12 = por %p1002_p11, %p1001_p10 }
  0x59   :  { %p1005_p0 = por %p1004_p13, %p1003_p12 }
  0x5b   :  { %p1006_p1 = pnand %p1005_p0, %p999_p9 }
  0x5d   :  { %1009 = shalt.err (!%p1006_p1)  }
  0x5e   :  { %s1010_s29 = scalar_lea.vmem %s1748_s18, 16  ;;  %p1015_p3 = scmp.lt.s32.totalorder %s1748_s18, %s1744_s15 }
  0x5f   :  { %p1011_p2 = scmp.ne.s32.totalorder %s1748_s18, %s1010_s29  ;;  %p1016_p4 = scmp.lt.s32.totalorder %s1788_s20, %s1010_s29 }
  0x61   :  { %p1017_p5 = por %p1016_p4, %p1015_p3 }
  0x63   :  { %p1018_p6 = pnand %p1017_p5, %p1011_p2 }
  0x65   :  { %1021 = shalt.err (!%p1018_p6)  }
  0x66   :  { %67 = dma.hbm_to_vmem [thread:$0]  %s55_s23, 16, %s1748_s18, [#allocation4] }
  0x67   :  { %s71_s6 = scalar_lea.hbm %s2227_s4, %s815_s24  ;;  %s1663_s8 = smov [#allocation3 + $0x2]  }
  0x68   :  { %s80_s9 = sshll.u32 %s1663_s8, 4  ;;  %s1811_s10 = sld [smem:[#allocation8 + $0x2]]  ;;  %s81_s9 = int_to_ptr.vmem [resolvable:$true] %s80_s9 }
  0x69   :  { %s1022_s0 = scalar_lea.hbm %s71_s6, 16  ;;  %p1025_p8 = scmp.lt.u32.totalorder %s71_s6, %s2227_s4 }
  0x6a   :  { %p1023_p7 = scmp.ne.s32.totalorder %s71_s6, %s1022_s0  ;;  %p1026_p9 = scmp.lt.u32.totalorder %s1779_s13, %s1022_s0 }
  0x6b   :  { %p1028_p11 = scmp.lt.u32.totalorder %s1022_s0, %s71_s6 }
  0x6c   :  { %p1027_p10 = por %p1026_p9, %p1025_p8 }
  0x6e   :  { %p1029_p12 = por %p1028_p11, %p1027_p10 }
  0x70   :  { %p1030_p13 = pnand %p1029_p12, %p1023_p7 }
  0x72   :  { %1033 = shalt.err (!%p1030_p13)  }
  0x73   :  { %s1034_s18 = scalar_lea.vmem %s81_s9, 16  ;;  %p1039_p1 = scmp.lt.s32.totalorder %s81_s9, %s1744_s15 }
  0x74   :  { %p1035_p0 = scmp.ne.s32.totalorder %s81_s9, %s1034_s18  ;;  %p1040_p2 = scmp.lt.s32.totalorder %s1788_s20, %s1034_s18 }
  0x76   :  { %p1041_p3 = por %p1040_p2, %p1039_p1 }
  0x78   :  { %p1042_p4 = pnand %p1041_p3, %p1035_p0 }
  0x7a   :  { %1045 = shalt.err (!%p1042_p4)  }
  0x7b   :  { %83 = dma.hbm_to_vmem [thread:$0]  %s71_s6, 16, %s81_s9, [#allocation4] }
  0x7c   :  { %s1664_s11 = smov [#allocation3 + $0x3]   ;;  %s1819_s17 = sld [smem:[#allocation8 + $0x3]] }
  0x7d   :  { %s96_s14 = sshll.u32 %s1664_s11, 4  ;;  %s1665_s16 = smov [#allocation3 + $0x4]   ;;  %s97_s14 = int_to_ptr.vmem [resolvable:$true] %s96_s14 }
  0x7e   :  { %s112_s21 = sshll.u32 %s1665_s16, 4  ;;  %s1821_s22 = sld [smem:[#allocation8 + $0x4]]  ;;  %s1824_s21 = int_to_ptr.vmem [resolvable:$true] %s112_s21 }
  0x7f   :  { %s817_s23 = sshll.u32 %s1811_s10, 4 }
  0x80   :  { %s87_s26 = scalar_lea.hbm %s2227_s4, %s817_s23 }
  0x81   :  { %s1046_s27 = scalar_lea.hbm %s87_s26, 16  ;;  %p1049_p6 = scmp.lt.u32.totalorder %s87_s26, %s2227_s4 }
  0x82   :  { %p1047_p5 = scmp.ne.s32.totalorder %s87_s26, %s1046_s27  ;;  %p1050_p7 = scmp.lt.u32.totalorder %s1779_s13, %s1046_s27 }
  0x83   :  { %p1052_p9 = scmp.lt.u32.totalorder %s1046_s27, %s87_s26 }
  0x84   :  { %p1051_p8 = por %p1050_p7, %p1049_p6 }
  0x86   :  { %p1053_p10 = por %p1052_p9, %p1051_p8 }
  0x88   :  { %p1054_p11 = pnand %p1053_p10, %p1047_p5 }
  0x8a   :  { %1057 = shalt.err (!%p1054_p11)  }
  0x8b   :  { %s1058_s30 = scalar_lea.vmem %s97_s14, 16  ;;  %p1063_p13 = scmp.lt.s32.totalorder %s97_s14, %s1744_s15 }
  0x8c   :  { %p1059_p12 = scmp.ne.s32.totalorder %s97_s14, %s1058_s30  ;;  %p1064_p0 = scmp.lt.s32.totalorder %s1788_s20, %s1058_s30 }
  0x8e   :  { %p1065_p1 = por %p1064_p0, %p1063_p13 }
  0x90   :  { %p1066_p2 = pnand %p1065_p1, %p1059_p12 }
  0x92   :  { %1069 = shalt.err (!%p1066_p2)  }
  0x93   :  { %99 = dma.hbm_to_vmem [thread:$0]  %s87_s26, 16, %s97_s14, [#allocation4] }
  0x94   :  { %s819_s6 = sshll.u32 %s1819_s17, 4  ;;  %s1666_s8 = smov [#allocation3 + $0x5]  }
  0x95   :  { %s128_s9 = sshll.u32 %s1666_s8, 4  ;;  %s103_s1 = scalar_lea.hbm %s2227_s4, %s819_s6  ;;  %s1839_s9 = int_to_ptr.vmem [resolvable:$true] %s128_s9 }
  0x96   :  { %s1070_s2 = scalar_lea.hbm %s103_s1, 16  ;;  %p1073_p4 = scmp.lt.u32.totalorder %s103_s1, %s2227_s4 }
  0x97   :  { %p1071_p3 = scmp.ne.s32.totalorder %s103_s1, %s1070_s2  ;;  %p1074_p5 = scmp.lt.u32.totalorder %s1779_s13, %s1070_s2 }
  0x98   :  { %p1076_p7 = scmp.lt.u32.totalorder %s1070_s2, %s103_s1 }
  0x99   :  { %p1075_p6 = por %p1074_p5, %p1073_p4 }
  0x9b   :  { %p1077_p8 = por %p1076_p7, %p1075_p6 }
  0x9d   :  { %p1078_p9 = pnand %p1077_p8, %p1071_p3 }
  0x9f   :  { %1081 = shalt.err (!%p1078_p9)  }
  0xa0   :  { %s1082_s14 = scalar_lea.vmem %s1824_s21, 16  ;;  %p1087_p11 = scmp.lt.s32.totalorder %s1824_s21, %s1744_s15 }
  0xa1   :  { %p1083_p10 = scmp.ne.s32.totalorder %s1824_s21, %s1082_s14  ;;  %p1088_p12 = scmp.lt.s32.totalorder %s1788_s20, %s1082_s14 }
  0xa3   :  { %p1089_p13 = por %p1088_p12, %p1087_p11 }
  0xa5   :  { %p1090_p0 = pnand %p1089_p13, %p1083_p10 }
  0xa7   :  { %1093 = shalt.err (!%p1090_p0)  }
  0xa8   :  { %115 = dma.hbm_to_vmem [thread:$0]  %s103_s1, 16, %s1824_s21, [#allocation4] }
  0xa9   :  { %s821_s17 = sshll.u32 %s1821_s22, 4  ;;  %s1852_s16 = sld [smem:[#allocation6 + $0x1]] }
  0xaa   :  { %s119_s25 = scalar_lea.hbm %s2227_s4, %s821_s17 }
  0xab   :  { %s1094_s26 = scalar_lea.hbm %s119_s25, 16  ;;  %p1097_p2 = scmp.lt.u32.totalorder %s119_s25, %s2227_s4 }
  0xac   :  { %p1095_p1 = scmp.ne.s32.totalorder %s119_s25, %s1094_s26  ;;  %p1098_p3 = scmp.lt.u32.totalorder %s1779_s13, %s1094_s26 }
  0xad   :  { %p1100_p5 = scmp.lt.u32.totalorder %s1094_s26, %s119_s25 }
  0xae   :  { %p1099_p4 = por %p1098_p3, %p1097_p2 }
  0xb0   :  { %p1101_p6 = por %p1100_p5, %p1099_p4 }
  0xb2   :  { %p1102_p7 = pnand %p1101_p6, %p1095_p1 }
  0xb4   :  { %1105 = shalt.err (!%p1102_p7)  }
  0xb5   :  { %s1106_s21 = scalar_lea.vmem %s1839_s9, 16  ;;  %p1111_p9 = scmp.lt.s32.totalorder %s1839_s9, %s1744_s15 }
  0xb6   :  { %p1107_p8 = scmp.ne.s32.totalorder %s1839_s9, %s1106_s21  ;;  %p1112_p10 = scmp.lt.s32.totalorder %s1788_s20, %s1106_s21 }
  0xb8   :  { %p1113_p11 = por %p1112_p10, %p1111_p9 }
  0xba   :  { %p1114_p12 = pnand %p1113_p11, %p1107_p8 }
  0xbc   :  { %1117 = shalt.err (!%p1114_p12)  }
  0xbd   :  { %131 = dma.hbm_to_vmem [thread:$0]  %s119_s25, 16, %s1839_s9, [#allocation4] }
  0xbe   :  { %s1667_s22 = smov [#allocation2 + $0x1]   ;;  %s1867_s30 = sld [smem:[#allocation7 + $0x1]] }
  0xbf   :  { %s145_s19 = sshll.u32 %s1667_s22, 4  ;;  %s1668_s6 = smov [#allocation3 + $0x8]   ;;  %s146_s19 = int_to_ptr.vmem [resolvable:$true] %s145_s19 }
  0xc0   :  { %s160_s8 = sshll.u32 %s1668_s6, 4  ;;  %s1869_s10 = sld [smem:[#allocation8 + $0x5]]  ;;  %s1872_s8 = int_to_ptr.vmem [resolvable:$true] %s160_s8 }
  0xc1   :  { %s823_s0 = sshll.u32 %s1852_s16, 4 }
  0xc2   :  { %s135_s18 = scalar_lea.hbm %s2226_s3, %s823_s0 }
  0xc3   :  { %s1118_s11 = scalar_lea.hbm %s135_s18, 16  ;;  %p1121_p0 = scmp.lt.u32.totalorder %s135_s18, %s2226_s3 }
  0xc4   :  { %p1119_p13 = scmp.ne.s32.totalorder %s135_s18, %s1118_s11  ;;  %p1122_p1 = scmp.lt.u32.totalorder %s1757_s28, %s1118_s11 }
  0xc5   :  { %p1124_p3 = scmp.lt.u32.totalorder %s1118_s11, %s135_s18 }
  0xc6   :  { %p1123_p2 = por %p1122_p1, %p1121_p0 }
  0xc8   :  { %p1125_p4 = por %p1124_p3, %p1123_p2 }
  0xca   :  { %p1126_p5 = pnand %p1125_p4, %p1119_p13 }
  0xcc   :  { %1129 = shalt.err (!%p1126_p5)  }
  0xcd   :  { %s1130_s17 = scalar_lea.vmem %s146_s19, 16  ;;  %p1135_p7 = scmp.lt.s32.totalorder %s146_s19, %s1740_s12 }
  0xce   :  { %p1131_p6 = scmp.ne.s32.totalorder %s146_s19, %s1130_s17  ;;  %p1136_p8 = scmp.lt.s32.totalorder %s1766_s7, %s1130_s17 }
  0xd0   :  { %p1137_p9 = por %p1136_p8, %p1135_p7 }
  0xd2   :  { %p1138_p10 = pnand %p1137_p9, %p1131_p6 }
  0xd4   :  { %1141 = shalt.err (!%p1138_p10)  }
  0xd5   :  { %148 = dma.hbm_to_vmem [thread:$0]  %s135_s18, 16, %s146_s19, [#allocation4 + $0x1] }
  0xd6   :  { %s825_s16 = sshll.u32 %s1867_s30, 4  ;;  %s1669_s23 = smov [#allocation3 + $0x9]  }
  0xd7   :  { %s176_s24 = sshll.u32 %s1669_s23, 4  ;;  %s151_s27 = scalar_lea.hbm %s2227_s4, %s825_s16  ;;  %s1887_s24 = int_to_ptr.vmem [resolvable:$true] %s176_s24 }
  0xd8   :  { %s1142_s29 = scalar_lea.hbm %s151_s27, 16  ;;  %p1145_p12 = scmp.lt.u32.totalorder %s151_s27, %s2227_s4 }
  0xd9   :  { %p1143_p11 = scmp.ne.s32.totalorder %s151_s27, %s1142_s29  ;;  %p1146_p13 = scmp.lt.u32.totalorder %s1779_s13, %s1142_s29 }
  0xda   :  { %p1148_p1 = scmp.lt.u32.totalorder %s1142_s29, %s151_s27 }
  0xdb   :  { %p1147_p0 = por %p1146_p13, %p1145_p12 }
  0xdd   :  { %p1149_p2 = por %p1148_p1, %p1147_p0 }
  0xdf   :  { %p1150_p3 = pnand %p1149_p2, %p1143_p11 }
  0xe1   :  { %1153 = shalt.err (!%p1150_p3)  }
  0xe2   :  { %s1154_s19 = scalar_lea.vmem %s1872_s8, 16  ;;  %p1159_p5 = scmp.lt.s32.totalorder %s1872_s8, %s1744_s15 }
  0xe3   :  { %p1155_p4 = scmp.ne.s32.totalorder %s1872_s8, %s1154_s19  ;;  %p1160_p6 = scmp.lt.s32.totalorder %s1788_s20, %s1154_s19 }
  0xe5   :  { %p1161_p7 = por %p1160_p6, %p1159_p5 }
  0xe7   :  { %p1162_p8 = pnand %p1161_p7, %p1155_p4 }
  0xe9   :  { %1165 = shalt.err (!%p1162_p8)  }
  0xea   :  { %163 = dma.hbm_to_vmem [thread:$0]  %s151_s27, 16, %s1872_s8, [#allocation4 + $0x1] }
  0xeb   :  { %s827_s30 = sshll.u32 %s1869_s10, 4  ;;  %s1900_s6 = sld [smem:[#allocation8 + $0x6]] }
  0xec   :  { %s167_s2 = scalar_lea.hbm %s2227_s4, %s827_s30 }
  0xed   :  { %s1166_s18 = scalar_lea.hbm %s167_s2, 16  ;;  %p1169_p10 = scmp.lt.u32.totalorder %s167_s2, %s2227_s4 }
  0xee   :  { %p1167_p9 = scmp.ne.s32.totalorder %s167_s2, %s1166_s18  ;;  %p1170_p11 = scmp.lt.u32.totalorder %s1779_s13, %s1166_s18 }
  0xef   :  { %p1172_p13 = scmp.lt.u32.totalorder %s1166_s18, %s167_s2 }
  0xf0   :  { %p1171_p12 = por %p1170_p11, %p1169_p10 }
  0xf2   :  { %p1173_p0 = por %p1172_p13, %p1171_p12 }
  0xf4   :  { %p1174_p1 = pnand %p1173_p0, %p1167_p9 }
  0xf6   :  { %1177 = shalt.err (!%p1174_p1)  }
  0xf7   :  { %s1178_s8 = scalar_lea.vmem %s1887_s24, 16  ;;  %p1183_p3 = scmp.lt.s32.totalorder %s1887_s24, %s1744_s15 }
  0xf8   :  { %p1179_p2 = scmp.ne.s32.totalorder %s1887_s24, %s1178_s8  ;;  %p1184_p4 = scmp.lt.s32.totalorder %s1788_s20, %s1178_s8 }
  0xfa   :  { %p1185_p5 = por %p1184_p4, %p1183_p3 }
  0xfc   :  { %p1186_p6 = pnand %p1185_p5, %p1179_p2 }
  0xfe   :  { %1189 = shalt.err (!%p1186_p6)  }
  0xff   :  { %179 = dma.hbm_to_vmem [thread:$0]  %s167_s2, 16, %s1887_s24, [#allocation4 + $0x1] }
 0x100   :  { %s1670_s10 = smov [#allocation3 + $0xa]   ;;  %s1915_s17 = sld [smem:[#allocation8 + $0x7]] }
 0x101   :  { %s192_s9 = sshll.u32 %s1670_s10, 4  ;;  %s1671_s16 = smov [#allocation3 + $0xb]   ;;  %s193_s9 = int_to_ptr.vmem [resolvable:$true] %s192_s9 }
 0x102   :  { %s208_s23 = sshll.u32 %s1671_s16, 4  ;;  %s1917_s25 = sld [smem:[#allocation8 + $0x8]]  ;;  %s1920_s23 = int_to_ptr.vmem [resolvable:$true] %s208_s23 }
 0x103   :  { %s829_s26 = sshll.u32 %s1900_s6, 4 }
 0x104   :  { %s183_s21 = scalar_lea.hbm %s2227_s4, %s829_s26 }
 0x105   :  { %s1190_s22 = scalar_lea.hbm %s183_s21, 16  ;;  %p1193_p8 = scmp.lt.u32.totalorder %s183_s21, %s2227_s4 }
 0x106   :  { %p1191_p7 = scmp.ne.s32.totalorder %s183_s21, %s1190_s22  ;;  %p1194_p9 = scmp.lt.u32.totalorder %s1779_s13, %s1190_s22 }
 0x107   :  { %p1196_p11 = scmp.lt.u32.totalorder %s1190_s22, %s183_s21 }
 0x108   :  { %p1195_p10 = por %p1194_p9, %p1193_p8 }
 0x10a   :  { %p1197_p12 = por %p1196_p11, %p1195_p10 }
 0x10c   :  { %p1198_p13 = pnand %p1197_p12, %p1191_p7 }
 0x10e   :  { %1201 = shalt.err (!%p1198_p13)  }
 0x10f   :  { %s1202_s30 = scalar_lea.vmem %s193_s9, 16  ;;  %p1207_p1 = scmp.lt.s32.totalorder %s193_s9, %s1744_s15 }
 0x110   :  { %p1203_p0 = scmp.ne.s32.totalorder %s193_s9, %s1202_s30  ;;  %p1208_p2 = scmp.lt.s32.totalorder %s1788_s20, %s1202_s30 }
 0x112   :  { %p1209_p3 = por %p1208_p2, %p1207_p1 }
 0x114   :  { %p1210_p4 = pnand %p1209_p3, %p1203_p0 }
 0x116   :  { %1213 = shalt.err (!%p1210_p4)  }
 0x117   :  { %195 = dma.hbm_to_vmem [thread:$0]  %s183_s21, 16, %s193_s9, [#allocation4 + $0x1] }
 0x118   :  { %s831_s6 = sshll.u32 %s1915_s17, 4  ;;  %s1672_s0 = smov [#allocation3 + $0xc]  }
 0x119   :  { %s224_s1 = sshll.u32 %s1672_s0, 4  ;;  %s199_s11 = scalar_lea.hbm %s2227_s4, %s831_s6  ;;  %s1935_s1 = int_to_ptr.vmem [resolvable:$true] %s224_s1 }
 0x11a   :  { %s1214_s14 = scalar_lea.hbm %s199_s11, 16  ;;  %p1217_p6 = scmp.lt.u32.totalorder %s199_s11, %s2227_s4 }
 0x11b   :  { %p1215_p5 = scmp.ne.s32.totalorder %s199_s11, %s1214_s14  ;;  %p1218_p7 = scmp.lt.u32.totalorder %s1779_s13, %s1214_s14 }
 0x11c   :  { %p1220_p9 = scmp.lt.u32.totalorder %s1214_s14, %s199_s11 }
 0x11d   :  { %p1219_p8 = por %p1218_p7, %p1217_p6 }
 0x11f   :  { %p1221_p10 = por %p1220_p9, %p1219_p8 }
 0x121   :  { %p1222_p11 = pnand %p1221_p10, %p1215_p5 }
 0x123   :  { %1225 = shalt.err (!%p1222_p11)  }
 0x124   :  { %s1226_s9 = scalar_lea.vmem %s1920_s23, 16  ;;  %p1231_p13 = scmp.lt.s32.totalorder %s1920_s23, %s1744_s15 }
 0x125   :  { %p1227_p12 = scmp.ne.s32.totalorder %s1920_s23, %s1226_s9  ;;  %p1232_p0 = scmp.lt.s32.totalorder %s1788_s20, %s1226_s9 }
 0x127   :  { %p1233_p1 = por %p1232_p0, %p1231_p13 }
 0x129   :  { %p1234_p2 = pnand %p1233_p1, %p1227_p12 }
 0x12b   :  { %1237 = shalt.err (!%p1234_p2)  }
 0x12c   :  { %211 = dma.hbm_to_vmem [thread:$0]  %s199_s11, 16, %s1920_s23, [#allocation4 + $0x1] }
 0x12d   :  { %s833_s17 = sshll.u32 %s1917_s25, 4  ;;  %s1948_s16 = sld [smem:[#allocation8 + $0x9]] }
 0x12e   :  { %s215_s29 = scalar_lea.hbm %s2227_s4, %s833_s17 }
 0x12f   :  { %s1238_s21 = scalar_lea.hbm %s215_s29, 16  ;;  %p1241_p4 = scmp.lt.u32.totalorder %s215_s29, %s2227_s4 }
 0x130   :  { %p1239_p3 = scmp.ne.s32.totalorder %s215_s29, %s1238_s21  ;;  %p1242_p5 = scmp.lt.u32.totalorder %s1779_s13, %s1238_s21 }
 0x131   :  { %p1244_p7 = scmp.lt.u32.totalorder %s1238_s21, %s215_s29 }
 0x132   :  { %p1243_p6 = por %p1242_p5, %p1241_p4 }
 0x134   :  { %p1245_p8 = por %p1244_p7, %p1243_p6 }
 0x136   :  { %p1246_p9 = pnand %p1245_p8, %p1239_p3 }
 0x138   :  { %1249 = shalt.err (!%p1246_p9)  }
 0x139   :  { %s1250_s23 = scalar_lea.vmem %s1935_s1, 16  ;;  %p1255_p11 = scmp.lt.s32.totalorder %s1935_s1, %s1744_s15 }
 0x13a   :  { %p1251_p10 = scmp.ne.s32.totalorder %s1935_s1, %s1250_s23  ;;  %p1256_p12 = scmp.lt.s32.totalorder %s1788_s20, %s1250_s23 }
 0x13c   :  { %p1257_p13 = por %p1256_p12, %p1255_p11 }
 0x13e   :  { %p1258_p0 = pnand %p1257_p13, %p1251_p10 }
 0x140   :  { %1261 = shalt.err (!%p1258_p0)  }
 0x141   :  { %227 = dma.hbm_to_vmem [thread:$0]  %s215_s29, 16, %s1935_s1, [#allocation4 + $0x1] }
 0x142   :  { %s1673_s25 = smov [#allocation3 + $0xd]   ;;  %s1963_s30 = sld [smem:[#allocation6 + $0x2]] }
 0x143   :  { %s240_s24 = sshll.u32 %s1673_s25, 4  ;;  %s1674_s6 = smov [#allocation2 + $0x2]   ;;  %s241_s24 = int_to_ptr.vmem [resolvable:$true] %s240_s24 }
 0x144   :  { %s257_s0 = sshll.u32 %s1674_s6, 4  ;;  %s1965_s2 = sld [smem:[#allocation7 + $0x2]]  ;;  %s1968_s0 = int_to_ptr.vmem [resolvable:$true] %s257_s0 }
 0x145   :  { %s835_s18 = sshll.u32 %s1948_s16, 4 }
 0x146   :  { %s231_s8 = scalar_lea.hbm %s2227_s4, %s835_s18 }
 0x147   :  { %s1262_s10 = scalar_lea.hbm %s231_s8, 16  ;;  %p1265_p2 = scmp.lt.u32.totalorder %s231_s8, %s2227_s4 }
 0x148   :  { %p1263_p1 = scmp.ne.s32.totalorder %s231_s8, %s1262_s10  ;;  %p1266_p3 = scmp.lt.u32.totalorder %s1779_s13, %s1262_s10 }
 0x149   :  { %p1268_p5 = scmp.lt.u32.totalorder %s1262_s10, %s231_s8 }
 0x14a   :  { %p1267_p4 = por %p1266_p3, %p1265_p2 }
 0x14c   :  { %p1269_p6 = por %p1268_p5, %p1267_p4 }
 0x14e   :  { %p1270_p7 = pnand %p1269_p6, %p1263_p1 }
 0x150   :  { %1273 = shalt.err (!%p1270_p7)  }
 0x151   :  { %s1274_s17 = scalar_lea.vmem %s241_s24, 16  ;;  %p1279_p9 = scmp.lt.s32.totalorder %s241_s24, %s1744_s15 }
 0x152   :  { %p1275_p8 = scmp.ne.s32.totalorder %s241_s24, %s1274_s17  ;;  %p1280_p10 = scmp.lt.s32.totalorder %s1788_s20, %s1274_s17 }
 0x154   :  { %p1281_p11 = por %p1280_p10, %p1279_p9 }
 0x156   :  { %p1282_p12 = pnand %p1281_p11, %p1275_p8 }
 0x158   :  { %1285 = shalt.err (!%p1282_p12)  }
 0x159   :  { %243 = dma.hbm_to_vmem [thread:$0]  %s231_s8, 16, %s241_s24, [#allocation4 + $0x1] }
 0x15a   :  { %s837_s16 = sshll.u32 %s1963_s30, 4  ;;  %s1675_s26 = smov [#allocation3 + $0x10]  }
 0x15b   :  { %s272_s27 = sshll.u32 %s1675_s26, 4  ;;  %s247_s22 = scalar_lea.hbm %s2226_s3, %s837_s16  ;;  %s1983_s27 = int_to_ptr.vmem [resolvable:$true] %s272_s27 }
 0x15c   :  { %s1286_s19 = scalar_lea.hbm %s247_s22, 16  ;;  %p1289_p0 = scmp.lt.u32.totalorder %s247_s22, %s2226_s3 }
 0x15d   :  { %p1287_p13 = scmp.ne.s32.totalorder %s247_s22, %s1286_s19  ;;  %p1290_p1 = scmp.lt.u32.totalorder %s1757_s28, %s1286_s19 }
 0x15e   :  { %p1292_p3 = scmp.lt.u32.totalorder %s1286_s19, %s247_s22 }
 0x15f   :  { %p1291_p2 = por %p1290_p1, %p1289_p0 }
 0x161   :  { %p1293_p4 = por %p1292_p3, %p1291_p2 }
 0x163   :  { %p1294_p5 = pnand %p1293_p4, %p1287_p13 }
 0x165   :  { %1297 = shalt.err (!%p1294_p5)  }
 0x166   :  { %s1298_s24 = scalar_lea.vmem %s1968_s0, 16  ;;  %p1303_p7 = scmp.lt.s32.totalorder %s1968_s0, %s1740_s12 }
 0x167   :  { %p1299_p6 = scmp.ne.s32.totalorder %s1968_s0, %s1298_s24  ;;  %p1304_p8 = scmp.lt.s32.totalorder %s1766_s7, %s1298_s24 }
 0x169   :  { %p1305_p9 = por %p1304_p8, %p1303_p7 }
 0x16b   :  { %p1306_p10 = pnand %p1305_p9, %p1299_p6 }
 0x16d   :  { %1309 = shalt.err (!%p1306_p10)  }
 0x16e   :  { %260 = dma.hbm_to_vmem [thread:$0]  %s247_s22, 16, %s1968_s0, [#allocation4 + $0x2] }
 0x16f   :  { %s839_s30 = sshll.u32 %s1965_s2, 4  ;;  %s1996_s6 = sld [smem:[#allocation8 + $0xa]] }
 0x170   :  { %s263_s14 = scalar_lea.hbm %s2227_s4, %s839_s30 }
 0x171   :  { %s1310_s8 = scalar_lea.hbm %s263_s14, 16  ;;  %p1313_p12 = scmp.lt.u32.totalorder %s263_s14, %s2227_s4 }
 0x172   :  { %p1311_p11 = scmp.ne.s32.totalorder %s263_s14, %s1310_s8  ;;  %p1314_p13 = scmp.lt.u32.totalorder %s1779_s13, %s1310_s8 }
 0x173   :  { %p1316_p1 = scmp.lt.u32.totalorder %s1310_s8, %s263_s14 }
 0x174   :  { %p1315_p0 = por %p1314_p13, %p1313_p12 }
 0x176   :  { %p1317_p2 = por %p1316_p1, %p1315_p0 }
 0x178   :  { %p1318_p3 = pnand %p1317_p2, %p1311_p11 }
 0x17a   :  { %1321 = shalt.err (!%p1318_p3)  }
 0x17b   :  { %s1322_s0 = scalar_lea.vmem %s1983_s27, 16  ;;  %p1327_p5 = scmp.lt.s32.totalorder %s1983_s27, %s1744_s15 }
 0x17c   :  { %p1323_p4 = scmp.ne.s32.totalorder %s1983_s27, %s1322_s0  ;;  %p1328_p6 = scmp.lt.s32.totalorder %s1788_s20, %s1322_s0 }
 0x17e   :  { %p1329_p7 = por %p1328_p6, %p1327_p5 }
 0x180   :  { %p1330_p8 = pnand %p1329_p7, %p1323_p4 }
 0x182   :  { %1333 = shalt.err (!%p1330_p8)  }
 0x183   :  { %275 = dma.hbm_to_vmem [thread:$0]  %s263_s14, 16, %s1983_s27, [#allocation4 + $0x2] }
 0x184   :  { %s1676_s2 = smov [#allocation3 + $0x11]   ;;  %s2011_s17 = sld [smem:[#allocation8 + $0xb]] }
 0x185   :  { %s288_s1 = sshll.u32 %s1676_s2, 4  ;;  %s1677_s16 = smov [#allocation3 + $0x12]   ;;  %s289_s1 = int_to_ptr.vmem [resolvable:$true] %s288_s1 }
 0x186   :  { %s304_s26 = sshll.u32 %s1677_s16, 4  ;;  %s2013_s29 = sld [smem:[#allocation8 + $0xc]]  ;;  %s2016_s26 = int_to_ptr.vmem [resolvable:$true] %s304_s26 }
 0x187   :  { %s841_s21 = sshll.u32 %s1996_s6, 4 }
 0x188   :  { %s279_s23 = scalar_lea.hbm %s2227_s4, %s841_s21 }
 0x189   :  { %s1334_s25 = scalar_lea.hbm %s279_s23, 16  ;;  %p1337_p10 = scmp.lt.u32.totalorder %s279_s23, %s2227_s4 }
 0x18a   :  { %p1335_p9 = scmp.ne.s32.totalorder %s279_s23, %s1334_s25  ;;  %p1338_p11 = scmp.lt.u32.totalorder %s1779_s13, %s1334_s25 }
 0x18b   :  { %p1340_p13 = scmp.lt.u32.totalorder %s1334_s25, %s279_s23 }
 0x18c   :  { %p1339_p12 = por %p1338_p11, %p1337_p10 }
 0x18e   :  { %p1341_p0 = por %p1340_p13, %p1339_p12 }
 0x190   :  { %p1342_p1 = pnand %p1341_p0, %p1335_p9 }
 0x192   :  { %1345 = shalt.err (!%p1342_p1)  }
 0x193   :  { %s1346_s30 = scalar_lea.vmem %s289_s1, 16  ;;  %p1351_p3 = scmp.lt.s32.totalorder %s289_s1, %s1744_s15 }
 0x194   :  { %p1347_p2 = scmp.ne.s32.totalorder %s289_s1, %s1346_s30  ;;  %p1352_p4 = scmp.lt.s32.totalorder %s1788_s20, %s1346_s30 }
 0x196   :  { %p1353_p5 = por %p1352_p4, %p1351_p3 }
 0x198   :  { %p1354_p6 = pnand %p1353_p5, %p1347_p2 }
 0x19a   :  { %1357 = shalt.err (!%p1354_p6)  }
 0x19b   :  { %291 = dma.hbm_to_vmem [thread:$0]  %s279_s23, 16, %s289_s1, [#allocation4 + $0x2] }
 0x19c   :  { %s843_s6 = sshll.u32 %s2011_s17, 4  ;;  %s1678_s18 = smov [#allocation3 + $0x13]  }
 0x19d   :  { %s320_s11 = sshll.u32 %s1678_s18, 4  ;;  %s295_s10 = scalar_lea.hbm %s2227_s4, %s843_s6  ;;  %s2031_s11 = int_to_ptr.vmem [resolvable:$true] %s320_s11 }
 0x19e   :  { %s1358_s9 = scalar_lea.hbm %s295_s10, 16  ;;  %p1361_p8 = scmp.lt.u32.totalorder %s295_s10, %s2227_s4 }
 0x19f   :  { %p1359_p7 = scmp.ne.s32.totalorder %s295_s10, %s1358_s9  ;;  %p1362_p9 = scmp.lt.u32.totalorder %s1779_s13, %s1358_s9 }
 0x1a0   :  { %p1364_p11 = scmp.lt.u32.totalorder %s1358_s9, %s295_s10 }
 0x1a1   :  { %p1363_p10 = por %p1362_p9, %p1361_p8 }
 0x1a3   :  { %p1365_p12 = por %p1364_p11, %p1363_p10 }
 0x1a5   :  { %p1366_p13 = pnand %p1365_p12, %p1359_p7 }
 0x1a7   :  { %1369 = shalt.err (!%p1366_p13)  }
 0x1a8   :  { %s1370_s1 = scalar_lea.vmem %s2016_s26, 16  ;;  %p1375_p1 = scmp.lt.s32.totalorder %s2016_s26, %s1744_s15 }
 0x1a9   :  { %p1371_p0 = scmp.ne.s32.totalorder %s2016_s26, %s1370_s1  ;;  %p1376_p2 = scmp.lt.s32.totalorder %s1788_s20, %s1370_s1 }
 0x1ab   :  { %p1377_p3 = por %p1376_p2, %p1375_p1 }
 0x1ad   :  { %p1378_p4 = pnand %p1377_p3, %p1371_p0 }
 0x1af   :  { %1381 = shalt.err (!%p1378_p4)  }
 0x1b0   :  { %307 = dma.hbm_to_vmem [thread:$0]  %s295_s10, 16, %s2016_s26, [#allocation4 + $0x2] }
 0x1b1   :  { %s845_s17 = sshll.u32 %s2013_s29, 4  ;;  %s2044_s16 = sld [smem:[#allocation8 + $0xd]] }
 0x1b2   :  { %s311_s19 = scalar_lea.hbm %s2227_s4, %s845_s17 }
 0x1b3   :  { %s1382_s23 = scalar_lea.hbm %s311_s19, 16  ;;  %p1385_p6 = scmp.lt.u32.totalorder %s311_s19, %s2227_s4 }
 0x1b4   :  { %p1383_p5 = scmp.ne.s32.totalorder %s311_s19, %s1382_s23  ;;  %p1386_p7 = scmp.lt.u32.totalorder %s1779_s13, %s1382_s23 }
 0x1b5   :  { %p1388_p9 = scmp.lt.u32.totalorder %s1382_s23, %s311_s19 }
 0x1b6   :  { %p1387_p8 = por %p1386_p7, %p1385_p6 }
 0x1b8   :  { %p1389_p10 = por %p1388_p9, %p1387_p8 }
 0x1ba   :  { %p1390_p11 = pnand %p1389_p10, %p1383_p5 }
 0x1bc   :  { %1393 = shalt.err (!%p1390_p11)  }
 0x1bd   :  { %s1394_s26 = scalar_lea.vmem %s2031_s11, 16  ;;  %p1399_p13 = scmp.lt.s32.totalorder %s2031_s11, %s1744_s15 }
 0x1be   :  { %p1395_p12 = scmp.ne.s32.totalorder %s2031_s11, %s1394_s26  ;;  %p1400_p0 = scmp.lt.s32.totalorder %s1788_s20, %s1394_s26 }
 0x1c0   :  { %p1401_p1 = por %p1400_p0, %p1399_p13 }
 0x1c2   :  { %p1402_p2 = pnand %p1401_p1, %p1395_p12 }
 0x1c4   :  { %1405 = shalt.err (!%p1402_p2)  }
 0x1c5   :  { %323 = dma.hbm_to_vmem [thread:$0]  %s311_s19, 16, %s2031_s11, [#allocation4 + $0x2] }
 0x1c6   :  { %s1679_s29 = smov [#allocation3 + $0x14]   ;;  %s2059_s30 = sld [smem:[#allocation8 + $0xe]] }
 0x1c7   :  { %s336_s27 = sshll.u32 %s1679_s29, 4  ;;  %s1680_s6 = smov [#allocation3 + $0x15]   ;;  %s337_s27 = int_to_ptr.vmem [resolvable:$true] %s336_s27 }
 0x1c8   :  { %s352_s18 = sshll.u32 %s1680_s6, 4  ;;  %s2061_s14 = sld [smem:[#allocation6 + $0x3]]  ;;  %s2064_s18 = int_to_ptr.vmem [resolvable:$true] %s352_s18 }
 0x1c9   :  { %s847_s8 = sshll.u32 %s2044_s16, 4 }
 0x1ca   :  { %s327_s0 = scalar_lea.hbm %s2227_s4, %s847_s8 }
 0x1cb   :  { %s1406_s2 = scalar_lea.hbm %s327_s0, 16  ;;  %p1409_p4 = scmp.lt.u32.totalorder %s327_s0, %s2227_s4 }
 0x1cc   :  { %p1407_p3 = scmp.ne.s32.totalorder %s327_s0, %s1406_s2  ;;  %p1410_p5 = scmp.lt.u32.totalorder %s1779_s13, %s1406_s2 }
 0x1cd   :  { %p1412_p7 = scmp.lt.u32.totalorder %s1406_s2, %s327_s0 }
 0x1ce   :  { %p1411_p6 = por %p1410_p5, %p1409_p4 }
 0x1d0   :  { %p1413_p8 = por %p1412_p7, %p1411_p6 }
 0x1d2   :  { %p1414_p9 = pnand %p1413_p8, %p1407_p3 }
 0x1d4   :  { %1417 = shalt.err (!%p1414_p9)  }
 0x1d5   :  { %s1418_s17 = scalar_lea.vmem %s337_s27, 16  ;;  %p1423_p11 = scmp.lt.s32.totalorder %s337_s27, %s1744_s15 }
 0x1d6   :  { %p1419_p10 = scmp.ne.s32.totalorder %s337_s27, %s1418_s17  ;;  %p1424_p12 = scmp.lt.s32.totalorder %s1788_s20, %s1418_s17 }
 0x1d8   :  { %p1425_p13 = por %p1424_p12, %p1423_p11 }
 0x1da   :  { %p1426_p0 = pnand %p1425_p13, %p1419_p10 }
 0x1dc   :  { %1429 = shalt.err (!%p1426_p0)  }
 0x1dd   :  { %339 = dma.hbm_to_vmem [thread:$0]  %s327_s0, 16, %s337_s27, [#allocation4 + $0x2] }
 0x1de   :  { %s849_s16 = sshll.u32 %s2059_s30, 4  ;;  %s1681_s21 = smov [#allocation2 + $0x3]  }
 0x1df   :  { %s369_s22 = sshll.u32 %s1681_s21, 4  ;;  %s343_s25 = scalar_lea.hbm %s2227_s4, %s849_s16  ;;  %s2079_s22 = int_to_ptr.vmem [resolvable:$true] %s369_s22 }
 0x1e0   :  { %s1430_s24 = scalar_lea.hbm %s343_s25, 16  ;;  %p1433_p2 = scmp.lt.u32.totalorder %s343_s25, %s2227_s4 }
 0x1e1   :  { %p1431_p1 = scmp.ne.s32.totalorder %s343_s25, %s1430_s24  ;;  %p1434_p3 = scmp.lt.u32.totalorder %s1779_s13, %s1430_s24 }
 0x1e2   :  { %p1436_p5 = scmp.lt.u32.totalorder %s1430_s24, %s343_s25 }
 0x1e3   :  { %p1435_p4 = por %p1434_p3, %p1433_p2 }
 0x1e5   :  { %p1437_p6 = por %p1436_p5, %p1435_p4 }
 0x1e7   :  { %p1438_p7 = pnand %p1437_p6, %p1431_p1 }
 0x1e9   :  { %1441 = shalt.err (!%p1438_p7)  }
 0x1ea   :  { %s1442_s27 = scalar_lea.vmem %s2064_s18, 16  ;;  %p1447_p9 = scmp.lt.s32.totalorder %s2064_s18, %s1744_s15 }
 0x1eb   :  { %p1443_p8 = scmp.ne.s32.totalorder %s2064_s18, %s1442_s27  ;;  %p1448_p10 = scmp.lt.s32.totalorder %s1788_s20, %s1442_s27 }
 0x1ed   :  { %p1449_p11 = por %p1448_p10, %p1447_p9 }
 0x1ef   :  { %p1450_p12 = pnand %p1449_p11, %p1443_p8 }
 0x1f1   :  { %1453 = shalt.err (!%p1450_p12)  }
 0x1f2   :  { %355 = dma.hbm_to_vmem [thread:$0]  %s343_s25, 16, %s2064_s18, [#allocation4 + $0x2] }
 0x1f3   :  { %s851_s30 = sshll.u32 %s2061_s14, 4  ;;  %s2092_s6 = sld [smem:[#allocation7 + $0x3]] }
 0x1f4   :  { %s359_s9 = scalar_lea.hbm %s2226_s3, %s851_s30 }
 0x1f5   :  { %s1454_s0 = scalar_lea.hbm %s359_s9, 16  ;;  %p1457_p0 = scmp.lt.u32.totalorder %s359_s9, %s2226_s3 }
 0x1f6   :  { %p1455_p13 = scmp.ne.s32.totalorder %s359_s9, %s1454_s0  ;;  %p1458_p1 = scmp.lt.u32.totalorder %s1757_s28, %s1454_s0 }
 0x1f7   :  { %p1460_p3 = scmp.lt.u32.totalorder %s1454_s0, %s359_s9 }
 0x1f8   :  { %p1459_p2 = por %p1458_p1, %p1457_p0 }
 0x1fa   :  { %p1461_p4 = por %p1460_p3, %p1459_p2 }
 0x1fc   :  { %p1462_p5 = pnand %p1461_p4, %p1455_p13 }
 0x1fe   :  { %1465 = shalt.err (!%p1462_p5)  }
 0x1ff   :  { %s1466_s18 = scalar_lea.vmem %s2079_s22, 16  ;;  %p1471_p7 = scmp.lt.s32.totalorder %s2079_s22, %s1740_s12 }
 0x200   :  { %p1467_p6 = scmp.ne.s32.totalorder %s2079_s22, %s1466_s18  ;;  %p1472_p8 = scmp.lt.s32.totalorder %s1766_s7, %s1466_s18 }
 0x202   :  { %p1473_p9 = por %p1472_p8, %p1471_p7 }
 0x204   :  { %p1474_p10 = pnand %p1473_p9, %p1467_p6 }
 0x206   :  { %1477 = shalt.err (!%p1474_p10)  }
 0x207   :  { %372 = dma.hbm_to_vmem [thread:$0]  %s359_s9, 16, %s2079_s22, [#allocation4 + $0x3] }
 0x208   :  { %s1682_s3 = smov [#allocation3 + $0x18]   ;;  %s2107_s14 = sld [smem:[#allocation8 + $0xf]] }
 0x209   :  { %s384_s28 = sshll.u32 %s1682_s3, 4  ;;  %s1683_s11 = smov [#allocation3 + $0x19]   ;;  %s385_s28 = int_to_ptr.vmem [resolvable:$true] %s384_s28 }
 0x20a   :  { %s400_s17 = sshll.u32 %s1683_s11, 4  ;;  %s2109_s16 = sld [smem:[#allocation8 + $0x10]]  ;;  %s2112_s17 = int_to_ptr.vmem [resolvable:$true] %s400_s17 }
 0x20b   :  { %s853_s21 = sshll.u32 %s2092_s6, 4 }
 0x20c   :  { %s375_s19 = scalar_lea.hbm %s2227_s4, %s853_s21 }
 0x20d   :  { %s1478_s23 = scalar_lea.hbm %s375_s19, 16  ;;  %p1481_p12 = scmp.lt.u32.totalorder %s375_s19, %s2227_s4 }
 0x20e   :  { %p1479_p11 = scmp.ne.s32.totalorder %s375_s19, %s1478_s23  ;;  %p1482_p13 = scmp.lt.u32.totalorder %s1779_s13, %s1478_s23 }
 0x20f   :  { %p1484_p1 = scmp.lt.u32.totalorder %s1478_s23, %s375_s19 }
 0x210   :  { %p1483_p0 = por %p1482_p13, %p1481_p12 }
 0x212   :  { %p1485_p2 = por %p1484_p1, %p1483_p0 }
 0x214   :  { %p1486_p3 = pnand %p1485_p2, %p1479_p11 }
 0x216   :  { %1489 = shalt.err (!%p1486_p3)  }
 0x217   :  { %s1490_s24 = scalar_lea.vmem %s385_s28, 16  ;;  %p1495_p5 = scmp.lt.s32.totalorder %s385_s28, %s1744_s15 }
 0x218   :  { %p1491_p4 = scmp.ne.s32.totalorder %s385_s28, %s1490_s24  ;;  %p1496_p6 = scmp.lt.s32.totalorder %s1788_s20, %s1490_s24 }
 0x21a   :  { %p1497_p7 = por %p1496_p6, %p1495_p5 }
 0x21c   :  { %p1498_p8 = pnand %p1497_p7, %p1491_p4 }
 0x21e   :  { %1501 = shalt.err (!%p1498_p8)  }
 0x21f   :  { %387 = dma.hbm_to_vmem [thread:$0]  %s375_s19, 16, %s385_s28, [#allocation4 + $0x3] }
 0x220   :  { %s855_s26 = sshll.u32 %s2107_s14, 4  ;;  %s1684_s29 = smov [#allocation3 + $0x1a]  }
 0x221   :  { %s416_s27 = sshll.u32 %s1684_s29, 4  ;;  %s391_s8 = scalar_lea.hbm %s2227_s4, %s855_s26  ;;  %s2127_s27 = int_to_ptr.vmem [resolvable:$true] %s416_s27 }
 0x222   :  { %s1502_s10 = scalar_lea.hbm %s391_s8, 16  ;;  %p1505_p10 = scmp.lt.u32.totalorder %s391_s8, %s2227_s4 }
 0x223   :  { %p1503_p9 = scmp.ne.s32.totalorder %s391_s8, %s1502_s10  ;;  %p1506_p11 = scmp.lt.u32.totalorder %s1779_s13, %s1502_s10 }
 0x224   :  { %p1508_p13 = scmp.lt.u32.totalorder %s1502_s10, %s391_s8 }
 0x225   :  { %p1507_p12 = por %p1506_p11, %p1505_p10 }
 0x227   :  { %p1509_p0 = por %p1508_p13, %p1507_p12 }
 0x229   :  { %p1510_p1 = pnand %p1509_p0, %p1503_p9 }
 0x22b   :  { %1513 = shalt.err (!%p1510_p1)  }
 0x22c   :  { %s1514_s2 = scalar_lea.vmem %s2112_s17, 16  ;;  %p1519_p3 = scmp.lt.s32.totalorder %s2112_s17, %s1744_s15 }
 0x22d   :  { %p1515_p2 = scmp.ne.s32.totalorder %s2112_s17, %s1514_s2  ;;  %p1520_p4 = scmp.lt.s32.totalorder %s1788_s20, %s1514_s2 }
 0x22f   :  { %p1521_p5 = por %p1520_p4, %p1519_p3 }
 0x231   :  { %p1522_p6 = pnand %p1521_p5, %p1515_p2 }
 0x233   :  { %1525 = shalt.err (!%p1522_p6)  }
 0x234   :  { %403 = dma.hbm_to_vmem [thread:$0]  %s391_s8, 16, %s2112_s17, [#allocation4 + $0x3] }
 0x235   :  { %s857_s1 = sshll.u32 %s2109_s16, 4  ;;  %s2140_s18 = sld [smem:[#allocation8 + $0x11]] }
 0x236   :  { %s407_s14 = scalar_lea.hbm %s2227_s4, %s857_s1 }
 0x237   :  { %s1526_s11 = scalar_lea.hbm %s407_s14, 16  ;;  %p1529_p8 = scmp.lt.u32.totalorder %s407_s14, %s2227_s4 }
 0x238   :  { %p1527_p7 = scmp.ne.s32.totalorder %s407_s14, %s1526_s11  ;;  %p1530_p9 = scmp.lt.u32.totalorder %s1779_s13, %s1526_s11 }
 0x239   :  { %p1532_p11 = scmp.lt.u32.totalorder %s1526_s11, %s407_s14 }
 0x23a   :  { %p1531_p10 = por %p1530_p9, %p1529_p8 }
 0x23c   :  { %p1533_p12 = por %p1532_p11, %p1531_p10 }
 0x23e   :  { %p1534_p13 = pnand %p1533_p12, %p1527_p7 }
 0x240   :  { %1537 = shalt.err (!%p1534_p13)  }
 0x241   :  { %s1538_s17 = scalar_lea.vmem %s2127_s27, 16  ;;  %p1543_p1 = scmp.lt.s32.totalorder %s2127_s27, %s1744_s15 }
 0x242   :  { %p1539_p0 = scmp.ne.s32.totalorder %s2127_s27, %s1538_s17  ;;  %p1544_p2 = scmp.lt.s32.totalorder %s1788_s20, %s1538_s17 }
 0x244   :  { %p1545_p3 = por %p1544_p2, %p1543_p1 }
 0x246   :  { %p1546_p4 = pnand %p1545_p3, %p1539_p0 }
 0x248   :  { %1549 = shalt.err (!%p1546_p4)  }
 0x249   :  { %419 = dma.hbm_to_vmem [thread:$0]  %s407_s14, 16, %s2127_s27, [#allocation4 + $0x3] }
 0x24a   :  { %s1685_s16 = smov [#allocation3 + $0x1b]   ;;  %s2155_s19 = sld [smem:[#allocation8 + $0x12]] }
 0x24b   :  { %s432_s7 = sshll.u32 %s1685_s16, 4  ;;  %s1686_s23 = smov [#allocation3 + $0x1c]   ;;  %s433_s7 = int_to_ptr.vmem [resolvable:$true] %s432_s7 }
 0x24c   :  { %s448_s25 = sshll.u32 %s1686_s23, 4  ;;  %s2157_s22 = sld [smem:[#allocation8 + $0x13]]  ;;  %s2160_s25 = int_to_ptr.vmem [resolvable:$true] %s448_s25 }
 0x24d   :  { %s859_s24 = sshll.u32 %s2140_s18, 4 }
 0x24e   :  { %s423_s30 = scalar_lea.hbm %s2227_s4, %s859_s24 }
 0x24f   :  { %s1550_s6 = scalar_lea.hbm %s423_s30, 16  ;;  %p1553_p6 = scmp.lt.u32.totalorder %s423_s30, %s2227_s4 }
 0x250   :  { %p1551_p5 = scmp.ne.s32.totalorder %s423_s30, %s1550_s6  ;;  %p1554_p7 = scmp.lt.u32.totalorder %s1779_s13, %s1550_s6 }
 0x251   :  { %p1556_p9 = scmp.lt.u32.totalorder %s1550_s6, %s423_s30 }
 0x252   :  { %p1555_p8 = por %p1554_p7, %p1553_p6 }
 0x254   :  { %p1557_p10 = por %p1556_p9, %p1555_p8 }
 0x256   :  { %p1558_p11 = pnand %p1557_p10, %p1551_p5 }
 0x258   :  { %1561 = shalt.err (!%p1558_p11)  }
 0x259   :  { %s1562_s10 = scalar_lea.vmem %s433_s7, 16  ;;  %p1567_p13 = scmp.lt.s32.totalorder %s433_s7, %s1744_s15 }
 0x25a   :  { %p1563_p12 = scmp.ne.s32.totalorder %s433_s7, %s1562_s10  ;;  %p1568_p0 = scmp.lt.s32.totalorder %s1788_s20, %s1562_s10 }
 0x25c   :  { %p1569_p1 = por %p1568_p0, %p1567_p13 }
 0x25e   :  { %p1570_p2 = pnand %p1569_p1, %p1563_p12 }
 0x260   :  { %1573 = shalt.err (!%p1570_p2)  }
 0x261   :  { %435 = dma.hbm_to_vmem [thread:$0]  %s423_s30, 16, %s433_s7, [#allocation4 + $0x3] }
 0x262   :  { %s861_s9 = sshll.u32 %s2155_s19, 4  ;;  %s1687_s0 = smov [#allocation3 + $0x1d]  }
 0x263   :  { %s464_s2 = sshll.u32 %s1687_s0, 4  ;;  %s439_s3 = scalar_lea.hbm %s2227_s4, %s861_s9  ;;  %s2175_s2 = int_to_ptr.vmem [resolvable:$true] %s464_s2 }
 0x264   :  { %s1574_s28 = scalar_lea.hbm %s439_s3, 16  ;;  %p1577_p4 = scmp.lt.u32.totalorder %s439_s3, %s2227_s4 }
 0x265   :  { %p1575_p3 = scmp.ne.s32.totalorder %s439_s3, %s1574_s28  ;;  %p1578_p5 = scmp.lt.u32.totalorder %s1779_s13, %s1574_s28 }
 0x266   :  { %p1580_p7 = scmp.lt.u32.totalorder %s1574_s28, %s439_s3 }
 0x267   :  { %p1579_p6 = por %p1578_p5, %p1577_p4 }
 0x269   :  { %p1581_p8 = por %p1580_p7, %p1579_p6 }
 0x26b   :  { %p1582_p9 = pnand %p1581_p8, %p1575_p3 }
 0x26d   :  { %1585 = shalt.err (!%p1582_p9)  }
 0x26e   :  { %s1586_s21 = scalar_lea.vmem %s2160_s25, 16  ;;  %p1591_p11 = scmp.lt.s32.totalorder %s2160_s25, %s1744_s15 }
 0x26f   :  { %p1587_p10 = scmp.ne.s32.totalorder %s2160_s25, %s1586_s21  ;;  %p1592_p12 = scmp.lt.s32.totalorder %s1788_s20, %s1586_s21 }
 0x271   :  { %p1593_p13 = por %p1592_p12, %p1591_p11 }
 0x273   :  { %p1594_p0 = pnand %p1593_p13, %p1587_p10 }
 0x275   :  { %1597 = shalt.err (!%p1594_p0)  }
 0x276   :  { %451 = dma.hbm_to_vmem [thread:$0]  %s439_s3, 16, %s2160_s25, [#allocation4 + $0x3] }
 0x277   :  { %s863_s12 = sshll.u32 %s2157_s22, 4 }
 0x278   :  { %s455_s7 = scalar_lea.hbm %s2227_s4, %s863_s12 }
 0x279   :  { %s1598_s19 = scalar_lea.hbm %s455_s7, 16  ;;  %p1601_p2 = scmp.lt.u32.totalorder %s455_s7, %s2227_s4 }
 0x27a   :  { %p1599_p1 = scmp.ne.s32.totalorder %s455_s7, %s1598_s19  ;;  %p1602_p3 = scmp.lt.u32.totalorder %s1779_s13, %s1598_s19 }
 0x27b   :  { %p1604_p5 = scmp.lt.u32.totalorder %s1598_s19, %s455_s7 }
 0x27c   :  { %p1603_p4 = por %p1602_p3, %p1601_p2 }
 0x27e   :  { %p1605_p6 = por %p1604_p5, %p1603_p4 }
 0x280   :  { %p1606_p7 = pnand %p1605_p6, %p1599_p1 }
 0x282   :  { %1609 = shalt.err (!%p1606_p7)  }
 0x283   :  { %s1610_s25 = scalar_lea.vmem %s2175_s2, 16  ;;  %p1615_p9 = scmp.lt.s32.totalorder %s2175_s2, %s1744_s15 }
 0x284   :  { %p1611_p8 = scmp.ne.s32.totalorder %s2175_s2, %s1610_s25  ;;  %p1616_p10 = scmp.lt.s32.totalorder %s1788_s20, %s1610_s25 }
 0x286   :  { %p1617_p11 = por %p1616_p10, %p1615_p9 }
 0x288   :  { %p1618_p12 = pnand %p1617_p11, %p1611_p8 }
 0x28a   :  { %1621 = shalt.err (!%p1618_p12)  }
 0x28b   :  { %467 = dma.hbm_to_vmem [thread:$0]  %s455_s7, 16, %s2175_s2, [#allocation4 + $0x3] }
 0x28c   :  { %1646 = dma.done.wait [#allocation4], 112 }
 0x28d   :  { %1647 = vsyncadd [#allocation4], 4294967184 }
 0x28e   :  { %1648 = dma.done.wait [#allocation4 + $0x1], 112 }
 0x28f   :  { %1649 = vsyncadd [#allocation4 + $0x1], 4294967184 }
 0x290   :  { %1650 = dma.done.wait [#allocation4 + $0x2], 112 }
 0x291   :  { %1651 = vsyncadd [#allocation4 + $0x2], 4294967184 }
 0x292   :  { %1652 = dma.done.wait [#allocation4 + $0x3], 112 }
 0x293   :  { %1653 = vsyncadd [#allocation4 + $0x3], 4294967184  ;;  %v542_v1 = vlaneseq  ;;  %v1688_v2 = vmov 1966171168   ;;  %v526_v11 = vld [vmem:[#allocation3] sm:$0x3f] }
 0x294   :  { %v540_v3 = vunpack.c.l.s4 %v1688_v2  ;;  %v864_v8 = vld.sshfl [vmem:[#allocation2] sm:$0x33 pattern:$0x75316420]  ;;  %vm579_vm0 = vcmask 1045504   ;;  %vm619_vm1 = vcmask 1041409  }
 0x295   :  { %v2201_v4 = vshrl.u32 %v542_v1, 7  ;;  %v538_v10 = vcombine.high %v864_v8, %v864_v8  ;;  %v528_v15 = vld [vmem:[#allocation3 + $0x10] sm:$0x3f]  ;;  %v527_v16 = vld [vmem:[#allocation3 + $0x8] sm:$0x3f]  ;;  %v593_v30 = vand.u32 127, %v542_v1 }
 0x296   :  { %v541_v5 = vunpack.c.0.s8 %v540_v3  ;;  %v529_v21 = vld [vmem:[#allocation3 + $0x18] sm:$0x3f]  ;;  %vm621_vm2 = vcmask 1042434   ;;  %vm623_vm3 = vcmask 1043459   ;;  %vm660_vm5 = vcmask 44032   ;;  %s1689_s4 = smov [#allocation9]  }
 0x297   :  { %v557_v7 = vsub.s32 0, %v2201_v4  ;;  %v605_v32 = vsub.s32 %v593_v30, %v2201_v4  ;;  %vm594_vm4 = vcmp.eq.s32.totalorder %v593_v30, 0  ;;  %vm669_vm6 = vcmp.lt.s32.totalorder %v2201_v4, 4  ;;  %s692_s15 = sshll.u32 %s1689_s4, 4  ;;  %s693_s15 = int_to_ptr.vmem [resolvable:$true] %s692_s15 }
 0x298   :  { %v544_v6 = vsub.s32 %v541_v5, %v2201_v4  ;;  %vm672_vm7 = vcmask 3072   ;;  %s1622_s20 = scalar_lea.vmem %s693_s15, 128  ;;  %p1627_p0 = scmp.lt.s32.totalorder %s693_s15, %s693_s15 }
 0x299   :  { %p1623_p13 = scmp.ne.s32.totalorder %s693_s15, %s1622_s20  ;;  %p1628_p1 = scmp.lt.s32.totalorder %s1622_s20, %s1622_s20 }
 0x29a   :  { %v545_v9 = vrot.slane %v864_v8, %v544_v6  ;;  %v552_v14 = vrot.slane %v538_v10, %v544_v6 }
 0x29b   :  { %p1629_p2 = por %p1628_p1, %p1627_p0 }
 0x29c   :  { %v558_v12 = vrot.slane %v545_v9, %v557_v7  ;;  %v553_v13 = vcombine.high %v545_v9, %v545_v9  ;;  %v562_v19 = vrot.slane %v552_v14, %v557_v7  ;;  %v554_v20 = vcombine.high %v552_v14, %v552_v14 }
 0x29d   :  { %p1630_p3 = pnand %p1629_p2, %p1623_p13 }
 0x29e   :  { %v575_v17 = vmul.f32 %v558_v12, %v526_v11  ;;  %v566_v18 = vrot.slane %v553_v13, %v557_v7  ;;  %v576_v24 = vmul.f32 %v562_v19, %v527_v16  ;;  %v570_v25 = vrot.slane %v554_v20, %v557_v7  ;;  %v671_v11 = vld [vmem:[#allocation9] sm:$0xff] }
 0x2a0   :  { %v580_v22 = vsel %vm579_vm0, %v575_v17, 0.0  ;;  %v577_v23 = vmul.f32 %v566_v18, %v528_v15  ;;  %v583_v27 = vsel %vm579_vm0, %v576_v24, 0.0  ;;  %v578_v28 = vmul.f32 %v570_v25, %v529_v21 }
 0x2a1   :  { %581 = vadd.xlane.f32.xlu0 %v580_v22 }
 0x2a2   :  { %v586_v26 = vsel %vm579_vm0, %v577_v23, 0.0  ;;  %v589_v29 = vsel %vm579_vm0, %v578_v28, 0.0 }
 0x2a3   :  { %587 = vadd.xlane.f32.xlu1 %v586_v26 }
 0x2a5   :  { %584 = vadd.xlane.f32.xlu0 %v583_v27 }
 0x2a7   :  { %590 = vadd.xlane.f32.xlu1 %v589_v29 }
 0x32e   :  { %v582_v31 = vpop.xlane.xlu0 %581 }
 0x32f   :  { %v595_v33 = vsub.f32 0.0, %v582_v31  ;;  %v606_v37 = vrot.slane %v582_v31, %v605_v32 }
 0x330   :  { %v588_v34 = vpop.xlane.xlu1 %587 }
 0x331   :  { %v597_v35 = vsub.f32 0.0, %v588_v34  ;;  %v633_v40 = vrot.slane %v595_v33, %v605_v32  ;;  %v614_v41 = vrot.slane %v588_v34, %v605_v32 }
 0x332   :  { %v585_v36 = vpop.xlane.xlu0 %584 }
 0x333   :  { %v596_v38 = vsub.f32 0.0, %v585_v36  ;;  %v610_v39 = vrot.slane %v585_v36, %v605_v32  ;;  %v641_v47 = vrot.slane %v597_v35, %v605_v32 }
 0x334   :  { %v591_v42 = vpop.xlane.xlu1 %590 }
 0x335   :  { %v620_v43 = vsel %vm619_vm1, %v610_v39, %v606_v37  ;;  %v637_v44 = vrot.slane %v596_v38, %v605_v32  ;;  %v598_v45 = vsub.f32 0.0, %v591_v42  ;;  %v618_v46 = vrot.slane %v591_v42, %v605_v32 }
 0x336   :  { %v622_v48 = vsel %vm621_vm2, %v614_v41, %v620_v43 }
 0x337   :  { %v646_v49 = vsel %vm619_vm1, %v637_v44, %v633_v40  ;;  %v645_v50 = vrot.slane %v598_v45, %v605_v32  ;;  %v624_v52 = vsel %vm623_vm3, %v618_v46, %v622_v48 }
 0x338   :  { %v647_v51 = vsel %vm621_vm2, %v641_v47, %v646_v49 }
 0x339   :  { %v648_v53 = vsel %vm623_vm3, %v645_v50, %v647_v51 }
 0x33a   :  { %v650_v54 = vsel %vm594_vm4, %v624_v52, %v648_v53 }
 0x33b   :  { %v865_v55 = vmul.f32 -1.442695, %v650_v54 }
 0x33d   :  { %910 = vpow2.f32 %v865_v55 }
 0x347   :  { %v911_v56 = vpop.eup %910 }
 0x348   :  { %v654_v57 = vadd.f32 1.0, %v911_v56 }
 0x34a   :  { %912 = vrcp.f32 %v654_v57 }
 0x354   :  { %v913_v58 = vpop.eup %912 }
 0x355   :  { %v657_v59 = vadd.f32 1e-10, %v913_v58 }
 0x357   :  { %914 = vlog2.f32 %v657_v59 }
 0x361   :  { %v915_v60 = vpop.eup %914 }
 0x362   :  { %v659_v61 = vmul.f32 0.6931472, %v915_v60 }
 0x364   :  { %v661_v62 = vsel %vm660_vm5, %v659_v61, 0.0 }
 0x365   :  { %662 = vadd.xlane.f32.xlu0 %v661_v62 }
 0x3f2   :  { %v663_v63 = vpop.xlane.xlu0 %662 }
 0x3f3   :  { %v664_v0 = vsub.f32 0.0, %v663_v63 }
 0x3f5   :  { %v670_v1 = vsel %vm669_vm6, %v664_v0, 0.0 }
 0x3f6   :  { %v673_v2 = vsel %vm672_vm7, %v670_v1, 0.0 }
 0x3f7   :  { %674 = vadd.xlane.f32.xlu1 %v673_v2 }
 0x484   :  { %v675_v3 = vpop.xlane.xlu1 %674 }
 0x485   :  { %v676_v5 = vrot.slane %v675_v3, 4 }
 0x487   :  { %v677_v6 = vadd.f32 %v676_v5, %v675_v3 }
 0x489   :  { %v678_v7 = vrot.slane %v677_v6, 2 }
 0x48b   :  { %v679_v8 = vadd.f32 %v678_v7, %v677_v6 }
 0x48d   :  { %v680_v9 = vrot.slane %v679_v8, 1 }
 0x48f   :  { %v681_v10 = vadd.f32 %v680_v9, %v679_v8 }
 0x491   :  { %874 = vpush %v681_v10 }
 0x4c2   :  { %s875_s13 = spop %874 }
 0x4c3   :  { %v683_v12 = vstv %s875_s13 }
 0x4c4   :  { %v684_v13 = vadd.f32 %v683_v12, %v671_v11 }
 0x4c6   :  { %685 = vst [vmem:[#allocation9] sm:$0xff] %v684_v13 }
 0x4c7   :  { %1633 = shalt.err (!%p1630_p3)
}
 0x4c8   :  { %s1634_s29 = scalar_lea.hbm %s2228_s5, 128 }
 0x4c9   :  { %p1635_p4 = scmp.ne.s32.totalorder %s2228_s5, %s1634_s29  ;;  %p1638_p5 = scmp.lt.u32.totalorder %s1634_s29, %s2228_s5 }
 0x4cb   :  { %p1640_p6 = pnand %p1638_p5, %p1635_p4 }
 0x4cd   :  { %1643 = shalt.err (!%p1640_p6)
}
 0x4ce   :  { %695 = dma.vmem_to_hbm [thread:$0]  %s693_s15, 128, %s2228_s5, [#allocation10]  }
 0x4cf   :  { %1654 = dma.done.wait [#allocation10], 128  }
 0x4d0   :  { %1655 = vsyncadd [#allocation10], 4294967168 }
 0x4d1   :  { %699 = vsyncpa [#allocation10], 1 }
 0x4d2   :  { %700 = vsyncmov [#allocation4] }
 0x4d5   :  { %s701_s0 = vpop.sfrf %700 }
 0x4d6   :  { %p866_p7 = scmp.ne.s32.totalorder %s701_s0, 0 }
 0x4d8   :  { %705 = shalt.err (%p866_p7)  }
 0x4d9   :  { %707 = vsyncmov [#allocation4 + $0x1] }
 0x4dc   :  { %s708_s2 = vpop.sfrf %707 }
 0x4dd   :  { %p867_p8 = scmp.ne.s32.totalorder %s708_s2, 0 }
 0x4df   :  { %712 = shalt.err (%p867_p8)  }
 0x4e0   :  { %714 = vsyncmov [#allocation4 + $0x2] }
 0x4e3   :  { %s715_s1 = vpop.sfrf %714 }
 0x4e4   :  { %p868_p9 = scmp.ne.s32.totalorder %s715_s1, 0 }
 0x4e6   :  { %719 = shalt.err (%p868_p9)  }
 0x4e7   :  { %721 = vsyncmov [#allocation4 + $0x3] }
 0x4ea   :  { %s722_s18 = vpop.sfrf %721 }
 0x4eb   :  { %p869_p10 = scmp.ne.s32.totalorder %s722_s18, 0 }
 0x4ed   :  { %726 = shalt.err (%p869_p10)  }
 0x4ee   :  { %728 = vsyncmov [#allocation4 + $0x4] }
 0x4f1   :  { %s729_s5 = vpop.sfrf %728 }
 0x4f2   :  { %p870_p11 = scmp.ne.s32.totalorder %s729_s5, 0 }
 0x4f4   :  { %733 = shalt.err (%p870_p11)  }
 0x4f5   :  { %735 = vsyncmov [#allocation4 + $0x5] }
 0x4f8   :  { %s736_s3 = vpop.sfrf %735 }
 0x4f9   :  { %p871_p12 = scmp.ne.s32.totalorder %s736_s3, 0 }
 0x4fb   :  { %740 = shalt.err (%p871_p12)  }
 0x4fc   :  { %742 = vsyncmov [#allocation4 + $0x6] }
 0x4ff   :  { %s743_s28 = vpop.sfrf %742 }
 0x500   :  { %p872_p13 = scmp.ne.s32.totalorder %s743_s28, 0 }
 0x502   :  { %747 = shalt.err (%p872_p13)  }
 0x503   :  { %749 = vsyncmov [#allocation4 + $0x7] }
 0x506   :  { %s750_s14 = vpop.sfrf %749 }
 0x507   :  { %p873_p0 = scmp.ne.s32.totalorder %s750_s14, 0 }
 0x509   :  { %754 = shalt.err (%p873_p0)  }

</bundles_post_ra>
